<compile_context>
chip_gen: v7x
topology: tpu7x:2x2x1
jax: 0.10.0
libtpu: 0.0.40
codegen_flags: <defaults>
</compile_context>

<pallas_src>
import functools

import jax
import jax.numpy as jnp
import numpy as np
from jax.experimental import pallas as pl
from jax.experimental.pallas import tpu as pltpu

EPS = 1e-5  # nn.InstanceNorm2d default


def _resnet_block_kernel(x_ref, w1_ref, b1_ref, w2_ref, b2_ref, o_ref, *,
                         compute_dtype):
    # x_ref: (1, H, W, C)   w*_ref: (3*C, 3*C)   b*_ref: (1, C)   o_ref: (1, H, W, C)
    _, H, W, C = x_ref.shape
    # Reflect-padded width rounded up to a sublane multiple: the flattened image
    # is tile-aligned and the 3 dh-shifted im2col views start at multiples of
    # WPP (sublane-aligned).  Columns >= W are junk and dropped post-matmul.
    WPP = ((W + 2 + 7) // 8) * 8
    HPP = H + 2
    L = H * WPP                      # matmul rows (includes WPP - W junk cols per row)

    def conv3x3(a, w_ref, b_ref):
        # a: (H, W, C).  Cast at the matmul boundary only; the pad/flatten work
        # below is pure data movement (bytes halved in bf16).
        a = a.astype(compute_dtype)
        # ReflectionPad2d(1), built as one value (no masked scratch stores).
        rows = jnp.concatenate([a[1:2], a, a[H - 2:H - 1]], axis=0)       # (HPP, W, C)
        right = jnp.broadcast_to(rows[:, W - 2:W - 1, :],
                                 (HPP, WPP - W - 1, C))                   # reflect col + junk cols
        pad = jnp.concatenate([rows[:, 1:2, :], rows, right], axis=1)     # (HPP, WPP, C)
        flat = pad.reshape(HPP * WPP, C)                                  # row-major, 8-aligned rows

        # dh-stacked im2col: 3 contiguous, sublane-aligned views -> (L, 3C).
        col3 = jnp.concatenate(
            [flat[dh * WPP: dh * WPP + L, :] for dh in range(3)], axis=1)
        # One MXU matmul; the 3 dw taps live in the weight's output axis (N = 3C).
        y3 = jnp.dot(col3, w_ref[...], preferred_element_type=jnp.float32)  # (L, 3C) fp32
        y3 = y3.reshape(H, WPP, 3 * C)
        # Recombine dw slabs: output column w needs slab dw evaluated at w + dw
        # (always within the same padded row since w + 2 <= W + 1 < WPP).  The
        # junk columns are dropped here, before bias / IN stats / residual.
        y = (y3[:, 0:W, 0:C]
             + y3[:, 1:W + 1, C:2 * C]
             + y3[:, 2:W + 2, 2 * C:3 * C]
             + b_ref[0, :])
        return y                                                           # (H, W, C) fp32

    def instance_norm(y):
        # Per-channel stats over H*W (biased variance), single fused pass.
        inv_n = 1.0 / float(H * W)
        s = jnp.sum(y, axis=(0, 1), keepdims=True)
        ss = jnp.sum(y * y, axis=(0, 1), keepdims=True)
        m = s * inv_n
        v = jnp.maximum(ss * inv_n - m * m, 0.0)
        return (y - m) * jax.lax.rsqrt(v + EPS)

    h = jnp.maximum(instance_norm(conv3x3(x_ref[0], w1_ref, b1_ref)), 0.0)  # ReLU
    # TODO(synk): use_dropout=True path (nn.Dropout(0.5)) not implemented; this
    # block is configured with use_dropout=False.
    h = instance_norm(conv3x3(h, w2_ref, b2_ref))
    # Residual add: x is re-read here rather than kept live across both convs.
    o_ref[0] = (x_ref[0].astype(jnp.float32) + h).astype(o_ref.dtype)


def _pick_vmem_limit(estimate_bytes):
    """Scoped-VMEM request: sized to the kernel footprint, capped per chip.

    Requesting the full physical VMEM (64 MiB on v7x) leaves no headroom for
    double-buffered I/O blocks and compiler temporaries, so cap at 3/4 of the
    physical capacity (128 MiB on v5e/v6e, 64 MiB on v7x).
    """
    phys = 64 * 1024 * 1024
    try:
        phys = int(getattr(pltpu.get_tpu_info(), "vmem_capacity_bytes", phys))
    except Exception:
        pass
    cap = (3 * phys) // 4
    want = 4 * int(estimate_bytes) + (8 << 20)   # generous margin over the estimate
    return int(min(max(want, 16 << 20), cap))


def resnet_block_nhwc(x, w1, b1, w2, b2, *, compute_dtype=jnp.bfloat16):
    """x: (N, H, W, C); w*: (Cout, Cin, 3, 3) PyTorch OIHW; b*: (C,)."""
    N, H, W, C = x.shape

    def stack_w(w):
        # (Cout, Cin, kh, kw) -> (kh, Cin, kw, Cout) -> (3*Cin, 3*Cout).
        # Row dh*C + ci pairs with im2col dh-block; column dw*C + co pairs with
        # the dw output slab recombined after the matmul.  Pre-cast so no
        # per-grid-step weight cast happens inside the kernel.
        return jnp.transpose(w, (2, 1, 3, 0)).reshape(3 * C, 3 * C).astype(compute_dtype)

    w1s, w2s = stack_w(w1), stack_w(w2)
    # Biases stay fp32: they are added to the fp32 accumulator.
    b1r = b1.reshape(1, C).astype(jnp.float32)
    b2r = b2.reshape(1, C).astype(jnp.float32)

    # Rough per-grid-step VMEM footprint for the scoped-VMEM request.
    WPP = ((W + 2 + 7) // 8) * 8
    L = H * WPP
    cb = np.dtype(compute_dtype).itemsize
    xb = np.dtype(x.dtype).itemsize
    est = (4 * H * W * C * xb            # double-buffered input + output blocks
           + 4 * 9 * C * C * cb          # two resident (3C,3C) weights (+ revolving buf)
           + (H + 2) * WPP * C * cb      # reflect-padded activation
           + 3 * L * C * cb              # im2col (L, 3C)
           + 3 * L * C * 4               # matmul result (L, 3C) fp32
           + 4 * H * W * C * 4)          # conv / IN / residual fp32 temporaries

    kernel = functools.partial(_resnet_block_kernel, compute_dtype=compute_dtype)
    return pl.pallas_call(
        kernel,
        out_shape=jax.ShapeDtypeStruct((N, H, W, C), x.dtype),
        grid_spec=pltpu.PrefetchScalarGridSpec(
            num_scalar_prefetch=0,
            grid=(N,),  # one batch image per grid step
            # TODO(synk): at production CycleGAN sizes (64x64x256) on v7x, add a
            # row-tile grid axis with two-pass IN stats (conv -> stats,
            # normalize -> conv -> stats, finalize) to bound VMEM independent of
            # H and to give the megacore work to split when N == 1.
            in_specs=[
                pl.BlockSpec((1, H, W, C), lambda n: (n, 0, 0, 0)),
                # Constant block indices: weights/biases fetched once, resident
                # across the batch loop (per-buffer size is negligible here, so
                # no single-buffering override is requested).
                pl.BlockSpec((3 * C, 3 * C), lambda n: (0, 0)),
                pl.BlockSpec((1, C), lambda n: (0, 0)),
                pl.BlockSpec((3 * C, 3 * C), lambda n: (0, 0)),
                pl.BlockSpec((1, C), lambda n: (0, 0)),
            ],
            out_specs=pl.BlockSpec((1, H, W, C), lambda n: (n, 0, 0, 0)),
        ),
        compiler_params=pltpu.CompilerParams(
            dimension_semantics=("parallel",),       # batch axis is independent
            vmem_limit_bytes=_pick_vmem_limit(est)),
    )(x, w1s, b1r, w2s, b2r)


def resnet_block(x_nchw, w1, b1, w2, b2, *, compute_dtype=jnp.bfloat16):
    """NCHW wrapper matching the PyTorch module interface.

    If the surrounding model keeps activations in NHWC, call resnet_block_nhwc
    directly and skip these two full-array HBM transposes (they cost a full HBM
    round trip of the activation tensor per block).
    """
    x = jnp.transpose(x_nchw, (0, 2, 3, 1))  # -> NHWC (channels on the lane axis)
    out = resnet_block_nhwc(x, w1, b1, w2, b2, compute_dtype=compute_dtype)
    return jnp.transpose(out, (0, 3, 1, 2))  # back to NCHW


def _reference_forward(x, w1, b1, w2, b2):
    """Pure-JAX reference matching the PyTorch module semantics (NCHW, fp32)."""
    def conv_block(h, w, b):
        hp = jnp.pad(h, ((0, 0), (0, 0), (1, 1), (1, 1)), mode="reflect")
        y = jax.lax.conv_general_dilated(
            hp, w, window_strides=(1, 1), padding="VALID",
            dimension_numbers=("NCHW", "OIHW", "NCHW"),
            precision=jax.lax.Precision.HIGHEST)
        return y + b[None, :, None, None]

    def inorm(y):
        m = y.mean(axis=(2, 3), keepdims=True)
        v = ((y - m) ** 2).mean(axis=(2, 3), keepdims=True)
        return (y - m) * jax.lax.rsqrt(v + EPS)

    h = jax.nn.relu(inorm(conv_block(x, w1, b1)))
    h = inorm(conv_block(h, w2, b2))
    return x + h


if __name__ == "__main__":
    # dim=128: channel axis exactly fills the 128-lane vreg (lane-dense layout),
    # matching the real CycleGAN ResnetBlock channel counts.
    N, C, H, W = 2, 128, 16, 16

    key = jax.random.PRNGKey(0)
    kx, kw1, kb1, kw2, kb2 = jax.random.split(key, 5)
    x = jax.random.normal(kx, (N, C, H, W), dtype=jnp.float32)
    w1 = jax.random.normal(kw1, (C, C, 3, 3), dtype=jnp.float32) * 0.05
    b1 = jax.random.normal(kb1, (C,), dtype=jnp.float32) * 0.1
    w2 = jax.random.normal(kw2, (C, C, 3, 3), dtype=jnp.float32) * 0.05
    b2 = jax.random.normal(kb2, (C,), dtype=jnp.float32) * 0.1

    ref = jax.block_until_ready(_reference_forward(x, w1, b1, w2, b2))

    # fp32 MXU-operand path: tight check that the kernel math matches the module.
    out_f32 = jax.block_until_ready(
        resnet_block(x, w1, b1, w2, b2, compute_dtype=jnp.float32))
    assert out_f32.shape == ref.shape and out_f32.dtype == ref.dtype
    assert jnp.allclose(out_f32, ref, rtol=2e-3, atol=2e-3), (
        f"fp32 max abs err {jnp.max(jnp.abs(out_f32 - ref))}")

    # Default bf16 MXU-operand path (fp32 accumulation / stats): loose tolerance.
    out_bf16 = jax.block_until_ready(resnet_block(x, w1, b1, w2, b2))
    assert out_bf16.shape == ref.shape and out_bf16.dtype == ref.dtype
    assert jnp.allclose(out_bf16, ref, rtol=5e-2, atol=2e-1), (
        f"bf16 max abs err {jnp.max(jnp.abs(out_bf16 - ref))}")

    print("KERNEL_OK")
</pallas_src>

<mosaic_0001>
module attributes {stable_mosaic.version = 11 : i64} {
  func.func @_resnet_block_kernel(%arg0: i32, %arg1: memref<1x16x16x128xf32, #tpu.memory_space<vmem>>, %arg2: memref<384x384xf32, #tpu.memory_space<vmem>>, %arg3: memref<1x128xf32, #tpu.memory_space<vmem>>, %arg4: memref<384x384xf32, #tpu.memory_space<vmem>>, %arg5: memref<1x128xf32, #tpu.memory_space<vmem>>, %arg6: memref<1x16x16x128xf32, #tpu.memory_space<vmem>>) attributes {dimension_semantics = [#tpu.dimension_semantics<parallel>], iteration_bounds = array<i64: 2>, scalar_prefetch = 0 : i64, scratch_operands = 0 : i64, tpu.core_type = #tpu.core_type<tc>, window_params = [{transform_indices = @transform_0, window_bounds = array<i64: 1, 16, 16, 128>}, {pipeline_mode = #tpu.pipeline_mode<synchronous>, transform_indices = @transform_1, window_bounds = array<i64: 384, 384>}, {pipeline_mode = #tpu.pipeline_mode<synchronous>, transform_indices = @transform_2, window_bounds = array<i64: 1, 128>}, {pipeline_mode = #tpu.pipeline_mode<synchronous>, transform_indices = @transform_3, window_bounds = array<i64: 384, 384>}, {pipeline_mode = #tpu.pipeline_mode<synchronous>, transform_indices = @transform_4, window_bounds = array<i64: 1, 128>}, {transform_indices = @transform_5, window_bounds = array<i64: 1, 16, 16, 128>}]} {
    %c0 = arith.constant 0 : index
    %c0_0 = arith.constant 0 : index
    %c0_1 = arith.constant 0 : index
    %c0_2 = arith.constant 0 : index
    %0 = vector.load %arg1[%c0, %c0_0, %c0_1, %c0_2] : memref<1x16x16x128xf32, #tpu.memory_space<vmem>>, vector<1x16x16x128xf32>
    %1 = vector.shape_cast %0 : vector<1x16x16x128xf32> to vector<16x16x128xf32>
    %2 = vector.extract_strided_slice %1 {offsets = [1, 0, 0], sizes = [1, 16, 128], strides = [1, 1, 1]} : vector<16x16x128xf32> to vector<1x16x128xf32>
    %3 = vector.extract_strided_slice %1 {offsets = [14, 0, 0], sizes = [1, 16, 128], strides = [1, 1, 1]} : vector<16x16x128xf32> to vector<1x16x128xf32>
    %4 = tpu.concatenate %2, %1, %3 in 0 : vector<1x16x128xf32>, vector<16x16x128xf32>, vector<1x16x128xf32> -> vector<18x16x128xf32>
    %5 = vector.extract_strided_slice %4 {offsets = [0, 14, 0], sizes = [18, 1, 128], strides = [1, 1, 1]} : vector<18x16x128xf32> to vector<18x1x128xf32>
    %6 = vector.shape_cast %5 : vector<18x1x128xf32> to vector<18x1x128xf32>
    %7 = vector.broadcast %6 : vector<18x1x128xf32> to vector<18x7x128xf32>
    %8 = vector.extract_strided_slice %4 {offsets = [0, 1, 0], sizes = [18, 1, 128], strides = [1, 1, 1]} : vector<18x16x128xf32> to vector<18x1x128xf32>
    %9 = tpu.concatenate %8, %4, %7 in 1 : vector<18x1x128xf32>, vector<18x16x128xf32>, vector<18x7x128xf32> -> vector<18x24x128xf32>
    %10 = vector.shape_cast %9 : vector<18x24x128xf32> to vector<432x128xf32>
    %11 = vector.extract_strided_slice %10 {offsets = [0, 0], sizes = [384, 128], strides = [1, 1]} : vector<432x128xf32> to vector<384x128xf32>
    %12 = vector.extract_strided_slice %10 {offsets = [24, 0], sizes = [384, 128], strides = [1, 1]} : vector<432x128xf32> to vector<384x128xf32>
    %13 = vector.extract_strided_slice %10 {offsets = [48, 0], sizes = [384, 128], strides = [1, 1]} : vector<432x128xf32> to vector<384x128xf32>
    %14 = tpu.concatenate %11, %12, %13 in 1 : vector<384x128xf32>, vector<384x128xf32>, vector<384x128xf32> -> vector<384x384xf32>
    %c0_3 = arith.constant 0 : index
    %c0_4 = arith.constant 0 : index
    %15 = vector.load %arg2[%c0_3, %c0_4] : memref<384x384xf32, #tpu.memory_space<vmem>>, vector<384x384xf32>
    %cst = arith.constant dense<0.000000e+00> : vector<384x384xf32>
    %16 = tpu.matmul %14, %15, %cst {dimension_numbers = #tpu.dot_dimension_numbers<[1], [0], [0], [1], [0, 0, 1, 1], [], []>} : vector<384x384xf32>, vector<384x384xf32>, vector<384x384xf32> -> vector<384x384xf32>
    %17 = vector.shape_cast %16 : vector<384x384xf32> to vector<16x24x384xf32>
    %18 = vector.extract_strided_slice %17 {offsets = [0, 0, 0], sizes = [16, 16, 128], strides = [1, 1, 1]} : vector<16x24x384xf32> to vector<16x16x128xf32>
    %19 = vector.extract_strided_slice %17 {offsets = [0, 1, 128], sizes = [16, 16, 128], strides = [1, 1, 1]} : vector<16x24x384xf32> to vector<16x16x128xf32>
    %20 = arith.addf %18, %19 : vector<16x16x128xf32>
    %21 = vector.extract_strided_slice %17 {offsets = [0, 2, 256], sizes = [16, 16, 128], strides = [1, 1, 1]} : vector<16x24x384xf32> to vector<16x16x128xf32>
    %22 = arith.addf %20, %21 : vector<16x16x128xf32>
    %c0_5 = arith.constant 0 : index
    %c0_6 = arith.constant 0 : index
    %23 = vector.load %arg3[%c0_5, %c0_6] : memref<1x128xf32, #tpu.memory_space<vmem>>, vector<1x128xf32>
    %24 = vector.shape_cast %23 : vector<1x128xf32> to vector<128xf32>
    %25 = vector.shape_cast %24 : vector<128xf32> to vector<1x1x128xf32>
    %26 = vector.broadcast %25 : vector<1x1x128xf32> to vector<16x16x128xf32>
    %27 = arith.addf %22, %26 : vector<16x16x128xf32>
    %cst_7 = arith.constant dense<0.000000e+00> : vector<128xf32>
    %28 = vector.multi_reduction <add>, %27, %cst_7 [0, 1] : vector<16x16x128xf32> to vector<128xf32>
    %29 = vector.shape_cast %28 : vector<128xf32> to vector<1x1x128xf32>
    %30 = arith.mulf %27, %27 : vector<16x16x128xf32>
    %cst_8 = arith.constant dense<0.000000e+00> : vector<128xf32>
    %31 = vector.multi_reduction <add>, %30, %cst_8 [0, 1] : vector<16x16x128xf32> to vector<128xf32>
    %32 = vector.shape_cast %31 : vector<128xf32> to vector<1x1x128xf32>
    %cst_9 = arith.constant 3.906250e-03 : f32
    %33 = vector.broadcast %cst_9 : f32 to vector<1x1x128xf32>
    %34 = arith.mulf %29, %33 : vector<1x1x128xf32>
    %cst_10 = arith.constant 3.906250e-03 : f32
    %35 = vector.broadcast %cst_10 : f32 to vector<1x1x128xf32>
    %36 = arith.mulf %32, %35 : vector<1x1x128xf32>
    %37 = arith.mulf %34, %34 : vector<1x1x128xf32>
    %38 = arith.subf %36, %37 : vector<1x1x128xf32>
    %cst_11 = arith.constant 0.000000e+00 : f32
    %39 = vector.broadcast %cst_11 : f32 to vector<1x1x128xf32>
    %40 = arith.maximumf %38, %39 : vector<1x1x128xf32>
    %41 = vector.broadcast %34 : vector<1x1x128xf32> to vector<16x16x128xf32>
    %42 = arith.subf %27, %41 : vector<16x16x128xf32>
    %cst_12 = arith.constant 9.99999974E-6 : f32
    %43 = vector.broadcast %cst_12 : f32 to vector<1x1x128xf32>
    %44 = arith.addf %40, %43 : vector<1x1x128xf32>
    %45 = math.rsqrt %44 : vector<1x1x128xf32>
    %46 = vector.broadcast %45 : vector<1x1x128xf32> to vector<16x16x128xf32>
    %47 = arith.mulf %42, %46 : vector<16x16x128xf32>
    %cst_13 = arith.constant 0.000000e+00 : f32
    %48 = vector.broadcast %cst_13 : f32 to vector<16x16x128xf32>
    %49 = arith.maximumf %47, %48 : vector<16x16x128xf32>
    %50 = vector.extract_strided_slice %49 {offsets = [1, 0, 0], sizes = [1, 16, 128], strides = [1, 1, 1]} : vector<16x16x128xf32> to vector<1x16x128xf32>
    %51 = vector.extract_strided_slice %49 {offsets = [14, 0, 0], sizes = [1, 16, 128], strides = [1, 1, 1]} : vector<16x16x128xf32> to vector<1x16x128xf32>
    %52 = tpu.concatenate %50, %49, %51 in 0 : vector<1x16x128xf32>, vector<16x16x128xf32>, vector<1x16x128xf32> -> vector<18x16x128xf32>
    %53 = vector.extract_strided_slice %52 {offsets = [0, 14, 0], sizes = [18, 1, 128], strides = [1, 1, 1]} : vector<18x16x128xf32> to vector<18x1x128xf32>
    %54 = vector.shape_cast %53 : vector<18x1x128xf32> to vector<18x1x128xf32>
    %55 = vector.broadcast %54 : vector<18x1x128xf32> to vector<18x7x128xf32>
    %56 = vector.extract_strided_slice %52 {offsets = [0, 1, 0], sizes = [18, 1, 128], strides = [1, 1, 1]} : vector<18x16x128xf32> to vector<18x1x128xf32>
    %57 = tpu.concatenate %56, %52, %55 in 1 : vector<18x1x128xf32>, vector<18x16x128xf32>, vector<18x7x128xf32> -> vector<18x24x128xf32>
    %58 = vector.shape_cast %57 : vector<18x24x128xf32> to vector<432x128xf32>
    %59 = vector.extract_strided_slice %58 {offsets = [0, 0], sizes = [384, 128], strides = [1, 1]} : vector<432x128xf32> to vector<384x128xf32>
    %60 = vector.extract_strided_slice %58 {offsets = [24, 0], sizes = [384, 128], strides = [1, 1]} : vector<432x128xf32> to vector<384x128xf32>
    %61 = vector.extract_strided_slice %58 {offsets = [48, 0], sizes = [384, 128], strides = [1, 1]} : vector<432x128xf32> to vector<384x128xf32>
    %62 = tpu.concatenate %59, %60, %61 in 1 : vector<384x128xf32>, vector<384x128xf32>, vector<384x128xf32> -> vector<384x384xf32>
    %c0_14 = arith.constant 0 : index
    %c0_15 = arith.constant 0 : index
    %63 = vector.load %arg4[%c0_14, %c0_15] : memref<384x384xf32, #tpu.memory_space<vmem>>, vector<384x384xf32>
    %cst_16 = arith.constant dense<0.000000e+00> : vector<384x384xf32>
    %64 = tpu.matmul %62, %63, %cst_16 {dimension_numbers = #tpu.dot_dimension_numbers<[1], [0], [0], [1], [0, 0, 1, 1], [], []>} : vector<384x384xf32>, vector<384x384xf32>, vector<384x384xf32> -> vector<384x384xf32>
    %65 = vector.shape_cast %64 : vector<384x384xf32> to vector<16x24x384xf32>
    %66 = vector.extract_strided_slice %65 {offsets = [0, 0, 0], sizes = [16, 16, 128], strides = [1, 1, 1]} : vector<16x24x384xf32> to vector<16x16x128xf32>
    %67 = vector.extract_strided_slice %65 {offsets = [0, 1, 128], sizes = [16, 16, 128], strides = [1, 1, 1]} : vector<16x24x384xf32> to vector<16x16x128xf32>
    %68 = arith.addf %66, %67 : vector<16x16x128xf32>
    %69 = vector.extract_strided_slice %65 {offsets = [0, 2, 256], sizes = [16, 16, 128], strides = [1, 1, 1]} : vector<16x24x384xf32> to vector<16x16x128xf32>
    %70 = arith.addf %68, %69 : vector<16x16x128xf32>
    %c0_17 = arith.constant 0 : index
    %c0_18 = arith.constant 0 : index
    %71 = vector.load %arg5[%c0_17, %c0_18] : memref<1x128xf32, #tpu.memory_space<vmem>>, vector<1x128xf32>
    %72 = vector.shape_cast %71 : vector<1x128xf32> to vector<128xf32>
    %73 = vector.shape_cast %72 : vector<128xf32> to vector<1x1x128xf32>
    %74 = vector.broadcast %73 : vector<1x1x128xf32> to vector<16x16x128xf32>
    %75 = arith.addf %70, %74 : vector<16x16x128xf32>
    %cst_19 = arith.constant dense<0.000000e+00> : vector<128xf32>
    %76 = vector.multi_reduction <add>, %75, %cst_19 [0, 1] : vector<16x16x128xf32> to vector<128xf32>
    %77 = vector.shape_cast %76 : vector<128xf32> to vector<1x1x128xf32>
    %78 = arith.mulf %75, %75 : vector<16x16x128xf32>
    %cst_20 = arith.constant dense<0.000000e+00> : vector<128xf32>
    %79 = vector.multi_reduction <add>, %78, %cst_20 [0, 1] : vector<16x16x128xf32> to vector<128xf32>
    %80 = vector.shape_cast %79 : vector<128xf32> to vector<1x1x128xf32>
    %cst_21 = arith.constant 3.906250e-03 : f32
    %81 = vector.broadcast %cst_21 : f32 to vector<1x1x128xf32>
    %82 = arith.mulf %77, %81 : vector<1x1x128xf32>
    %cst_22 = arith.constant 3.906250e-03 : f32
    %83 = vector.broadcast %cst_22 : f32 to vector<1x1x128xf32>
    %84 = arith.mulf %80, %83 : vector<1x1x128xf32>
    %85 = arith.mulf %82, %82 : vector<1x1x128xf32>
    %86 = arith.subf %84, %85 : vector<1x1x128xf32>
    %cst_23 = arith.constant 0.000000e+00 : f32
    %87 = vector.broadcast %cst_23 : f32 to vector<1x1x128xf32>
    %88 = arith.maximumf %86, %87 : vector<1x1x128xf32>
    %89 = vector.broadcast %82 : vector<1x1x128xf32> to vector<16x16x128xf32>
    %90 = arith.subf %75, %89 : vector<16x16x128xf32>
    %cst_24 = arith.constant 9.99999974E-6 : f32
    %91 = vector.broadcast %cst_24 : f32 to vector<1x1x128xf32>
    %92 = arith.addf %88, %91 : vector<1x1x128xf32>
    %93 = math.rsqrt %92 : vector<1x1x128xf32>
    %94 = vector.broadcast %93 : vector<1x1x128xf32> to vector<16x16x128xf32>
    %95 = arith.mulf %90, %94 : vector<16x16x128xf32>
    %c0_25 = arith.constant 0 : index
    %c0_26 = arith.constant 0 : index
    %c0_27 = arith.constant 0 : index
    %c0_28 = arith.constant 0 : index
    %96 = vector.load %arg1[%c0_25, %c0_26, %c0_27, %c0_28] : memref<1x16x16x128xf32, #tpu.memory_space<vmem>>, vector<1x16x16x128xf32>
    %97 = vector.shape_cast %96 : vector<1x16x16x128xf32> to vector<16x16x128xf32>
    %98 = arith.addf %97, %95 : vector<16x16x128xf32>
    %c0_29 = arith.constant 0 : index
    %c0_30 = arith.constant 0 : index
    %c0_31 = arith.constant 0 : index
    %c0_32 = arith.constant 0 : index
    %99 = vector.load %arg6[%c0_29, %c0_30, %c0_31, %c0_32] : memref<1x16x16x128xf32, #tpu.memory_space<vmem>>, vector<1x16x16x128xf32>
    %100 = vector.shape_cast %99 : vector<1x16x16x128xf32> to vector<16x16x128xf32>
    %101 = vector.shape_cast %98 : vector<16x16x128xf32> to vector<1x16x16x128xf32>
    tpu.vector_store %arg6[%c0_29, %c0_30, %c0_31, %c0_32], %101 {strides = array<i32>} : memref<1x16x16x128xf32, #tpu.memory_space<vmem>>, vector<1x16x16x128xf32>,
    return
  }
  func.func @transform_0(%arg0: i32) -> (i32, i32, i32, i32) {
    %c0_i32 = arith.constant 0 : i32
    %c0_i32_0 = arith.constant 0 : i32
    %c0_i32_1 = arith.constant 0 : i32
    %c0_i32_2 = arith.constant 0 : i32
    return %arg0, %c0_i32, %c0_i32_0, %c0_i32_1 : i32, i32, i32, i32
  }
  func.func @transform_1(%arg0: i32) -> (i32, i32) {
    %c0_i32 = arith.constant 0 : i32
    %c0_i32_0 = arith.constant 0 : i32
    %c0_i32_1 = arith.constant 0 : i32
    return %c0_i32, %c0_i32_0 : i32, i32
  }
  func.func @transform_2(%arg0: i32) -> (i32, i32) {
    %c0_i32 = arith.constant 0 : i32
    %c0_i32_0 = arith.constant 0 : i32
    %c0_i32_1 = arith.constant 0 : i32
    return %c0_i32, %c0_i32_0 : i32, i32
  }
  func.func @transform_3(%arg0: i32) -> (i32, i32) {
    %c0_i32 = arith.constant 0 : i32
    %c0_i32_0 = arith.constant 0 : i32
    %c0_i32_1 = arith.constant 0 : i32
    return %c0_i32, %c0_i32_0 : i32, i32
  }
  func.func @transform_4(%arg0: i32) -> (i32, i32) {
    %c0_i32 = arith.constant 0 : i32
    %c0_i32_0 = arith.constant 0 : i32
    %c0_i32_1 = arith.constant 0 : i32
    return %c0_i32, %c0_i32_0 : i32, i32
  }
  func.func @transform_5(%arg0: i32) -> (i32, i32, i32, i32) {
    %c0_i32 = arith.constant 0 : i32
    %c0_i32_0 = arith.constant 0 : i32
    %c0_i32_1 = arith.constant 0 : i32
    %c0_i32_2 = arith.constant 0 : i32
    return %arg0, %c0_i32, %c0_i32_0, %c0_i32_1 : i32, i32, i32, i32
  }
}

</mosaic_0001>

<bundles_post_ra>
// kernel: tpu_custom_call.1
= control target key start
LH: loop header
LB: loop body
LE: loop exit
PB: predicated region body
PF: predicated region fallthrough
CT: control target
= control target key end

     0   :  { %10 = vsyncpa [#allocation3], 0  ;;  %s9314_s0 = inlined_call_operand.hbm [shape: f32[2,16,16,128], index: 0, kind: input, shape index: {}]   ;;  %s9315_s1 = inlined_call_operand.hbm [shape: f32[384,384], index: 1, kind: input, shape index: {}]   ;;  %s9316_s2 = inlined_call_operand.vmem [shape: f32[1,128], index: 2, kind: input, shape index: {}]   ;;  %s9317_s3 = inlined_call_operand.hbm [shape: f32[384,384], index: 3, kind: input, shape index: {}]   ;;  %s9318_s4 = inlined_call_operand.vmem [shape: f32[1,128], index: 4, kind: input, shape index: {}]   ;;  %s9319_s5 = inlined_call_operand.hbm [shape: f32[2,16,16,128], index: 5, kind: output, shape index: {}]  }
   0x1   :  { %12 = vsyncpa [#allocation3 + $0x1], 0 }
   0x2   :  { %13 = vsyncpa [#allocation6], 0 }
   0x3   :  { %14 = vsyncpa [#allocation4], 0 }
   0x4   :  { %16 = vsyncpa [#allocation4 + $0x1], 0  ;;  %s6290_s18 = smov 0   ;;  %s6292_s19 = smov 0  }
   0x5   :  { %s6294_s20 = smov 0   ;;  %s6296_s21 = smov 0  }
   0x6 LB: > { %s6311_s22 = sadd.s32 4294967295, %s6246_s21   ;;  %s5077_s23 = sadd.s32 4294967294, %s6246_s21   ;;  %s6246_s21 = sphi %s6296_s21, %s9482_s21   ;;  %s6242_s20 = sphi %s6294_s20, %s9481_s20   ;;  %s6238_s19 = sphi %s6292_s19, %s9480_s19   ;;  %s6234_s18 = sphi %s6290_s18, %s9479_s18  }
   0x7   : > { %p42_p0 = scmp.ne.s32.totalorder %s6238_s19, %s6234_s18  ;;  %p9320_p1 = scmp.eq.s32.totalorder %s6311_s22, 0 }
   0x8   : > { %p156_p3 = scmp.eq.s32.totalorder %s5077_s23, 1  ;;  %p5078_p5 = scmp.ge.s32.totalorder %s6246_s21, 1 }
   0x9   : > { %p6320_p4 = por %p9320_p1, %p42_p0  ;;  %p163_p7 = scmp.lt.s32.totalorder %s6246_s21, 3 }
   0xa   : > { %p6325_p6 = por %p156_p3, %p42_p0  ;;  %s6248_s27 = smov [#allocation5]  }
   0xb   : > { %s9373_s24 = scalar_select %p6320_p4, 1, 0 }
   0xc   : > { %s9374_s25 = scalar_select %p6325_p6, 1, 0 }
   0xd   : > { %p6330_p8 = pnand %p5078_p5, %p163_p7  ;;  %s175_s28 = sshll.u32 %s6248_s27, 4  ;;  %s6334_s28 = int_to_ptr.vmem [resolvable:$true] %s175_s28 }
   0xe   : > { %s6249_s30 = smov [#allocation7]   ;;  %s6090_s9 = scalar_lea.hbm %s9315_s1, 18432 }
   0xf   : > { %p5991_p9 = pneg %p6330_p8  ;;  %s191_s6 = sshll.u32 %s6249_s30, 4  ;;  %s6345_s6 = int_to_ptr.vmem [resolvable:$true] %s191_s6 }
  0x10   : > { %p6091_p12 = scmp.ne.s32.totalorder %s9315_s1, %s6090_s9  ;;  %p6097_p5 = scmp.lt.u32.totalorder %s6090_s9, %s9315_s1 }
  0x11   : > { %p6341_p11 = pnand %p5991_p9, %p9320_p1 }
  0x13   : > { %p6092_p13 = pneg %p6341_p11 }
  0x15   : > { %p6093_p0 = pnand %p6092_p13, %p6091_p12 }
  0x17   : > { %p6094_p3 = pneg %p6093_p0 }
  0x19   : > { %p6099_p7 = pnand %p6097_p5, %p6094_p3 }
  0x1b   : > { %6102 = shalt.err (!%p6099_p7)
}
  0x1c   : > { %s6103_s14 = scalar_lea.vmem %s6334_s28, 18432  ;;  %p6111_p2 = scmp.lt.s32.totalorder %s6334_s28, %s6334_s28 }
  0x1d   : > { %p6104_p9 = scmp.ne.s32.totalorder %s6334_s28, %s6103_s14  ;;  %p6112_p12 = scmp.lt.s32.totalorder %s6103_s14, %s6103_s14 }
  0x1f   : > { %p6106_p10 = pnand %p6104_p9, %p6092_p13  ;;  %p6113_p0 = por %p6112_p12, %p6111_p2 }
  0x21   : > { %p6107_p1 = pneg %p6106_p10 }
  0x23   : > { %p6114_p6 = pnand %p6113_p0, %p6107_p1 }
  0x25   : > { %6117 = shalt.err (!%p6114_p6)
}
  0x26   : > { %s6250_s15 = smov 384   ;;  %s6251_s16 = smov 24  }
  0x27   : > { %5994 = dma.hbm_to_vmem [thread:$0]  (!%p6341_p11), %s9315_s1, 18432, %s6334_s28, [#allocation6], %s6250_s15, %s6250_s15, %s6251_s16  }
  0x28   : > { %s6118_s7 = scalar_lea.hbm %s9317_s3, 18432 }
  0x29   : > { %p6119_p2 = scmp.ne.s32.totalorder %s9317_s3, %s6118_s7  ;;  %p6125_p10 = scmp.lt.u32.totalorder %s6118_s7, %s9317_s3 }
  0x2b   : > { %p6121_p1 = pnand %p6119_p2, %p6092_p13 }
  0x2d   : > { %p6122_p6 = pneg %p6121_p1 }
  0x2f   : > { %p6127_p3 = pnand %p6125_p10, %p6122_p6 }
  0x31   : > { %6130 = shalt.err (!%p6127_p3)
}
  0x32   : > { %s6131_s28 = scalar_lea.vmem %s6345_s6, 18432  ;;  %p6139_p12 = scmp.lt.s32.totalorder %s6345_s6, %s6345_s6 }
  0x33   : > { %p6132_p5 = scmp.ne.s32.totalorder %s6345_s6, %s6131_s28  ;;  %p6140_p0 = scmp.lt.s32.totalorder %s6131_s28, %s6131_s28 }
  0x35   : > { %p6134_p7 = pnand %p6132_p5, %p6092_p13  ;;  %p6141_p2 = por %p6140_p0, %p6139_p12 }
  0x37   : > { %p6135_p9 = pneg %p6134_p7 }
  0x39   : > { %p6142_p1 = pnand %p6141_p2, %p6135_p9 }
  0x3b   : > { %6145 = shalt.err (!%p6142_p1)
}
  0x3c   : > { %5997 = dma.hbm_to_vmem [thread:$0]  (!%p6341_p11), %s9317_s3, 18432, %s6345_s6, [#allocation6], %s6250_s15, %s6250_s15, %s6251_s16  }
  0x3d   : > { %s6400_s14 = sadd.s32 1, %s6246_s21   ;;  %s29_s29 = sadd.s32 1, %s6242_s20 }
  0x3e   : > { %s26_s17 = ssub.s32 %s6246_s21, %s6400_s14  ;;  %p36_p13 = scmp.ne.s32.totalorder %s6242_s20, %s6238_s19 }
  0x3f   : > { %p27_p6 = scmp.eq.s32.totalorder %s26_s17, 0  ;;  %p37_p10 = scmp.eq.s32.totalorder %s6246_s21, 0 }
  0x40   : > { %p9377_p3 = scmp.eq.s32.totalorder %s6311_s22, 1  ;;  %p6008_p7 = scmp.lt.s32.totalorder %s6246_s21, 2 }
  0x41   : > { %s6416_s27 = scalar_select %p27_p6, %s6242_s20, %s29_s29  }
  0x42   : > { %p6410_p5 = por %p9377_p3, %p36_p13  ;;  %p38_p9 = por %p37_p10, %p36_p13 }
  0x43   : > { %s208_s30 = sand.u32 1, %s6242_s20   ;;  %s5097_s6 = sshll.u32 %s6246_s21, 12 }
  0x44   : > { %s9378_s23 = scalar_select %p6410_p5, 1, 0 }
  0x45   : > { %s5082_s7 = sshll.u32 %s208_s30, 8  ;;  %s6423_s8 = scalar_lea.hbm %s9314_s0, %s5097_s6 }
  0x46   : > { %s212_s9 = scalar_lea.vmem [#allocation2], %s5082_s7  ;;  %p6427_p11 = pnand %p6008_p7, %p38_p9 }
  0x47   : > { %s219_s10 = sshll.u32 %s212_s9, 4  ;;  %s6431_s28 = scalar_lea.sflag [#allocation3], %s208_s30  ;;  %s6425_s10 = int_to_ptr.vmem [resolvable:$true] %s219_s10 }
  0x48   : > { %s6146_s12 = scalar_lea.hbm %s6423_s8, 4096  ;;  %p6148_p0 = pneg %p6427_p11 }
  0x49   : > { %p6147_p12 = scmp.ne.s32.totalorder %s6423_s8, %s6146_s12  ;;  %s6151_s17 = scalar_lea.hbm %s9314_s0, 8192 }
  0x4a   : > { %p6152_p13 = scmp.lt.u32.totalorder %s6423_s8, %s9314_s0  ;;  %p6153_p6 = scmp.lt.u32.totalorder %s6151_s17, %s6146_s12 }
  0x4b   : > { %p6149_p2 = pnand %p6148_p0, %p6147_p12  ;;  %p6155_p3 = scmp.lt.u32.totalorder %s6146_s12, %s6423_s8 }
  0x4c   : > { %p6154_p10 = por %p6153_p6, %p6152_p13 }
  0x4d   : > { %p6150_p1 = pneg %p6149_p2 }
  0x4e   : > { %p6156_p7 = por %p6155_p3, %p6154_p10 }
  0x50   : > { %p6157_p9 = pnand %p6156_p7, %p6150_p1 }
  0x52   : > { %6160 = shalt.err (!%p6157_p9)
}
  0x53   : > { %s6161_s30 = scalar_lea.vmem %s6425_s10, 4096  ;;  %s6252_s15 = smov [#allocation2]  }
  0x54   : > { %p6162_p12 = scmp.ne.s32.totalorder %s6425_s10, %s6161_s30  ;;  %s6166_s16 = sshll.u32 %s6252_s15, 4  ;;  %s6167_s16 = int_to_ptr.vmem [resolvable:$false] %s6166_s16 }
  0x55   : > { %s6168_s9 = scalar_lea.vmem %s6167_s16, 8192  ;;  %p6169_p4 = scmp.lt.s32.totalorder %s6425_s10, %s6167_s16 }
  0x56   : > { %p6164_p2 = pnand %p6162_p12, %p6148_p0  ;;  %p6170_p13 = scmp.lt.s32.totalorder %s6168_s9, %s6161_s30 }
  0x58   : > { %p6165_p5 = pneg %p6164_p2  ;;  %p6171_p6 = por %p6170_p13, %p6169_p4 }
  0x5a   : > { %p6172_p10 = pnand %p6171_p6, %p6165_p5 }
  0x5c   : > { %6175 = shalt.err (!%p6172_p10)
}
  0x5d   : > { %s6253_s12 = smov 128   ;;  %s6254_s13 = smov 8  }
  0x5e   : > { %6001 = dma.hbm_to_vmem [thread:$0]  (!%p6427_p11), %s6423_s8, 4096, %s6425_s10, %s6431_s28, %s6253_s12, %s6253_s12, %s6254_s13  }
  0x5f   : > { %231 = sbr.rel (%p6330_p8) target bundleno = 1500 (0x5dc), region = 40 }
  0x66   : > { %s6462_s29 = sand.u32 1, %s6238_s19   ;;  %p9380_p4 = scmp.ne.s32.totalorder %s9373_s24, 0 }
  0x67   : > { %s5086_s17 = sshll.u32 %s6462_s29, 8  ;;  %s234_s7 = scalar_lea.sflag [#allocation3], %s6462_s29 }
  0x68   : > { %s6468_s6 = scalar_lea.vmem [#allocation2], %s5086_s17 }
  0x69   : > { %6221 = dma.done.wait (%p9380_p4), %s234_s7, 4096  }
  0x6a   : > { %6223 = vsyncadd (%p9380_p4), %s234_s7, 4294963200  ;;  %p9381_p5 = scmp.eq.s32.totalorder %s6311_s22, 0 }
  0x6c   : > { %6225 = dma.done.wait (%p9381_p5), [#allocation6], 36864   ;;  %p9382_p8 = pmov %p9381_p5 }
  0x6d   : > { %v9325_v0 = vmov 0.0|0.0   ;;  %v562_v1 = vld [vmem:[#allocation5 + $0x8] sm:$0xff]  ;;  %v565_v2 = vld [vmem:[#allocation5 + $0x20] sm:$0xff]  ;;  %v563_v3 = vld [vmem:[#allocation5 + $0x10] sm:$0xff]  ;;  %vm432_vm0 = vcmask 1040384   ;;  %vm2230_vm1 = vcmask 1045504  }
  0x6e   : > { %6227 = vsyncadd (%p9382_p8), [#allocation6], 4294930432  ;;  %5531 = vmatprep.subr.bf16.mxu1 %v9325_v0  ;;  %v5435_v4 = vpack.c.bf16 %v565_v2, %v562_v1  ;;  %v566_v5 = vld [vmem:[#allocation5 + $0x28] sm:$0xff]  ;;  %v561_v6 = vld [vmem:[#allocation5] sm:$0xff]  ;;  %vm2037_vm2 = vcmask 1046528   ;;  %s9158_s11 = scalar_lea.vmem [#allocation8], %s5086_s17 }
  0x6f   : > { %v564_v7 = vld [vmem:[#allocation5 + $0x18] sm:$0xff]  ;;  %v5532_v8 = vpack.c.bf16 %v566_v5, %v563_v3  ;;  %v571_v11 = vld [vmem:[#allocation5 + $0x50] sm:$0xff]  ;;  %v569_v12 = vld [vmem:[#allocation5 + $0x40] sm:$0xff]  ;;  %s5098_s28 = sshll.u32 %s6311_s22, 12  ;;  %s4985_s30 = sshll.u32 %s9158_s11, 4  ;;  %s9250_s30 = int_to_ptr.vmem [resolvable:$true] %s4985_s30 }
  0x70   : > { %v5437_v9 = vpack.c.bf16 %v564_v7, %v561_v6  ;;  %v568_v10 = vld [vmem:[#allocation5 + $0x38] sm:$0xff]  ;;  %5436 = vmatprep.subr.bf16.mxu0 %v5435_v4  ;;  %v567_v15 = vld [vmem:[#allocation5 + $0x30] sm:$0xff]  ;;  %v570_v16 = vld [vmem:[#allocation5 + $0x48] sm:$0xff]  ;;  %s9246_s9 = scalar_lea.hbm %s9319_s5, %s5098_s28  ;;  %s4972_s22 = scalar_lea.sflag [#allocation4], %s6462_s29 }
  0x71   : > { %v5439_v13 = vpack.c.bf16 %v571_v11, %v568_v10  ;;  %v572_v14 = vld [vmem:[#allocation5 + $0x58] sm:$0xff]  ;;  %5533 = vmatpush1.bf16.msra.mxu1 %v5532_v8  ;;  %v5441_v18 = vpack.c.bf16 %v570_v16, %v567_v15  ;;  %v574_v19 = vld [vmem:[#allocation5 + $0x68] sm:$0xff]  ;;  %v577_v20 = vld [vmem:[#allocation5 + $0x80] sm:$0xff]  ;;  %s6176_s12 = scalar_lea.vmem %s9250_s30, 4096  ;;  %p9476_p0 = scmp.ne.s32.totalorder %s9378_s23, 0 }
  0x72   : > { %5438 = vmatpush1.bf16.msra.mxu0 %v5437_v9  ;;  %v5535_v17 = vpack.c.bf16 %v572_v14, %v569_v12  ;;  %v575_v21 = vld [vmem:[#allocation5 + $0x70] sm:$0xff]  ;;  %5534 = vmatprep.subr.bf16.mxu1 %v9325_v0  ;;  %v5443_v22 = vpack.c.bf16 %v577_v20, %v574_v19  ;;  %v578_v23 = vld [vmem:[#allocation5 + $0x88] sm:$0xff]  ;;  %v573_v24 = vld [vmem:[#allocation5 + $0x60] sm:$0xff]  ;;  %p6177_p11 = scmp.ne.s32.totalorder %s9250_s30, %s6176_s12  ;;  %s6257_s13 = smov [#allocation8]  }
  0x73   : > { %5440 = vmatprep.subr.bf16.mxu0 %v5439_v13  ;;  %v576_v25 = vld [vmem:[#allocation5 + $0x78] sm:$0xff]  ;;  %v583_v27 = vld [vmem:[#allocation5 + $0xb0] sm:$0xff]  ;;  %v5538_v28 = vpack.c.bf16 %v578_v23, %v575_v21  ;;  %v581_v30 = vld [vmem:[#allocation5 + $0xa0] sm:$0xff]  ;;  %s6180_s17 = sshll.u32 %s6257_s13, 4  ;;  %s6181_s17 = int_to_ptr.vmem [resolvable:$false] %s6180_s17 }
  0x74   : > { %v580_v26 = vld [vmem:[#allocation5 + $0x98] sm:$0xff]  ;;  %v5445_v29 = vpack.c.bf16 %v576_v25, %v573_v24  ;;  %v579_v33 = vld [vmem:[#allocation5 + $0x90] sm:$0xff]  ;;  %v582_v34 = vld [vmem:[#allocation5 + $0xa8] sm:$0xff]  ;;  %p6178_p1 = pnand %p6177_p11, %p9476_p0  ;;  %s6182_s7 = scalar_lea.vmem %s6181_s17, 8192 }
  0x75   : > { %5536 = vmatpush1.bf16.msra.mxu1 %v5535_v17  ;;  %v5447_v31 = vpack.c.bf16 %v583_v27, %v580_v26  ;;  %v584_v32 = vld [vmem:[#allocation5 + $0xb8] sm:$0xff]  ;;  %v586_v35 = vld [vmem:[#allocation5 + $0xc8] sm:$0xff]  ;;  %v589_v36 = vld [vmem:[#allocation5 + $0xe0] sm:$0xff]  ;;  %v5449_v38 = vpack.c.bf16 %v582_v34, %v579_v33  ;;  %p6183_p7 = scmp.lt.s32.totalorder %s9250_s30, %s6181_s17  ;;  %p6184_p9 = scmp.lt.s32.totalorder %s6182_s7, %s6176_s12 }
  0x76   : > { %5442 = vmatpush1.bf16.msra.mxu0 %v5441_v18  ;;  %5537 = vmatprep.subr.bf16.mxu1 %v9325_v0  ;;  %v5541_v37 = vpack.c.bf16 %v584_v32, %v581_v30  ;;  %v587_v39 = vld [vmem:[#allocation5 + $0xd0] sm:$0xff]  ;;  %v5451_v40 = vpack.c.bf16 %v589_v36, %v586_v35  ;;  %v590_v41 = vld [vmem:[#allocation5 + $0xe8] sm:$0xff]  ;;  %v585_v42 = vld [vmem:[#allocation5 + $0xc0] sm:$0xff]  ;;  %p6179_p3 = pneg %p6178_p1 }
  0x77   : > { %5444 = vmatprep.subr.bf16.mxu0 %v5443_v22  ;;  %v588_v43 = vld [vmem:[#allocation5 + $0xd8] sm:$0xff]  ;;  %v595_v45 = vld [vmem:[#allocation5 + $0x110] sm:$0xff]  ;;  %v5544_v46 = vpack.c.bf16 %v590_v41, %v587_v39  ;;  %v593_v48 = vld [vmem:[#allocation5 + $0x100] sm:$0xff]  ;;  %p6185_p12 = por %p6184_p9, %p6183_p7 }
  0x78   : > { %v592_v44 = vld [vmem:[#allocation5 + $0xf8] sm:$0xff]  ;;  %v5453_v47 = vpack.c.bf16 %v588_v43, %v585_v42  ;;  %v591_v51 = vld [vmem:[#allocation5 + $0xf0] sm:$0xff]  ;;  %v594_v52 = vld [vmem:[#allocation5 + $0x108] sm:$0xff] }
  0x79   : > { %5539 = vmatpush1.bf16.msra.mxu1 %v5538_v28  ;;  %v5455_v49 = vpack.c.bf16 %v595_v45, %v592_v44  ;;  %v596_v50 = vld [vmem:[#allocation5 + $0x118] sm:$0xff]  ;;  %v598_v53 = vld [vmem:[#allocation5 + $0x128] sm:$0xff]  ;;  %v601_v54 = vld [vmem:[#allocation5 + $0x140] sm:$0xff]  ;;  %v5457_v56 = vpack.c.bf16 %v594_v52, %v591_v51  ;;  %p6186_p2 = pnand %p6185_p12, %p6179_p3 }
  0x7a   : > { %5446 = vmatpush1.bf16.msra.mxu0 %v5445_v29  ;;  %5540 = vmatprep.subr.bf16.mxu1 %v9325_v0  ;;  %v5547_v55 = vpack.c.bf16 %v596_v50, %v593_v48  ;;  %v599_v57 = vld [vmem:[#allocation5 + $0x130] sm:$0xff]  ;;  %v5459_v58 = vpack.c.bf16 %v601_v54, %v598_v53  ;;  %v602_v59 = vld [vmem:[#allocation5 + $0x148] sm:$0xff]  ;;  %v597_v60 = vld [vmem:[#allocation5 + $0x120] sm:$0xff] }
  0x7b   : > { %5448 = vmatprep.subr.bf16.mxu0 %v5447_v31  ;;  %v600_v61 = vld [vmem:[#allocation5 + $0x138] sm:$0xff]  ;;  %v607_v63 = vld [vmem:[#allocation5 + $0x170] sm:$0xff]  ;;  %v5550_v1 = vpack.c.bf16 %v602_v59, %v599_v57  ;;  %v605_v3 = vld [vmem:[#allocation5 + $0x160] sm:$0xff] }
  0x7c   : > { %v604_v62 = vld [vmem:[#allocation5 + $0x158] sm:$0xff]  ;;  %v5461_v2 = vpack.c.bf16 %v600_v61, %v597_v60  ;;  %v603_v6 = vld [vmem:[#allocation5 + $0x150] sm:$0xff]  ;;  %v606_v7 = vld [vmem:[#allocation5 + $0x168] sm:$0xff] }
  0x7d   : > { %5542 = vmatpush1.bf16.msra.mxu1 %v5541_v37  ;;  %v5463_v4 = vpack.c.bf16 %v607_v63, %v604_v62  ;;  %v608_v5 = vld [vmem:[#allocation5 + $0x178] sm:$0xff]  ;;  %v610_v8 = vld [vmem:[#allocation5 + $0x188] sm:$0xff]  ;;  %v613_v9 = vld [vmem:[#allocation5 + $0x1a0] sm:$0xff]  ;;  %v5465_v11 = vpack.c.bf16 %v606_v7, %v603_v6 }
  0x7e   : > { %5450 = vmatpush1.bf16.msra.mxu0 %v5449_v38  ;;  %5543 = vmatprep.subr.bf16.mxu1 %v9325_v0  ;;  %v5553_v10 = vpack.c.bf16 %v608_v5, %v605_v3  ;;  %v611_v12 = vld [vmem:[#allocation5 + $0x190] sm:$0xff]  ;;  %v5467_v13 = vpack.c.bf16 %v613_v9, %v610_v8  ;;  %v614_v14 = vld [vmem:[#allocation5 + $0x1a8] sm:$0xff]  ;;  %v609_v15 = vld [vmem:[#allocation5 + $0x180] sm:$0xff] }
  0x7f   : > { %5452 = vmatprep.subr.bf16.mxu0 %v5451_v40  ;;  %v612_v16 = vld [vmem:[#allocation5 + $0x198] sm:$0xff]  ;;  %v619_v18 = vld [vmem:[#allocation5 + $0x1d0] sm:$0xff]  ;;  %v5556_v19 = vpack.c.bf16 %v614_v14, %v611_v12  ;;  %v617_v21 = vld [vmem:[#allocation5 + $0x1c0] sm:$0xff]  ;;  %v304_v12 = vlaneseq }
  0x80   : > { %v616_v17 = vld [vmem:[#allocation5 + $0x1b8] sm:$0xff]  ;;  %v5469_v20 = vpack.c.bf16 %v612_v16, %v609_v15  ;;  %v6487_v22 = vld [vmem:[%s6468_s6] sm:$0xff]  ;;  %v615_v25 = vld [vmem:[#allocation5 + $0x1b0] sm:$0xff] }
  0x81   : > { %5545 = vmatpush1.bf16.msra.mxu1 %v5544_v46  ;;  %v5471_v23 = vpack.c.bf16 %v619_v18, %v616_v17  ;;  %v620_v24 = vld [vmem:[#allocation5 + $0x1d8] sm:$0xff]  ;;  %v618_v26 = vld [vmem:[#allocation5 + $0x1c8] sm:$0xff]  ;;  %v385_v27 = vrot.slane %v6487_v22, 1  ;;  %v436_v28 = vrot.slane %v6487_v22, 7  ;;  %v625_v30 = vld [vmem:[#allocation5 + $0x200] sm:$0xff] }
  0x82   : > { %5454 = vmatpush1.bf16.msra.mxu0 %v5453_v47  ;;  %5546 = vmatprep.subr.bf16.mxu1 %v9325_v0  ;;  %v622_v29 = vld [vmem:[#allocation5 + $0x1e8] sm:$0xff]  ;;  %v5559_v32 = vpack.c.bf16 %v620_v24, %v617_v21  ;;  %v5473_v33 = vpack.c.bf16 %v618_v26, %v615_v25  ;;  %v623_v34 = vld [vmem:[#allocation5 + $0x1f0] sm:$0xff]  ;;  %v621_v37 = vld [vmem:[#allocation5 + $0x1e0] sm:$0xff]  ;;  %v305_v26 = vshrl.u32 %v304_v12, 7 }
  0x83   : > { %5456 = vmatprep.subr.bf16.mxu0 %v5455_v49  ;;  %v6495_v31 = vsel %vm432_vm0, %v385_v27, %v436_v28  ;;  %v5475_v35 = vpack.c.bf16 %v625_v30, %v622_v29  ;;  %v626_v36 = vld [vmem:[#allocation5 + $0x208] sm:$0xff]  ;;  %v624_v38 = vld [vmem:[#allocation5 + $0x1f8] sm:$0xff]  ;;  %v631_v40 = vld [vmem:[#allocation5 + $0x230] sm:$0xff] }
  0x84   : > { %v628_v39 = vld [vmem:[#allocation5 + $0x218] sm:$0xff]  ;;  %1443 = vmatprep.mubr.f32.mxu1 %v6495_v31  ;;  %769 = vmatprep.mubr.f32.mxu0 %v6495_v31  ;;  %v5562_v41 = vpack.c.bf16 %v626_v36, %v623_v34  ;;  %v5477_v42 = vpack.c.bf16 %v624_v38, %v621_v37  ;;  %v629_v43 = vld [vmem:[#allocation5 + $0x220] sm:$0xff]  ;;  %v627_v46 = vld [vmem:[#allocation5 + $0x210] sm:$0xff] }
  0x85   : > { %5548 = vmatpush1.bf16.msra.mxu1 %v5547_v55  ;;  %v5479_v44 = vpack.c.bf16 %v631_v40, %v628_v39  ;;  %v632_v45 = vld [vmem:[#allocation5 + $0x238] sm:$0xff]  ;;  %v630_v47 = vld [vmem:[#allocation5 + $0x228] sm:$0xff]  ;;  %v637_v49 = vld [vmem:[#allocation5 + $0x260] sm:$0xff] }
  0x86   : > { %5458 = vmatpush1.bf16.msra.mxu0 %v5457_v56  ;;  %5549 = vmatprep.subr.bf16.mxu1 %v9325_v0  ;;  %v634_v48 = vld [vmem:[#allocation5 + $0x248] sm:$0xff]  ;;  %v5565_v50 = vpack.c.bf16 %v632_v45, %v629_v43  ;;  %v5481_v51 = vpack.c.bf16 %v630_v47, %v627_v46  ;;  %v635_v52 = vld [vmem:[#allocation5 + $0x250] sm:$0xff]  ;;  %v633_v55 = vld [vmem:[#allocation5 + $0x240] sm:$0xff] }
  0x87   : > { %5460 = vmatprep.subr.bf16.mxu0 %v5459_v58  ;;  %v5483_v53 = vpack.c.bf16 %v637_v49, %v634_v48  ;;  %v638_v54 = vld [vmem:[#allocation5 + $0x268] sm:$0xff]  ;;  %v636_v56 = vld [vmem:[#allocation5 + $0x258] sm:$0xff]  ;;  %v643_v58 = vld [vmem:[#allocation5 + $0x290] sm:$0xff] }
  0x88   : > { %v640_v57 = vld [vmem:[#allocation5 + $0x278] sm:$0xff]  ;;  %v5568_v59 = vpack.c.bf16 %v638_v54, %v635_v52  ;;  %v5485_v60 = vpack.c.bf16 %v636_v56, %v633_v55  ;;  %v641_v61 = vld [vmem:[#allocation5 + $0x280] sm:$0xff]  ;;  %v646_v3 = vld [vmem:[#allocation5 + $0x2a8] sm:$0xff] }
  0x89   : > { %5551 = vmatpush1.bf16.msra.mxu1 %v5550_v1  ;;  %v5487_v62 = vpack.c.bf16 %v643_v58, %v640_v57  ;;  %v644_v63 = vld [vmem:[#allocation5 + $0x298] sm:$0xff]  ;;  %v639_v1 = vld [vmem:[#allocation5 + $0x270] sm:$0xff]  ;;  %v650_v9 = vld [vmem:[#allocation5 + $0x2c8] sm:$0xff] }
  0x8a   : > { %5462 = vmatpush1.bf16.msra.mxu0 %v5461_v2  ;;  %5552 = vmatprep.subr.bf16.mxu1 %v9325_v0  ;;  %v642_v2 = vld [vmem:[#allocation5 + $0x288] sm:$0xff]  ;;  %v5571_v5 = vpack.c.bf16 %v644_v63, %v641_v61  ;;  %v647_v7 = vld [vmem:[#allocation5 + $0x2b0] sm:$0xff]  ;;  %v653_v15 = vld [vmem:[#allocation5 + $0x2e0] sm:$0xff] }
  0x8b   : > { %5464 = vmatprep.subr.bf16.mxu0 %v5463_v4  ;;  %v649_v4 = vld [vmem:[#allocation5 + $0x2c0] sm:$0xff]  ;;  %v5489_v6 = vpack.c.bf16 %v642_v2, %v639_v1  ;;  %v655_v14 = vld [vmem:[#allocation5 + $0x2f0] sm:$0xff]  ;;  %v5574_v16 = vpack.c.bf16 %v650_v9, %v647_v7  ;;  %v656_v18 = vld [vmem:[#allocation5 + $0x2f8] sm:$0xff] }
  0x8c   : > { %v5491_v8 = vpack.c.bf16 %v649_v4, %v646_v3  ;;  %v658_v24 = vld [vmem:[#allocation5 + $0x308] sm:$0xff]  ;;  %v661_v25 = vld [vmem:[#allocation5 + $0x320] sm:$0xff]  ;;  %v659_v29 = vld [vmem:[#allocation5 + $0x310] sm:$0xff] }
  0x8d   : > { %5554 = vmatpush1.bf16.msra.mxu1 %v5553_v10  ;;  %v645_v10 = vld [vmem:[#allocation5 + $0x2a0] sm:$0xff]  ;;  %v273_v27 = vld [vmem:[%s6468_s6 + $0x8] sm:$0xff]  ;;  %v5499_v36 = vpack.c.bf16 %v661_v25, %v658_v24  ;;  %v660_v38 = vld [vmem:[#allocation5 + $0x318] sm:$0xff] }
  0x8e   : > { %5466 = vmatpush1.bf16.msra.mxu0 %v5465_v11  ;;  %5555 = vmatprep.subr.bf16.mxu1 %v9325_v0  ;;  %v648_v11 = vld [vmem:[#allocation5 + $0x2b8] sm:$0xff]  ;;  %v662_v30 = vld [vmem:[#allocation5 + $0x328] sm:$0xff]  ;;  %v657_v37 = vld [vmem:[#allocation5 + $0x300] sm:$0xff]  ;;  %v437_v39 = vrot.slane %v273_v27, 7 }
  0x8f   : > { %5468 = vmatprep.subr.bf16.mxu0 %v5467_v13  ;;  %v652_v13 = vld [vmem:[#allocation5 + $0x2d8] sm:$0xff]  ;;  %v5493_v17 = vpack.c.bf16 %v648_v11, %v645_v10  ;;  %v5501_v46 = vpack.c.bf16 %v660_v38, %v657_v37  ;;  %v666_v52 = vld [vmem:[#allocation5 + $0x348] sm:$0xff]  ;;  %v673_v56 = vld [vmem:[#allocation5 + $0x380] sm:$0xff] }
  0x90   : > { %v5495_v21 = vpack.c.bf16 %v655_v14, %v652_v13  ;;  %v275_v40 = vld [vmem:[%s6468_s6 + $0x18] sm:$0xff]  ;;  %v6517_v48 = vsel %vm432_vm0, %v436_v28, %v437_v39  ;;  %v670_v55 = vld [vmem:[#allocation5 + $0x368] sm:$0xff]  ;;  %v669_v61 = vld [vmem:[#allocation5 + $0x360] sm:$0xff] }
  0x91   : > { %5557 = vmatpush1.bf16.msra.mxu1 %v5556_v19  ;;  %v651_v19 = vld [vmem:[#allocation5 + $0x2d0] sm:$0xff]  ;;  %v664_v43 = vld [vmem:[#allocation5 + $0x338] sm:$0xff]  ;;  %v434_v47 = vrot.slane %v275_v40, 7  ;;  %v682_v7 = vld [vmem:[#allocation5 + $0x3c8] sm:$0xff] }
  0x92   : > { %5470 = vmatpush1.bf16.msra.mxu0 %v5469_v20  ;;  %5558 = vmatprep.subr.bf16.mxu1 %v9325_v0  ;;  %v654_v20 = vld [vmem:[#allocation5 + $0x2e8] sm:$0xff]  ;;  %v668_v54 = vld [vmem:[#allocation5 + $0x358] sm:$0xff]  ;;  %v679_v1 = vld [vmem:[#allocation5 + $0x3b0] sm:$0xff] }
  0x93   : > { %5472 = vmatprep.subr.bf16.mxu0 %v5471_v23  ;;  %v274_v23 = vld [vmem:[%s6468_s6 + $0x10] sm:$0xff]  ;;  %v676_v63 = vld [vmem:[#allocation5 + $0x398] sm:$0xff]  ;;  %v276_v10 = vld [vmem:[%s6468_s6 + $0x20] sm:$0xff] }
  0x94   : > { %v384_v34 = vrot.slane %v274_v23, 1  ;;  %v5511_v4 = vpack.c.bf16 %v679_v1, %v676_v63  ;;  %v681_v12 = vld [vmem:[#allocation5 + $0x3c0] sm:$0xff]  ;;  %v684_v13 = vld [vmem:[#allocation5 + $0x3d8] sm:$0xff]  ;;  %v687_v25 = vld [vmem:[#allocation5 + $0x3f0] sm:$0xff] }
  0x95   : > { %5560 = vmatpush1.bf16.msra.mxu1 %v5559_v32  ;;  %v5577_v32 = vpack.c.bf16 %v656_v18, %v653_v15  ;;  %v688_v14 = vld [vmem:[#allocation5 + $0x3f8] sm:$0xff]  ;;  %v691_v15 = vld [vmem:[#allocation5 + $0x410] sm:$0xff]  ;;  %v386_v18 = vrot.slane %v276_v10, 1 }
  0x96   : > { %5474 = vmatpush1.bf16.msra.mxu0 %v5473_v33  ;;  %5561 = vmatprep.subr.bf16.mxu1 %v9325_v0  ;;  %v5497_v33 = vpack.c.bf16 %v654_v20, %v651_v19  ;;  %v439_v19 = vrot.slane %v276_v10, 7  ;;  %v5517_v20 = vpack.c.bf16 %v684_v13, %v681_v12  ;;  %v5519_v24 = vpack.c.bf16 %v691_v15, %v688_v14  ;;  %v692_v10 = vld [vmem:[#allocation5 + $0x418] sm:$0xff] }
  0x97   : > { %5476 = vmatprep.subr.bf16.mxu0 %v5475_v35  ;;  %v433_v35 = vrot.slane %v274_v23, 7  ;;  %v277_v23 = vld [vmem:[%s6468_s6 + $0x28] sm:$0xff]  ;;  %v283_v15 = vld [vmem:[%s6468_s6 + $0x58] sm:$0xff] }
  0x99   : > { %5563 = vmatpush1.bf16.msra.mxu1 %v5562_v41  ;;  %v6509_v41 = vsub.s32 6, %v305_v26  ;;  %v6512_v45 = vsel %vm432_vm0, %v384_v34, %v433_v35  ;;  %v6524_v22 = vsel %vm432_vm0, %v433_v35, %v434_v47  ;;  %v690_v26 = vld [vmem:[#allocation5 + $0x408] sm:$0xff]  ;;  %v693_v34 = vld [vmem:[#allocation5 + $0x420] sm:$0xff]  ;;  %v696_v35 = vld [vmem:[#allocation5 + $0x438] sm:$0xff] }
  0x9a   : > { %5478 = vmatpush1.bf16.msra.mxu0 %v5477_v42  ;;  %5564 = vmatprep.subr.bf16.mxu1 %v9325_v0  ;;  %v5579_v42 = vpack.c.bf16 %v662_v30, %v659_v29  ;;  %v6553_v29 = vsel %vm432_vm0, %v386_v18, %v439_v19  ;;  %v440_v30 = vrot.slane %v277_v23, 7  ;;  %v5525_v38 = vpack.c.bf16 %v696_v35, %v693_v34 }
  0x9b   : > { %5480 = vmatprep.subr.bf16.mxu0 %v5479_v44  ;;  %9383 = vst [vmem:[#allocation12_spill] sm:$0xff] %v6509_v41  ;;  %v667_v44 = vld [vmem:[#allocation5 + $0x350] sm:$0xff]  ;;  %v311_v49 = vrot.slane %v273_v27, %v6509_v41  ;;  %v307_v28 = vrot.slane %v275_v40, %v6509_v41  ;;  %v697_v27 = vld [vmem:[#allocation5 + $0x440] sm:$0xff]  ;;  %v315_v37 = vrot.slane %v277_v23, %v6509_v41  ;;  %v704_v23 = vld [vmem:[#allocation5 + $0x478] sm:$0xff] }
  0x9d   : > { %5566 = vmatpush1.bf16.msra.mxu1 %v5565_v50  ;;  %v5503_v50 = vpack.c.bf16 %v667_v44, %v664_v43  ;;  %v6529_v57 = vsel %vm432_vm0, %v437_v39, %v311_v49  ;;  %v6536_v2 = vsel %vm432_vm0, %v434_v47, %v307_v28  ;;  %v278_v39 = vld [vmem:[%s6468_s6 + $0x30] sm:$0xff]  ;;  %v6569_v40 = vsel %vm432_vm0, %v440_v30, %v315_v37  ;;  %v279_v44 = vld [vmem:[%s6468_s6 + $0x38] sm:$0xff]  ;;  %v281_v28 = vld [vmem:[%s6468_s6 + $0x48] sm:$0xff] }
  0x9e   : > { %5482 = vmatpush1.bf16.msra.mxu0 %v5481_v51  ;;  %5567 = vmatprep.subr.bf16.mxu1 %v9325_v0  ;;  %v663_v51 = vld [vmem:[#allocation5 + $0x330] sm:$0xff]  ;;  %v442_v43 = vrot.slane %v278_v39, 7  ;;  %v443_v47 = vrot.slane %v279_v44, 7  ;;  %v319_v49 = vrot.slane %v279_v44, %v6509_v41  ;;  %v446_v63 = vrot.slane %v281_v28, 7 }
  0x9f   : > { %5484 = vmatprep.subr.bf16.mxu0 %v5483_v53  ;;  %v665_v53 = vld [vmem:[#allocation5 + $0x340] sm:$0xff]  ;;  %v5505_v58 = vpack.c.bf16 %v666_v52, %v663_v51  ;;  %v680_v52 = vld [vmem:[#allocation5 + $0x3b8] sm:$0xff] }
  0xa0   : > { %v677_v51 = vld [vmem:[#allocation5 + $0x3a0] sm:$0xff] }
  0xa1   : > { %5569 = vmatpush1.bf16.msra.mxu1 %v5568_v59  ;;  %v5583_v59 = vpack.c.bf16 %v668_v54, %v665_v53  ;;  %v6593_v53 = vsel %vm432_vm0, %v443_v47, %v319_v49 }
  0xa2   : > { %5486 = vmatpush1.bf16.msra.mxu0 %v5485_v60  ;;  %5570 = vmatprep.subr.bf16.mxu1 %v9325_v0  ;;  %v5507_v60 = vpack.c.bf16 %v673_v56, %v670_v55  ;;  %v5591_v56 = vpack.c.bf16 %v680_v52, %v677_v51 }
  0xa3   : > { %5488 = vmatprep.subr.bf16.mxu0 %v5487_v62  ;;  %v672_v62 = vld [vmem:[#allocation5 + $0x378] sm:$0xff] }
  0xa4   : > { %v5509_v3 = vpack.c.bf16 %v672_v62, %v669_v61  ;;  %v702_v61 = vld [vmem:[#allocation5 + $0x468] sm:$0xff] }
  0xa5   : > { %5572 = vmatpush1.bf16.msra.mxu1 %v5571_v5  ;;  %v675_v5 = vld [vmem:[#allocation5 + $0x390] sm:$0xff] }
  0xa6   : > { %5490 = vmatpush1.bf16.msra.mxu0 %v5489_v6  ;;  %5573 = vmatprep.subr.bf16.mxu1 %v9325_v0  ;;  %v678_v6 = vld [vmem:[#allocation5 + $0x3a8] sm:$0xff] }
  0xa7   : > { %5492 = vmatprep.subr.bf16.mxu0 %v5491_v8  ;;  %v685_v8 = vld [vmem:[#allocation5 + $0x3e0] sm:$0xff]  ;;  %v5513_v9 = vpack.c.bf16 %v678_v6, %v675_v5  ;;  %v323_v6 = vrot.slane %v281_v28, %v6509_v41 }
  0xa8   : > { %v5515_v11 = vpack.c.bf16 %v685_v8, %v682_v7  ;;  %v282_v8 = vld [vmem:[%s6468_s6 + $0x50] sm:$0xff] }
  0xa9   : > { %5575 = vmatpush1.bf16.msra.mxu1 %v5574_v16  ;;  %v671_v16 = vld [vmem:[#allocation5 + $0x370] sm:$0xff]  ;;  %v389_v12 = vrot.slane %v282_v8, 1  ;;  %v448_v13 = vrot.slane %v282_v8, 7 }
  0xaa   : > { %5494 = vmatpush1.bf16.msra.mxu0 %v5493_v17  ;;  %5576 = vmatprep.subr.bf16.mxu1 %v9325_v0  ;;  %v674_v17 = vld [vmem:[#allocation5 + $0x388] sm:$0xff] }
  0xab   : > { %5496 = vmatprep.subr.bf16.mxu0 %v5495_v21  ;;  %v5587_v21 = vpack.c.bf16 %v674_v17, %v671_v16  ;;  %v695_v16 = vld [vmem:[#allocation5 + $0x430] sm:$0xff]  ;;  %v698_v17 = vld [vmem:[#allocation5 + $0x448] sm:$0xff]  ;;  %v6626_v18 = vsel %vm432_vm0, %v389_v12, %v448_v13  ;;  %v292_v12 = vld [vmem:[%s6468_s6 + $0xa0] sm:$0xff] }
  0xad   : > { %5578 = vmatpush1.bf16.msra.mxu1 %v5577_v32  ;;  %v5521_v32 = vpack.c.bf16 %v690_v26, %v687_v25  ;;  %v327_v25 = vrot.slane %v283_v15, %v6509_v41 }
  0xae   : > { %5498 = vmatpush1.bf16.msra.mxu0 %v5497_v33  ;;  %5580 = vmatprep.subr.bf16.mxu1 %v5579_v42 }
  0xaf   : > { %5500 = vmatprep.subr.bf16.mxu0 %v5499_v36  ;;  %v6560_v36 = vsel %vm432_vm0, %v439_v19, %v440_v30  ;;  %v449_v19 = vrot.slane %v283_v15, 7  ;;  %v463_v15 = vrot.slane %v292_v12, 7 }
  0xb0   : > { %1444 = vmatmul.mubr.f32.vlgmr.msra.gmra.mrb[0].mxu1 %v6512_v45 }
  0xb1   : > { %770 = vmatmul.mubr.f32.vlgmr.msra.gmra.mrb[0].mxu0 %v6512_v45  ;;  %1448 = vmatprep.mubr.f32.mxu1 %v6517_v48 }
  0xb2   : > { %5502 = vmatpush1.bf16.msra.mxu0 %v5501_v46  ;;  %775 = vmatprep.mubr.f32.mxu0 %v6517_v48 }
  0xb3   : > { %5504 = vmatprep.subr.bf16.mxu0 %v5503_v50  ;;  %5582 = vmatpush3.bf16.msra.mxu1 %v5579_v42  ;;  %v387_v42 = vrot.slane %v278_v39, 1  ;;  %v280_v50 = vld [vmem:[%s6468_s6 + $0x40] sm:$0xff]  ;;  %v286_v39 = vld [vmem:[%s6468_s6 + $0x70] sm:$0xff] }
  0xb4   : > { %1449 = vmatmul.mubr.f32.gmra.mrb[2].mxu1 %v6524_v22  ;;  %5584 = vmatprep.subr.bf16.mxu1 %v5583_v59  ;;  %v388_v54 = vrot.slane %v280_v50, 1  ;;  %v445_v55 = vrot.slane %v280_v50, 7  ;;  %v454_v44 = vrot.slane %v286_v39, 7 }
  0xb5   : > { %776 = vmatmul.mubr.f32.gmra.mrb[2].mxu0 %v6524_v22  ;;  %1453 = vmatprep.mubr.f32.mxu1 %v6529_v57  ;;  %v6577_v46 = vsel %vm432_vm0, %v387_v42, %v442_v43 }
  0xb6   : > { %781 = vmatprep.mubr.f32.mxu0 %v6529_v57  ;;  %5506 = vmatpush1.bf16.msra.mxu0 %v5505_v58  ;;  %v703_v58 = vld [vmem:[#allocation5 + $0x470] sm:$0xff]  ;;  %v6601_v62 = vsel %vm432_vm0, %v388_v54, %v445_v55  ;;  %v6608_v5 = vsel %vm432_vm0, %v445_v55, %v446_v63  ;;  %v288_v54 = vld [vmem:[%s6468_s6 + $0x80] sm:$0xff] }
  0xb7   : > { %5508 = vmatprep.subr.bf16.mxu0 %v5507_v60  ;;  %5586 = vmatpush3.bf16.msra.mxu1 %v5583_v59  ;;  %v699_v59 = vld [vmem:[#allocation5 + $0x450] sm:$0xff]  ;;  %v457_v28 = vrot.slane %v288_v54, 7 }
  0xb8   : > { %1454 = vmatmul.mubr.f32.gmra.mrb[4].mxu1 %v6536_v2  ;;  %5588 = vmatprep.subr.bf16.mxu1 %v5587_v21  ;;  %v5529_v1 = vpack.c.bf16 %v702_v61, %v699_v59 }
  0xb9   : > { %782 = vmatmul.mubr.f32.gmra.mrb[4].mxu0 %v6536_v2  ;;  %1458 = vmatprep.mubr.f32.mxu1 %v6512_v45 }
  0xba   : > { %786 = vmatprep.mubr.f32.mxu0 %v6512_v45  ;;  %5510 = vmatpush1.bf16.msra.mxu0 %v5509_v3  ;;  %v683_v3 = vld [vmem:[#allocation5 + $0x3d0] sm:$0xff] }
  0xbb   : > { %5512 = vmatprep.subr.bf16.mxu0 %v5511_v4  ;;  %5590 = vmatpush3.bf16.msra.mxu1 %v5587_v21  ;;  %v686_v4 = vld [vmem:[#allocation5 + $0x3e8] sm:$0xff]  ;;  %v701_v21 = vld [vmem:[#allocation5 + $0x460] sm:$0xff] }
  0xbc   : > { %1459 = vmatmul.mubr.f32.gmra.mrb[6].mxu1 %v6495_v31  ;;  %5592 = vmatprep.subr.bf16.mxu1 %v5591_v56  ;;  %v5595_v7 = vpack.c.bf16 %v686_v4, %v683_v3  ;;  %v5607_v26 = vpack.c.bf16 %v704_v23, %v701_v21  ;;  %v294_v23 = vld [vmem:[%s6468_s6 + $0xb0] sm:$0xff] }
  0xbd   : > { %787 = vmatmul.mubr.f32.gmra.mrb[6].mxu0 %v6495_v31  ;;  %1463 = vmatprep.mubr.f32.mxu1 %v6524_v22  ;;  %v694_v31 = vld [vmem:[#allocation5 + $0x428] sm:$0xff] }
  0xbe   : > { %792 = vmatprep.mubr.f32.mxu0 %v6524_v22  ;;  %5514 = vmatpush1.bf16.msra.mxu0 %v5513_v9  ;;  %v5523_v33 = vpack.c.bf16 %v697_v27, %v694_v31  ;;  %v689_v9 = vld [vmem:[#allocation5 + $0x400] sm:$0xff]  ;;  %v6642_v27 = vsel %vm432_vm0, %v449_v19, %v327_v25 }
  0xbf   : > { %5516 = vmatprep.subr.bf16.mxu0 %v5515_v11  ;;  %5594 = vmatpush3.bf16.msra.mxu1 %v5591_v56  ;;  %v6618_v11 = vsel %vm432_vm0, %v446_v63, %v323_v6  ;;  %v5599_v14 = vpack.c.bf16 %v692_v10, %v689_v9  ;;  %v284_v31 = vld [vmem:[%s6468_s6 + $0x60] sm:$0xff]  ;;  %v392_v56 = vrot.slane %v288_v54, 1  ;;  %v290_v63 = vld [vmem:[%s6468_s6 + $0x90] sm:$0xff]  ;;  %v291_v6 = vld [vmem:[%s6468_s6 + $0x98] sm:$0xff] }
  0xc0   : > { %1464 = vmatmul.mubr.f32.gmra.mrb[8].mxu1 %v6517_v48  ;;  %5596 = vmatprep.subr.bf16.mxu1 %v5595_v7  ;;  %v390_v30 = vrot.slane %v284_v31, 1  ;;  %v393_v3 = vrot.slane %v290_v63, 1  ;;  %v460_v4 = vrot.slane %v290_v63, 7  ;;  %v461_v8 = vrot.slane %v291_v6, 7 }
  0xc1   : > { %793 = vmatmul.mubr.f32.gmra.mrb[8].mxu0 %v6517_v48  ;;  %1468 = vmatprep.mubr.f32.mxu1 %v6536_v2  ;;  %v6584_v48 = vsel %vm432_vm0, %v442_v43, %v443_v47  ;;  %v391_v43 = vrot.slane %v286_v39, 1  ;;  %v287_v47 = vld [vmem:[%s6468_s6 + $0x78] sm:$0xff]  ;;  %v343_v10 = vrot.slane %v291_v6, %v6509_v41  ;;  %v296_v39 = vld [vmem:[%s6468_s6 + $0xc0] sm:$0xff] }
  0xc2   : > { %798 = vmatprep.mubr.f32.mxu0 %v6536_v2  ;;  %5518 = vmatpush1.bf16.msra.mxu0 %v5517_v20  ;;  %v5603_v20 = vpack.c.bf16 %v698_v17, %v695_v16  ;;  %v455_v50 = vrot.slane %v287_v47, 7  ;;  %v335_v52 = vrot.slane %v287_v47, %v6509_v41  ;;  %v6729_v9 = vsel %vm432_vm0, %v460_v4, %v461_v8  ;;  %v293_v16 = vld [vmem:[%s6468_s6 + $0xa8] sm:$0xff] }
  0xc3   : > { %5520 = vmatprep.subr.bf16.mxu0 %v5519_v24  ;;  %5598 = vmatpush3.bf16.msra.mxu1 %v5595_v7  ;;  %v6633_v24 = vsel %vm432_vm0, %v448_v13, %v449_v19  ;;  %v6674_v49 = vsel %vm432_vm0, %v391_v43, %v454_v44  ;;  %v6722_v7 = vsel %vm432_vm0, %v393_v3, %v460_v4  ;;  %v464_v19 = vrot.slane %v293_v16, 7  ;;  %v299_v3 = vld [vmem:[%s6468_s6 + $0xd8] sm:$0xff] }
  0xc4   : > { %1469 = vmatmul.mubr.f32.gmra.mrb[10].mxu1 %v6529_v57  ;;  %5600 = vmatprep.subr.bf16.mxu1 %v5599_v14  ;;  %v6681_v51 = vsel %vm432_vm0, %v454_v44, %v455_v50  ;;  %v6690_v55 = vsel %vm432_vm0, %v455_v50, %v335_v52  ;;  %v6738_v13 = vsel %vm432_vm0, %v461_v8, %v343_v10  ;;  %v396_v44 = vrot.slane %v296_v39, 1  ;;  %v297_v50 = vld [vmem:[%s6468_s6 + $0xc8] sm:$0xff] }
  0xc5   : > { %799 = vmatmul.mubr.f32.gmra.mrb[10].mxu0 %v6529_v57  ;;  %1473 = vmatprep.mubr.f32.mxu1 %v6553_v29  ;;  %v700_v57 = vld [vmem:[#allocation5 + $0x458] sm:$0xff]  ;;  %v347_v21 = vrot.slane %v293_v16, %v6509_v41  ;;  %v469_v47 = vrot.slane %v296_v39, 7  ;;  %v470_v54 = vrot.slane %v297_v50, 7  ;;  %v473_v6 = vrot.slane %v299_v3, 7 }
  0xc6   : > { %803 = vmatprep.mubr.f32.mxu0 %v6553_v29  ;;  %5522 = vmatpush1.bf16.msra.mxu0 %v5521_v32  ;;  %v5527_v60 = vpack.c.bf16 %v703_v58, %v700_v57  ;;  %v451_v32 = vrot.slane %v284_v31, 7  ;;  %v289_v57 = vld [vmem:[%s6468_s6 + $0x88] sm:$0xff]  ;;  %v6698_v58 = vsel %vm432_vm0, %v392_v56, %v457_v28  ;;  %v466_v31 = vrot.slane %v294_v23, 7 }
  0xc7   : > { %5524 = vmatprep.subr.bf16.mxu0 %v5523_v33  ;;  %5602 = vmatpush3.bf16.msra.mxu1 %v5599_v14  ;;  %v285_v33 = vld [vmem:[%s6468_s6 + $0x68] sm:$0xff]  ;;  %v458_v59 = vrot.slane %v289_v57, 7  ;;  %v339_v61 = vrot.slane %v289_v57, %v6509_v41  ;;  %v394_v14 = vrot.slane %v292_v12, 1  ;;  %v6762_v25 = vsel %vm432_vm0, %v464_v19, %v347_v21  ;;  %v298_v57 = vld [vmem:[%s6468_s6 + $0xd0] sm:$0xff]  ;;  %v300_v12 = vld [vmem:[%s6468_s6 + $0xe0] sm:$0xff] }
  0xc8   : > { %1474 = vmatmul.mubr.f32.gmra.mrb[12].mxu1 %v6512_v45  ;;  %5604 = vmatprep.subr.bf16.mxu1 %v5603_v20  ;;  %v6650_v34 = vsel %vm432_vm0, %v390_v30, %v451_v32  ;;  %v452_v35 = vrot.slane %v285_v33, 7  ;;  %v295_v30 = vld [vmem:[%s6468_s6 + $0xb8] sm:$0xff]  ;;  %v6794_v52 = vsel %vm432_vm0, %v396_v44, %v469_v47  ;;  %v6801_v56 = vsel %vm432_vm0, %v469_v47, %v470_v54 }
  0xc9   : > { %804 = vmatmul.mubr.f32.gmra.mrb[12].mxu0 %v6512_v45  ;;  %1478 = vmatprep.mubr.f32.mxu1 %v6560_v36  ;;  %v6746_v17 = vsel %vm432_vm0, %v394_v14, %v463_v15  ;;  %v472_v63 = vrot.slane %v298_v57, 7  ;;  %v359_v10 = vrot.slane %v299_v3, %v6509_v41  ;;  %v475_v16 = vrot.slane %v300_v12, 7  ;;  %v303_v44 = vld [vmem:[%s6468_s6 + $0xf8] sm:$0xff] }
  0xca   : > { %809 = vmatprep.mubr.f32.mxu0 %v6560_v36  ;;  %5526 = vmatpush1.bf16.msra.mxu0 %v5525_v38  ;;  %v6657_v37 = vsel %vm432_vm0, %v451_v32, %v452_v35  ;;  %v331_v38 = vrot.slane %v285_v33, %v6509_v41  ;;  %v467_v33 = vrot.slane %v295_v30, 7 }
  0xcb   : > { %5528 = vmatprep.subr.bf16.mxu0 %v5527_v60  ;;  %5606 = vmatpush3.bf16.msra.mxu1 %v5603_v20  ;;  %v6705_v60 = vsel %vm432_vm0, %v457_v28, %v458_v59  ;;  %v6753_v20 = vsel %vm432_vm0, %v463_v15, %v464_v19  ;;  %v355_v28 = vrot.slane %v297_v50, %v6509_v41  ;;  %v398_v15 = vrot.slane %v300_v12, 1  ;;  %v301_v19 = vld [vmem:[%s6468_s6 + $0xe8] sm:$0xff] }
  0xcc   : > { %1479 = vmatmul.mubr.f32.gmra.mrb[14].mxu1 %v6524_v22  ;;  %5608 = vmatprep.subr.bf16.mxu1 %v5607_v26  ;;  %v6666_v42 = vsel %vm432_vm0, %v452_v35, %v331_v38  ;;  %v6777_v35 = vsel %vm432_vm0, %v466_v31, %v467_v33  ;;  %v351_v38 = vrot.slane %v295_v30, %v6509_v41  ;;  %v302_v30 = vld [vmem:[%s6468_s6 + $0xf0] sm:$0xff]  ;;  %v479_v50 = vrot.slane %v303_v44, 7 }
  0xcd   : > { %810 = vmatmul.mubr.f32.gmra.mrb[14].mxu0 %v6524_v22  ;;  %1483 = vmatprep.mubr.f32.mxu1 %v6569_v40  ;;  %v6825_v8 = vsel %vm432_vm0, %v472_v63, %v473_v6  ;;  %v6834_v14 = vsel %vm432_vm0, %v473_v6, %v359_v10  ;;  %v6842_v21 = vsel %vm432_vm0, %v398_v15, %v475_v16  ;;  %v478_v39 = vrot.slane %v302_v30, 7 }
  0xce   : > { %815 = vmatprep.mubr.f32.mxu0 %v6569_v40  ;;  %5530 = vmatpush1.bf16.msra.mxu0 %v5529_v1  ;;  %v6714_v1 = vsel %vm432_vm0, %v458_v59, %v339_v61  ;;  %v6786_v43 = vsel %vm432_vm0, %v467_v33, %v351_v38  ;;  %v6810_v59 = vsel %vm432_vm0, %v470_v54, %v355_v28  ;;  %v397_v61 = vrot.slane %v298_v57, 1 }
  0xcf   : > { %5707 = vmatprep.subr.bf16.mxu0 %v9325_v0  ;;  %5610 = vmatpush3.bf16.msra.mxu1 %v5607_v26  ;;  %v395_v26 = vrot.slane %v294_v23, 1  ;;  %v476_v23 = vrot.slane %v301_v19, 7  ;;  %v399_v38 = vrot.slane %v302_v30, 1  ;;  %v6873_v54 = vsel %vm432_vm0, %v478_v39, %v479_v50 }
  0xd0   : > { %1484 = vmatmul.mubr.f32.gmra.mrb[16].mxu1 %v6536_v2  ;;  %v6818_v4 = vsel %vm432_vm0, %v397_v61, %v472_v63  ;;  %v367_v28 = vrot.slane %v303_v44, %v6509_v41  ;;  %v9323_v61 = vmov 0.0  }
  0xd1   : > { %816 = vmatmul.mubr.f32.gmra.mrb[16].mxu0 %v6536_v2  ;;  %1488 = vmatprep.mubr.f32.mxu1 %v6577_v46  ;;  %v6770_v32 = vsel %vm432_vm0, %v395_v26, %v466_v31  ;;  %v6849_v26 = vsel %vm432_vm0, %v475_v16, %v476_v23  ;;  %v363_v31 = vrot.slane %v301_v19, %v6509_v41 }
  0xd2   : > { %820 = vmatprep.mubr.f32.mxu0 %v6577_v46  ;;  %v6866_v47 = vsel %vm432_vm0, %v399_v38, %v478_v39  ;;  %v6881_v57 = vsel %vm432_vm0, %v479_v50, %v367_v28 }
  0xd3   : > { %v6858_v33 = vsel %vm432_vm0, %v476_v23, %v363_v31 }
  0xd4   : > { %1489 = vmatmul.mubr.f32.gmra.mrb[18].mxu1 %v6553_v29 }
  0xd5   : > { %821 = vmatmul.mubr.f32.gmra.mrb[18].mxu0 %v6553_v29  ;;  %1493 = vmatprep.mubr.f32.mxu1 %v6584_v48 }
  0xd6   : > { %826 = vmatprep.mubr.f32.mxu0 %v6584_v48 }
  0xd8   : > { %1494 = vmatmul.mubr.f32.gmra.mrb[20].mxu1 %v6560_v36 }
  0xd9   : > { %827 = vmatmul.mubr.f32.gmra.mrb[20].mxu0 %v6560_v36  ;;  %1498 = vmatprep.mubr.f32.mxu1 %v6593_v53 }
  0xda   : > { %832 = vmatprep.mubr.f32.mxu0 %v6593_v53 }
  0xdc   : > { %1499 = vmatmul.mubr.f32.gmra.mrb[22].mxu1 %v6569_v40 }
  0xdd   : > { %833 = vmatmul.mubr.f32.gmra.mrb[22].mxu0 %v6569_v40  ;;  %1503 = vmatprep.mubr.f32.mxu1 %v6601_v62 }
  0xde   : > { %837 = vmatprep.mubr.f32.mxu0 %v6601_v62 }
  0xe0   : > { %1504 = vmatmul.mubr.f32.gmra.mrb[24].mxu1 %v6577_v46 }
  0xe1   : > { %838 = vmatmul.mubr.f32.gmra.mrb[24].mxu0 %v6577_v46  ;;  %1508 = vmatprep.mubr.f32.mxu1 %v6608_v5 }
  0xe2   : > { %843 = vmatprep.mubr.f32.mxu0 %v6608_v5 }
  0xe4   : > { %1509 = vmatmul.mubr.f32.gmra.mrb[26].mxu1 %v6584_v48 }
  0xe5   : > { %844 = vmatmul.mubr.f32.gmra.mrb[26].mxu0 %v6584_v48  ;;  %1513 = vmatprep.mubr.f32.mxu1 %v6618_v11 }
  0xe6   : > { %849 = vmatprep.mubr.f32.mxu0 %v6618_v11 }
  0xe8   : > { %1514 = vmatmul.mubr.f32.gmra.mrb[28].mxu1 %v6593_v53 }
  0xe9   : > { %850 = vmatmul.mubr.f32.gmra.mrb[28].mxu0 %v6593_v53  ;;  %1518 = vmatprep.mubr.f32.mxu1 %v6626_v18 }
  0xea   : > { %854 = vmatprep.mubr.f32.mxu0 %v6626_v18 }
  0xec   : > { %1519 = vmatmul.mubr.f32.gmra.mrb[30].mxu1 %v6601_v62 }
  0xed   : > { %855 = vmatmul.mubr.f32.gmra.mrb[30].mxu0 %v6601_v62  ;;  %1523 = vmatprep.mubr.f32.mxu1 %v6633_v24 }
  0xee   : > { %860 = vmatprep.mubr.f32.mxu0 %v6633_v24 }
  0xf0   : > { %1524 = vmatmul.mubr.f32.gmra.mrb[32].mxu1 %v6608_v5 }
  0xf1   : > { %861 = vmatmul.mubr.f32.gmra.mrb[32].mxu0 %v6608_v5  ;;  %1528 = vmatprep.mubr.f32.mxu1 %v6642_v27 }
  0xf2   : > { %866 = vmatprep.mubr.f32.mxu0 %v6642_v27 }
  0xf4   : > { %1529 = vmatmul.mubr.f32.gmra.mrb[34].mxu1 %v6618_v11 }
  0xf5   : > { %867 = vmatmul.mubr.f32.gmra.mrb[34].mxu0 %v6618_v11  ;;  %1533 = vmatprep.mubr.f32.mxu1 %v6650_v34 }
  0xf6   : > { %871 = vmatprep.mubr.f32.mxu0 %v6650_v34 }
  0xf8   : > { %1534 = vmatmul.mubr.f32.gmra.mrb[36].mxu1 %v6626_v18 }
  0xf9   : > { %872 = vmatmul.mubr.f32.gmra.mrb[36].mxu0 %v6626_v18  ;;  %1538 = vmatprep.mubr.f32.mxu1 %v6657_v37 }
  0xfa   : > { %877 = vmatprep.mubr.f32.mxu0 %v6657_v37 }
  0xfc   : > { %1539 = vmatmul.mubr.f32.gmra.mrb[38].mxu1 %v6633_v24 }
  0xfd   : > { %878 = vmatmul.mubr.f32.gmra.mrb[38].mxu0 %v6633_v24  ;;  %1543 = vmatprep.mubr.f32.mxu1 %v6666_v42 }
  0xfe   : > { %883 = vmatprep.mubr.f32.mxu0 %v6666_v42 }
 0x100   : > { %1544 = vmatmul.mubr.f32.gmra.mrb[40].mxu1 %v6642_v27 }
 0x101   : > { %884 = vmatmul.mubr.f32.gmra.mrb[40].mxu0 %v6642_v27  ;;  %1548 = vmatprep.mubr.f32.mxu1 %v6674_v49 }
 0x102   : > { %888 = vmatprep.mubr.f32.mxu0 %v6674_v49 }
 0x104   : > { %1549 = vmatmul.mubr.f32.gmra.mrb[42].mxu1 %v6650_v34 }
 0x105   : > { %889 = vmatmul.mubr.f32.gmra.mrb[42].mxu0 %v6650_v34  ;;  %1553 = vmatprep.mubr.f32.mxu1 %v6681_v51 }
 0x106   : > { %894 = vmatprep.mubr.f32.mxu0 %v6681_v51 }
 0x108   : > { %1554 = vmatmul.mubr.f32.gmra.mrb[44].mxu1 %v6657_v37 }
 0x109   : > { %895 = vmatmul.mubr.f32.gmra.mrb[44].mxu0 %v6657_v37  ;;  %1558 = vmatprep.mubr.f32.mxu1 %v6690_v55 }
 0x10a   : > { %900 = vmatprep.mubr.f32.mxu0 %v6690_v55 }
 0x10c   : > { %1559 = vmatmul.mubr.f32.gmra.mrb[46].mxu1 %v6666_v42 }
 0x10d   : > { %901 = vmatmul.mubr.f32.gmra.mrb[46].mxu0 %v6666_v42  ;;  %1563 = vmatprep.mubr.f32.mxu1 %v6698_v58 }
 0x10e   : > { %905 = vmatprep.mubr.f32.mxu0 %v6698_v58 }
 0x110   : > { %1564 = vmatmul.mubr.f32.gmra.mrb[48].mxu1 %v6674_v49 }
 0x111   : > { %906 = vmatmul.mubr.f32.gmra.mrb[48].mxu0 %v6674_v49  ;;  %1568 = vmatprep.mubr.f32.mxu1 %v6705_v60 }
 0x112   : > { %911 = vmatprep.mubr.f32.mxu0 %v6705_v60 }
 0x114   : > { %1569 = vmatmul.mubr.f32.gmra.mrb[50].mxu1 %v6681_v51 }
 0x115   : > { %912 = vmatmul.mubr.f32.gmra.mrb[50].mxu0 %v6681_v51  ;;  %1573 = vmatprep.mubr.f32.mxu1 %v6714_v1 }
 0x116   : > { %917 = vmatprep.mubr.f32.mxu0 %v6714_v1 }
 0x118   : > { %1574 = vmatmul.mubr.f32.gmra.mrb[52].mxu1 %v6690_v55 }
 0x119   : > { %918 = vmatmul.mubr.f32.gmra.mrb[52].mxu0 %v6690_v55  ;;  %1578 = vmatprep.mubr.f32.mxu1 %v6722_v7 }
 0x11a   : > { %922 = vmatprep.mubr.f32.mxu0 %v6722_v7 }
 0x11c   : > { %1579 = vmatmul.mubr.f32.gmra.mrb[54].mxu1 %v6698_v58 }
 0x11d   : > { %923 = vmatmul.mubr.f32.gmra.mrb[54].mxu0 %v6698_v58  ;;  %1583 = vmatprep.mubr.f32.mxu1 %v6729_v9 }
 0x11e   : > { %928 = vmatprep.mubr.f32.mxu0 %v6729_v9 }
 0x120   : > { %1584 = vmatmul.mubr.f32.gmra.mrb[56].mxu1 %v6705_v60 }
 0x121   : > { %929 = vmatmul.mubr.f32.gmra.mrb[56].mxu0 %v6705_v60  ;;  %1588 = vmatprep.mubr.f32.mxu1 %v6738_v13 }
 0x122   : > { %934 = vmatprep.mubr.f32.mxu0 %v6738_v13 }
 0x124   : > { %1589 = vmatmul.mubr.f32.gmra.mrb[58].mxu1 %v6714_v1 }
 0x125   : > { %935 = vmatmul.mubr.f32.gmra.mrb[58].mxu0 %v6714_v1  ;;  %1593 = vmatprep.mubr.f32.mxu1 %v6746_v17 }
 0x126   : > { %939 = vmatprep.mubr.f32.mxu0 %v6746_v17 }
 0x128   : > { %1594 = vmatmul.mubr.f32.gmra.mrb[60].mxu1 %v6722_v7 }
 0x129   : > { %940 = vmatmul.mubr.f32.gmra.mrb[60].mxu0 %v6722_v7  ;;  %1598 = vmatprep.mubr.f32.mxu1 %v6753_v20 }
 0x12a   : > { %945 = vmatprep.mubr.f32.mxu0 %v6753_v20 }
 0x12c   : > { %1599 = vmatmul.mubr.f32.gmra.mrb[62].mxu1 %v6729_v9 }
 0x12d   : > { %946 = vmatmul.mubr.f32.gmra.mrb[62].mxu0 %v6729_v9  ;;  %1603 = vmatprep.mubr.f32.mxu1 %v6762_v25 }
 0x12e   : > { %951 = vmatprep.mubr.f32.mxu0 %v6762_v25 }
 0x130   : > { %1604 = vmatmul.mubr.f32.gmra.mrb[64].mxu1 %v6738_v13 }
 0x131   : > { %952 = vmatmul.mubr.f32.gmra.mrb[64].mxu0 %v6738_v13  ;;  %1608 = vmatprep.mubr.f32.mxu1 %v6770_v32 }
 0x132   : > { %956 = vmatprep.mubr.f32.mxu0 %v6770_v32 }
 0x134   : > { %1609 = vmatmul.mubr.f32.gmra.mrb[66].mxu1 %v6746_v17 }
 0x135   : > { %957 = vmatmul.mubr.f32.gmra.mrb[66].mxu0 %v6746_v17  ;;  %1613 = vmatprep.mubr.f32.mxu1 %v6777_v35 }
 0x136   : > { %962 = vmatprep.mubr.f32.mxu0 %v6777_v35 }
 0x138   : > { %1614 = vmatmul.mubr.f32.gmra.mrb[68].mxu1 %v6753_v20 }
 0x139   : > { %963 = vmatmul.mubr.f32.gmra.mrb[68].mxu0 %v6753_v20  ;;  %1618 = vmatprep.mubr.f32.mxu1 %v6786_v43 }
 0x13a   : > { %968 = vmatprep.mubr.f32.mxu0 %v6786_v43 }
 0x13c   : > { %1619 = vmatmul.mubr.f32.gmra.mrb[70].mxu1 %v6762_v25 }
 0x13d   : > { %969 = vmatmul.mubr.f32.gmra.mrb[70].mxu0 %v6762_v25  ;;  %1623 = vmatprep.mubr.f32.mxu1 %v6794_v52 }
 0x13e   : > { %973 = vmatprep.mubr.f32.mxu0 %v6794_v52 }
 0x140   : > { %1624 = vmatmul.mubr.f32.gmra.mrb[72].mxu1 %v6770_v32 }
 0x141   : > { %974 = vmatmul.mubr.f32.gmra.mrb[72].mxu0 %v6770_v32  ;;  %1628 = vmatprep.mubr.f32.mxu1 %v6801_v56 }
 0x142   : > { %979 = vmatprep.mubr.f32.mxu0 %v6801_v56 }
 0x144   : > { %1629 = vmatmul.mubr.f32.gmra.mrb[74].mxu1 %v6777_v35 }
 0x145   : > { %980 = vmatmul.mubr.f32.gmra.mrb[74].mxu0 %v6777_v35  ;;  %1633 = vmatprep.mubr.f32.mxu1 %v6810_v59 }
 0x146   : > { %985 = vmatprep.mubr.f32.mxu0 %v6810_v59 }
 0x148   : > { %1634 = vmatmul.mubr.f32.gmra.mrb[76].mxu1 %v6786_v43 }
 0x149   : > { %986 = vmatmul.mubr.f32.gmra.mrb[76].mxu0 %v6786_v43  ;;  %1638 = vmatprep.mubr.f32.mxu1 %v6818_v4 }
 0x14a   : > { %990 = vmatprep.mubr.f32.mxu0 %v6818_v4 }
 0x14c   : > { %1639 = vmatmul.mubr.f32.gmra.mrb[78].mxu1 %v6794_v52 }
 0x14d   : > { %991 = vmatmul.mubr.f32.gmra.mrb[78].mxu0 %v6794_v52  ;;  %1643 = vmatprep.mubr.f32.mxu1 %v6825_v8 }
 0x14e   : > { %996 = vmatprep.mubr.f32.mxu0 %v6825_v8 }
 0x150   : > { %1644 = vmatmul.mubr.f32.gmra.mrb[80].mxu1 %v6801_v56 }
 0x151   : > { %997 = vmatmul.mubr.f32.gmra.mrb[80].mxu0 %v6801_v56  ;;  %1648 = vmatprep.mubr.f32.mxu1 %v6834_v14 }
 0x152   : > { %1002 = vmatprep.mubr.f32.mxu0 %v6834_v14 }
 0x154   : > { %1649 = vmatmul.mubr.f32.gmra.mrb[82].mxu1 %v6810_v59 }
 0x155   : > { %1003 = vmatmul.mubr.f32.gmra.mrb[82].mxu0 %v6810_v59  ;;  %1653 = vmatprep.mubr.f32.mxu1 %v6842_v21 }
 0x156   : > { %1007 = vmatprep.mubr.f32.mxu0 %v6842_v21 }
 0x158   : > { %1654 = vmatmul.mubr.f32.gmra.mrb[84].mxu1 %v6818_v4 }
 0x159   : > { %1008 = vmatmul.mubr.f32.gmra.mrb[84].mxu0 %v6818_v4  ;;  %1658 = vmatprep.mubr.f32.mxu1 %v6849_v26 }
 0x15a   : > { %1013 = vmatprep.mubr.f32.mxu0 %v6849_v26 }
 0x15c   : > { %1659 = vmatmul.mubr.f32.gmra.mrb[86].mxu1 %v6825_v8 }
 0x15d   : > { %1014 = vmatmul.mubr.f32.gmra.mrb[86].mxu0 %v6825_v8  ;;  %1663 = vmatprep.mubr.f32.mxu1 %v6858_v33 }
 0x15e   : > { %1019 = vmatprep.mubr.f32.mxu0 %v6858_v33 }
 0x160   : > { %1664 = vmatmul.mubr.f32.gmra.mrb[88].mxu1 %v6834_v14 }
 0x161   : > { %1020 = vmatmul.mubr.f32.gmra.mrb[88].mxu0 %v6834_v14  ;;  %1668 = vmatprep.mubr.f32.mxu1 %v6866_v47 }
 0x162   : > { %1024 = vmatprep.mubr.f32.mxu0 %v6866_v47 }
 0x164   : > { %1669 = vmatmul.mubr.f32.gmra.mrb[90].mxu1 %v6842_v21 }
 0x165   : > { %1025 = vmatmul.mubr.f32.gmra.mrb[90].mxu0 %v6842_v21  ;;  %1673 = vmatprep.mubr.f32.mxu1 %v6873_v54 }
 0x166   : > { %1030 = vmatprep.mubr.f32.mxu0 %v6873_v54 }
 0x168   : > { %1674 = vmatmul.mubr.f32.gmra.mrb[92].mxu1 %v6849_v26 }
 0x169   : > { %1031 = vmatmul.mubr.f32.gmra.mrb[92].mxu0 %v6849_v26  ;;  %1678 = vmatprep.mubr.f32.mxu1 %v6881_v57 }
 0x16a   : > { %1036 = vmatprep.mubr.f32.mxu0 %v6881_v57 }
 0x16c   : > { %1679 = vmatmul.mubr.f32.gmra.mrb[94].mxu1 %v6858_v33 }
 0x16d   : > { %1037 = vmatmul.mubr.f32.gmra.mrb[94].mxu0 %v6858_v33  ;;  %5259 = vmatprep.mubr.f32.mxu1 %v6512_v45 }
 0x16e   : > { %1106 = vmatprep.mubr.f32.mxu0 %v9323_v61 }
 0x170   : > { %5260 = vmatmul.mubr.f32.vlgmr.msra.gmra.mrb[96].mxu1 %v6524_v22 }
 0x171   : > { %1107 = vmatmul.mubr.f32.vlgmr.msra.gmra.mrb[0].mxu0 %v6512_v45  ;;  %5262 = vmatprep.mubr.f32.mxu1 %v6536_v2 }
 0x172   : > { %1112 = vmatprep.mubr.f32.mxu0 %v9323_v61 }
 0x174   : > { %5263 = vmatmul.mubr.f32.gmra.mrb[98].mxu1 %v6553_v29 }
 0x175   : > { %1113 = vmatmul.mubr.f32.gmra.mrb[2].mxu0 %v6524_v22  ;;  %5265 = vmatprep.mubr.f32.mxu1 %v6560_v36 }
 0x176   : > { %1118 = vmatprep.mubr.f32.mxu0 %v9323_v61 }
 0x178   : > { %5266 = vmatmul.mubr.f32.gmra.mrb[100].mxu1 %v6569_v40 }
 0x179   : > { %1119 = vmatmul.mubr.f32.gmra.mrb[4].mxu0 %v6536_v2  ;;  %5268 = vmatprep.mubr.f32.mxu1 %v6577_v46 }
 0x17a   : > { %1123 = vmatprep.mubr.f32.mxu0 %v9323_v61 }
 0x17c   : > { %5269 = vmatmul.mubr.f32.gmra.mrb[102].mxu1 %v6584_v48 }
 0x17d   : > { %1124 = vmatmul.mubr.f32.gmra.mrb[6].mxu0 %v6553_v29  ;;  %5271 = vmatprep.mubr.f32.mxu1 %v6593_v53 }
 0x17e   : > { %1129 = vmatprep.mubr.f32.mxu0 %v9323_v61 }
 0x180   : > { %5272 = vmatmul.mubr.f32.gmra.mrb[104].mxu1 %v6601_v62 }
 0x181   : > { %1130 = vmatmul.mubr.f32.gmra.mrb[8].mxu0 %v6560_v36  ;;  %5274 = vmatprep.mubr.f32.mxu1 %v6608_v5 }
 0x182   : > { %1135 = vmatprep.mubr.f32.mxu0 %v9323_v61 }
 0x183   : > { %v6911_v45 = vpop.f32.mrb[0].mxu1 }
 0x184   : > { %5275 = vmatmul.mubr.f32.gmra.mrb[106].mxu1 %v6618_v11  ;;  %v1447_v22 = vpop.f32.mrb[1].mxu1 }
 0x185   : > { %1136 = vmatmul.mubr.f32.gmra.mrb[10].mxu0 %v6569_v40  ;;  %5277 = vmatprep.mubr.f32.mxu1 %v6626_v18 }
 0x186   : > { %1140 = vmatprep.mubr.f32.mxu0 %v9323_v61 }
 0x187   : > { %v6917_v2 = vpop.f32.mrb[2].mxu1 }
 0x188   : > { %5278 = vmatmul.mubr.f32.gmra.mrb[108].mxu1 %v6633_v24  ;;  %v1452_v29 = vpop.f32.mrb[3].mxu1 }
 0x189   : > { %1141 = vmatmul.mubr.f32.gmra.mrb[12].mxu0 %v6577_v46  ;;  %5280 = vmatprep.mubr.f32.mxu1 %v6642_v27 }
 0x18a   : > { %1146 = vmatprep.mubr.f32.mxu0 %v9323_v61 }
 0x18b   : > { %v6923_v36 = vpop.f32.mrb[4].mxu1 }
 0x18c   : > { %5281 = vmatmul.mubr.f32.gmra.mrb[110].mxu1 %v6650_v34  ;;  %v1457_v40 = vpop.f32.mrb[5].mxu1 }
 0x18d   : > { %1147 = vmatmul.mubr.f32.gmra.mrb[14].mxu0 %v6584_v48  ;;  %5283 = vmatprep.mubr.f32.mxu1 %v6657_v37 }
 0x18e   : > { %1152 = vmatprep.mubr.f32.mxu0 %v9323_v61 }
 0x18f   : > { %v6929_v63 = vpop.f32.mrb[6].mxu1 }
 0x190   : > { %5284 = vmatmul.mubr.f32.gmra.mrb[112].mxu1 %v6666_v42  ;;  %v1462_v46 = vpop.f32.mrb[7].mxu1 }
 0x191   : > { %1153 = vmatmul.mubr.f32.gmra.mrb[16].mxu0 %v6593_v53  ;;  %5286 = vmatprep.mubr.f32.mxu1 %v6674_v49 }
 0x192   : > { %1157 = vmatprep.mubr.f32.mxu0 %v9323_v61 }
 0x193   : > { %v6935_v3 = vpop.f32.mrb[8].mxu1 }
 0x194   : > { %5287 = vmatmul.mubr.f32.gmra.mrb[114].mxu1 %v6681_v51  ;;  %v1467_v48 = vpop.f32.mrb[9].mxu1 }
 0x195   : > { %1158 = vmatmul.mubr.f32.gmra.mrb[18].mxu0 %v6601_v62  ;;  %5289 = vmatprep.mubr.f32.mxu1 %v6690_v55 }
 0x196   : > { %1163 = vmatprep.mubr.f32.mxu0 %v9323_v61 }
 0x197   : > { %v6941_v6 = vpop.f32.mrb[10].mxu1 }
 0x198   : > { %5290 = vmatmul.mubr.f32.gmra.mrb[116].mxu1 %v6698_v58  ;;  %v1472_v53 = vpop.f32.mrb[11].mxu1 }
 0x199   : > { %1164 = vmatmul.mubr.f32.gmra.mrb[20].mxu0 %v6608_v5  ;;  %5292 = vmatprep.mubr.f32.mxu1 %v6705_v60 }
 0x19a   : > { %1169 = vmatprep.mubr.f32.mxu0 %v9323_v61 }
 0x19b   : > { %v6947_v10 = vpop.f32.mrb[12].mxu1 }
 0x19c   : > { %5293 = vmatmul.mubr.f32.gmra.mrb[118].mxu1 %v6714_v1  ;;  %v1477_v62 = vpop.f32.mrb[13].mxu1 }
 0x19d   : > { %1170 = vmatmul.mubr.f32.gmra.mrb[22].mxu0 %v6618_v11  ;;  %5295 = vmatprep.mubr.f32.mxu1 %v6722_v7 }
 0x19e   : > { %1174 = vmatprep.mubr.f32.mxu0 %v9323_v61 }
 0x19f   : > { %v6953_v12 = vpop.f32.mrb[14].mxu1 }
 0x1a0   : > { %5296 = vmatmul.mubr.f32.gmra.mrb[120].mxu1 %v6729_v9  ;;  %v1482_v5 = vpop.f32.mrb[15].mxu1 }
 0x1a1   : > { %1175 = vmatmul.mubr.f32.gmra.mrb[24].mxu0 %v6626_v18  ;;  %5298 = vmatprep.mubr.f32.mxu1 %v6738_v13 }
 0x1a2   : > { %1180 = vmatprep.mubr.f32.mxu0 %v9323_v61 }
 0x1a3   : > { %v6959_v15 = vpop.f32.mrb[16].mxu1 }
 0x1a4   : > { %5299 = vmatmul.mubr.f32.gmra.mrb[122].mxu1 %v6746_v17  ;;  %v1487_v11 = vpop.f32.mrb[17].mxu1 }
 0x1a5   : > { %1181 = vmatmul.mubr.f32.gmra.mrb[26].mxu0 %v6633_v24  ;;  %5301 = vmatprep.mubr.f32.mxu1 %v6753_v20 }
 0x1a6   : > { %1186 = vmatprep.mubr.f32.mxu0 %v9323_v61 }
 0x1a7   : > { %v6965_v16 = vpop.f32.mrb[18].mxu1 }
 0x1a8   : > { %5302 = vmatmul.mubr.f32.gmra.mrb[124].mxu1 %v6762_v25  ;;  %v1492_v18 = vpop.f32.mrb[19].mxu1 }
 0x1a9   : > { %1187 = vmatmul.mubr.f32.gmra.mrb[28].mxu0 %v6642_v27  ;;  %5304 = vmatprep.mubr.f32.mxu1 %v6770_v32 }
 0x1aa   : > { %1191 = vmatprep.mubr.f32.mxu0 %v9323_v61 }
 0x1ab   : > { %v6971_v19 = vpop.f32.mrb[20].mxu1 }
 0x1ac   : > { %5305 = vmatmul.mubr.f32.gmra.mrb[126].mxu1 %v6777_v35  ;;  %v1497_v24 = vpop.f32.mrb[21].mxu1 }
 0x1ad   : > { %1192 = vmatmul.mubr.f32.gmra.mrb[30].mxu0 %v6650_v34  ;;  %5307 = vmatprep.mubr.f32.mxu1 %v6786_v43 }
 0x1ae   : > { %1197 = vmatprep.mubr.f32.mxu0 %v9323_v61 }
 0x1af   : > { %v6977_v23 = vpop.f32.mrb[22].mxu1 }
 0x1b0   : > { %5308 = vmatmul.mubr.f32.gmra.mrb[128].mxu1 %v6794_v52  ;;  %v1502_v27 = vpop.f32.mrb[23].mxu1 }
 0x1b1   : > { %1198 = vmatmul.mubr.f32.gmra.mrb[32].mxu0 %v6657_v37  ;;  %5310 = vmatprep.mubr.f32.mxu1 %v6801_v56 }
 0x1b2   : > { %1203 = vmatprep.mubr.f32.mxu0 %v9323_v61 }
 0x1b3   : > { %v6983_v31 = vpop.f32.mrb[24].mxu1 }
 0x1b4   : > { %5311 = vmatmul.mubr.f32.gmra.mrb[130].mxu1 %v6810_v59  ;;  %v1507_v34 = vpop.f32.mrb[25].mxu1 }
 0x1b5   : > { %1204 = vmatmul.mubr.f32.gmra.mrb[34].mxu0 %v6666_v42  ;;  %5313 = vmatprep.mubr.f32.mxu1 %v6818_v4 }
 0x1b6   : > { %1208 = vmatprep.mubr.f32.mxu0 %v9323_v61 }
 0x1b7   : > { %v6989_v30 = vpop.f32.mrb[26].mxu1 }
 0x1b8   : > { %5314 = vmatmul.mubr.f32.gmra.mrb[132].mxu1 %v6825_v8  ;;  %v1512_v37 = vpop.f32.mrb[27].mxu1 }
 0x1b9   : > { %1209 = vmatmul.mubr.f32.gmra.mrb[36].mxu0 %v6674_v49  ;;  %5316 = vmatprep.mubr.f32.mxu1 %v6834_v14 }
 0x1ba   : > { %1214 = vmatprep.mubr.f32.mxu0 %v9323_v61 }
 0x1bb   : > { %v6995_v38 = vpop.f32.mrb[28].mxu1 }
 0x1bc   : > { %5317 = vmatmul.mubr.f32.gmra.mrb[134].mxu1 %v6842_v21  ;;  %v1517_v42 = vpop.f32.mrb[29].mxu1 }
 0x1bd   : > { %1215 = vmatmul.mubr.f32.gmra.mrb[38].mxu0 %v6681_v51  ;;  %5319 = vmatprep.mubr.f32.mxu1 %v6849_v26 }
 0x1be   : > { %1220 = vmatprep.mubr.f32.mxu0 %v9323_v61 }
 0x1bf   : > { %v7001_v39 = vpop.f32.mrb[30].mxu1 }
 0x1c0   : > { %5320 = vmatmul.mubr.f32.gmra.mrb[136].mxu1 %v6858_v33  ;;  %v1522_v49 = vpop.f32.mrb[31].mxu1 }
 0x1c1   : > { %1221 = vmatmul.mubr.f32.gmra.mrb[40].mxu0 %v6690_v55  ;;  %5322 = vmatprep.mubr.f32.mxu1 %v6866_v47 }
 0x1c2   : > { %1225 = vmatprep.mubr.f32.mxu0 %v9323_v61 }
 0x1c3   : > { %v7007_v44 = vpop.f32.mrb[32].mxu1 }
 0x1c4   : > { %5323 = vmatmul.mubr.f32.gmra.mrb[138].mxu1 %v6873_v54  ;;  %v1527_v51 = vpop.f32.mrb[33].mxu1 }
 0x1c5   : > { %1226 = vmatmul.mubr.f32.gmra.mrb[42].mxu0 %v6698_v58  ;;  %5325 = vmatprep.mubr.f32.mxu1 %v6881_v57 }
 0x1c6   : > { %1231 = vmatprep.mubr.f32.mxu0 %v9323_v61 }
 0x1c7   : > { %v7013_v50 = vpop.f32.mrb[34].mxu1 }
 0x1c8   : > { %5326 = vmatmul.mubr.f32.gmra.mrb[140].mxu1 %v6842_v21  ;;  %v1532_v55 = vpop.f32.mrb[35].mxu1 }
 0x1c9   : > { %1232 = vmatmul.mubr.f32.gmra.mrb[44].mxu0 %v6705_v60  ;;  %5328 = vmatprep.mubr.f32.mxu1 %v6849_v26 }
 0x1ca   : > { %1237 = vmatprep.mubr.f32.mxu0 %v9323_v61 }
 0x1cb   : > { %v7019_v28 = vpop.f32.mrb[36].mxu1 }
 0x1cc   : > { %5329 = vmatmul.mubr.f32.gmra.mrb[142].mxu1 %v6858_v33  ;;  %v1537_v58 = vpop.f32.mrb[37].mxu1 }
 0x1cd   : > { %1238 = vmatmul.mubr.f32.gmra.mrb[46].mxu0 %v6714_v1 }
 0x1ce   : > { %1242 = vmatprep.mubr.f32.mxu0 %v9323_v61 }
 0x1cf   : > { %v7024_v22 = vpop.f32.mrb[38].mxu1 }
 0x1d0   : > { %v1542_v29 = vpop.f32.mrb[39].mxu1 }
 0x1d1   : > { %1243 = vmatmul.mubr.f32.gmra.mrb[48].mxu0 %v6722_v7 }
 0x1d2   : > { %1248 = vmatprep.mubr.f32.mxu0 %v9323_v61 }
 0x1d3   : > { %v7028_v60 = vpop.f32.mrb[40].mxu1 }
 0x1d4   : > { %v1547_v40 = vpop.f32.mrb[41].mxu1 }
 0x1d5   : > { %1249 = vmatmul.mubr.f32.gmra.mrb[50].mxu0 %v6729_v9 }
 0x1d6   : > { %1254 = vmatprep.mubr.f32.mxu0 %v9323_v61 }
 0x1d7   : > { %v7032_v46 = vpop.f32.mrb[42].mxu1 }
 0x1d8   : > { %v1552_v1 = vpop.f32.mrb[43].mxu1 }
 0x1d9   : > { %1255 = vmatmul.mubr.f32.gmra.mrb[52].mxu0 %v6738_v13 }
 0x1da   : > { %1259 = vmatprep.mubr.f32.mxu0 %v9323_v61 }
 0x1db   : > { %v7036_v48 = vpop.f32.mrb[44].mxu1 }
 0x1dc   : > { %v1557_v7 = vpop.f32.mrb[45].mxu1 }
 0x1dd   : > { %1260 = vmatmul.mubr.f32.gmra.mrb[54].mxu0 %v6746_v17 }
 0x1de   : > { %1265 = vmatprep.mubr.f32.mxu0 %v9323_v61 }
 0x1df   : > { %v7040_v53 = vpop.f32.mrb[46].mxu1 }
 0x1e0   : > { %v1562_v9 = vpop.f32.mrb[47].mxu1 }
 0x1e1   : > { %1266 = vmatmul.mubr.f32.gmra.mrb[56].mxu0 %v6753_v20 }
 0x1e2   : > { %1271 = vmatprep.mubr.f32.mxu0 %v9323_v61 }
 0x1e3   : > { %v7044_v62 = vpop.f32.mrb[48].mxu1 }
 0x1e4   : > { %v1567_v13 = vpop.f32.mrb[49].mxu1 }
 0x1e5   : > { %1272 = vmatmul.mubr.f32.gmra.mrb[58].mxu0 %v6762_v25 }
 0x1e6   : > { %1276 = vmatprep.mubr.f32.mxu0 %v9323_v61 }
 0x1e7   : > { %v7048_v5 = vpop.f32.mrb[50].mxu1 }
 0x1e8   : > { %v1572_v17 = vpop.f32.mrb[51].mxu1 }
 0x1e9   : > { %1277 = vmatmul.mubr.f32.gmra.mrb[60].mxu0 %v6770_v32 }
 0x1ea   : > { %1282 = vmatprep.mubr.f32.mxu0 %v9323_v61 }
 0x1eb   : > { %v7052_v11 = vpop.f32.mrb[52].mxu1 }
 0x1ec   : > { %v1577_v20 = vpop.f32.mrb[53].mxu1 }
 0x1ed   : > { %1283 = vmatmul.mubr.f32.gmra.mrb[62].mxu0 %v6777_v35 }
 0x1ee   : > { %1288 = vmatprep.mubr.f32.mxu0 %v9323_v61 }
 0x1ef   : > { %v7056_v18 = vpop.f32.mrb[54].mxu1 }
 0x1f0   : > { %v1582_v25 = vpop.f32.mrb[55].mxu1 }
 0x1f1   : > { %1289 = vmatmul.mubr.f32.gmra.mrb[64].mxu0 %v6786_v43 }
 0x1f2   : > { %1293 = vmatprep.mubr.f32.mxu0 %v9323_v61 }
 0x1f3   : > { %v7060_v24 = vpop.f32.mrb[56].mxu1 }
 0x1f4   : > { %v1587_v32 = vpop.f32.mrb[57].mxu1 }
 0x1f5   : > { %1294 = vmatmul.mubr.f32.gmra.mrb[66].mxu0 %v6794_v52 }
 0x1f6   : > { %1299 = vmatprep.mubr.f32.mxu0 %v9323_v61 }
 0x1f7   : > { %v7064_v27 = vpop.f32.mrb[58].mxu1 }
 0x1f8   : > { %v1592_v35 = vpop.f32.mrb[59].mxu1 }
 0x1f9   : > { %1300 = vmatmul.mubr.f32.gmra.mrb[68].mxu0 %v6801_v56 }
 0x1fa   : > { %1305 = vmatprep.mubr.f32.mxu0 %v9323_v61 }
 0x1fb   : > { %v7068_v34 = vpop.f32.mrb[60].mxu1 }
 0x1fc   : > { %v1597_v43 = vpop.f32.mrb[61].mxu1 }
 0x1fd   : > { %1306 = vmatmul.mubr.f32.gmra.mrb[70].mxu0 %v6810_v59 }
 0x1fe   : > { %1310 = vmatprep.mubr.f32.mxu0 %v9323_v61 }
 0x1ff   : > { %v7072_v37 = vpop.f32.mrb[62].mxu1 }
 0x200   : > { %v1602_v52 = vpop.f32.mrb[63].mxu1 }
 0x201   : > { %1311 = vmatmul.mubr.f32.gmra.mrb[72].mxu0 %v6818_v4 }
 0x202   : > { %1316 = vmatprep.mubr.f32.mxu0 %v9323_v61 }
 0x203   : > { %v7076_v42 = vpop.f32.mrb[64].mxu1 }
 0x204   : > { %v1607_v56 = vpop.f32.mrb[65].mxu1 }
 0x205   : > { %1317 = vmatmul.mubr.f32.gmra.mrb[74].mxu0 %v6825_v8 }
 0x206   : > { %1322 = vmatprep.mubr.f32.mxu0 %v9323_v61 }
 0x207   : > { %v7080_v49 = vpop.f32.mrb[66].mxu1 }
 0x208   : > { %v1612_v59 = vpop.f32.mrb[67].mxu1 }
 0x209   : > { %1323 = vmatmul.mubr.f32.gmra.mrb[76].mxu0 %v6834_v14 }
 0x20a   : > { %1327 = vmatprep.mubr.f32.mxu0 %v9323_v61 }
 0x20b   : > { %v7084_v51 = vpop.f32.mrb[68].mxu1 }
 0x20c   : > { %v1617_v4 = vpop.f32.mrb[69].mxu1 }
 0x20d   : > { %1328 = vmatmul.mubr.f32.gmra.mrb[78].mxu0 %v6842_v21 }
 0x20e   : > { %1333 = vmatprep.mubr.f32.mxu0 %v9323_v61 }
 0x20f   : > { %v7088_v55 = vpop.f32.mrb[70].mxu1 }
 0x210   : > { %v1622_v8 = vpop.f32.mrb[71].mxu1 }
 0x211   : > { %1334 = vmatmul.mubr.f32.gmra.mrb[80].mxu0 %v6849_v26 }
 0x212   : > { %1339 = vmatprep.mubr.f32.mxu0 %v9323_v61 }
 0x213   : > { %v7092_v58 = vpop.f32.mrb[72].mxu1 }
 0x214   : > { %v1627_v14 = vpop.f32.mrb[73].mxu1 }
 0x215   : > { %1340 = vmatmul.mubr.f32.gmra.mrb[82].mxu0 %v6858_v33 }
 0x216   : > { %1344 = vmatprep.mubr.f32.mxu0 %v9323_v61 }
 0x217   : > { %v7096_v29 = vpop.f32.mrb[74].mxu1 }
 0x218   : > { %v1632_v40 = vpop.f32.mrb[75].mxu1 }
 0x219   : > { %1345 = vmatmul.mubr.f32.gmra.mrb[84].mxu0 %v6866_v47 }
 0x21a   : > { %1350 = vmatprep.mubr.f32.mxu0 %v9323_v61 }
 0x21b   : > { %v7100_v1 = vpop.f32.mrb[76].mxu1 }
 0x21c   : > { %v1637_v7 = vpop.f32.mrb[77].mxu1 }
 0x21d   : > { %1351 = vmatmul.mubr.f32.gmra.mrb[86].mxu0 %v6873_v54 }
 0x21e   : > { %1356 = vmatprep.mubr.f32.mxu0 %v9323_v61 }
 0x21f   : > { %v7104_v9 = vpop.f32.mrb[78].mxu1 }
 0x220   : > { %v1642_v13 = vpop.f32.mrb[79].mxu1 }
 0x221   : > { %1357 = vmatmul.mubr.f32.gmra.mrb[88].mxu0 %v6881_v57 }
 0x222   : > { %1361 = vmatprep.mubr.f32.mxu0 %v9323_v61 }
 0x223   : > { %v7108_v17 = vpop.f32.mrb[80].mxu1 }
 0x224   : > { %v1647_v47 = vpop.f32.mrb[81].mxu1 }
 0x225   : > { %1362 = vmatmul.mubr.f32.gmra.mrb[90].mxu0 %v6842_v21 }
 0x226   : > { %1367 = vmatprep.mubr.f32.mxu0 %v9323_v61 }
 0x227   : > { %v7112_v20 = vpop.f32.mrb[82].mxu1 }
 0x228   : > { %v1652_v54 = vpop.f32.mrb[83].mxu1 }
 0x229   : > { %1368 = vmatmul.mubr.f32.gmra.mrb[92].mxu0 %v6849_v26 }
 0x22a   : > { %1373 = vmatprep.mubr.f32.mxu0 %v9323_v61 }
 0x22b   : > { %v7116_v25 = vpop.f32.mrb[84].mxu1 }
 0x22c   : > { %v1657_v57 = vpop.f32.mrb[85].mxu1 }
 0x22d   : > { %1374 = vmatmul.mubr.f32.gmra.mrb[94].mxu0 %v6858_v33 }
 0x22f   : > { %v7119_v32 = vpop.f32.mrb[86].mxu1 }
 0x230   : > { %v1662_v35 = vpop.f32.mrb[87].mxu1 }
 0x233   : > { %v7121_v43 = vpop.f32.mrb[88].mxu1 }
 0x234   : > { %9384 = vst [vmem:[#allocation13_spill] sm:$0xff] %v7121_v43  ;;  %v1667_v21 = vpop.f32.mrb[89].mxu1 }
 0x237   : > { %v7123_v52 = vpop.f32.mrb[90].mxu1 }
 0x238   : > { %9385 = vst [vmem:[#allocation14_spill] sm:$0xff] %v7123_v52  ;;  %v1672_v56 = vpop.f32.mrb[91].mxu1 }
 0x23b   : > { %v7125_v59 = vpop.f32.mrb[92].mxu1 }
 0x23c   : > { %9386 = vst [vmem:[#allocation15_spill] sm:$0xff] %v7125_v59  ;;  %v1677_v26 = vpop.f32.mrb[93].mxu1 }
 0x23f   : > { %v7127_v4 = vpop.f32.mrb[94].mxu1 }
 0x240   : > { %9387 = vst [vmem:[#allocation16_spill] sm:$0xff] %v7127_v4  ;;  %v1682_v8 = vpop.f32.mrb[95].mxu1 }
 0x243   : > { %v5261_v14 = vpop.f32.mrb[96].mxu1 }
 0x244   : > { %v1108_v40 = vpop.f32.mrb[0].mxu0  ;;  %v1756_v33 = vadd.f32 %v5261_v14, %v6917_v2  ;;  %v1750_v7 = vpop.f32.mrb[97].mxu1 }
 0x245   : > { %v1110_v13 = vpop.f32.mrb[1].mxu0  ;;  %v1751_v47 = vadd.f32 %v1750_v7, %v6911_v45 }
 0x246   : > { %v2232_v54 = vrot.slane %v1756_v33, 2  ;;  %v2038_v0 = vrot.slane %v1110_v13, 1 }
 0x247   : > { %v2231_v57 = vrot.slane %v1751_v47, 2  ;;  %v5264_v35 = vpop.f32.mrb[98].mxu1 }
 0x248   : > { %v1114_v21 = vpop.f32.mrb[2].mxu0  ;;  %v1766_v56 = vadd.f32 %v5264_v35, %v6929_v63  ;;  %v1760_v61 = vpop.f32.mrb[99].mxu1 }
 0x249   : > { %v1116_v26 = vpop.f32.mrb[3].mxu0  ;;  %v2233_v8 = vsel %vm2230_vm1, %v2231_v57, %v2232_v54  ;;  %v1761_v41 = vadd.f32 %v1760_v61, %v6923_v36 }
 0x24a   : > { %v2039_v2 = vrot.slane %v1116_v26, 1  ;;  %v2236_v61 = vrot.slane %v1766_v56, 2 }
 0x24b   : > { %v2234_v14 = vrot.slane %v1761_v41, 2  ;;  %v5267_v45 = vpop.f32.mrb[100].mxu1 }
 0x24c   : > { %v2040_v59 = vsel %vm2037_vm2, %v2038_v0, %v2039_v2  ;;  %v1120_v33 = vpop.f32.mrb[4].mxu0  ;;  %v1776_v47 = vadd.f32 %v5267_v45, %v6941_v6  ;;  %v1770_v4 = vpop.f32.mrb[101].mxu1 }
 0x24d   : > { %v2150_v7 = vadd.f32 %v2040_v59, %v1108_v40  ;;  %v1121_v43 = vpop.f32.mrb[5].mxu0  ;;  %v2235_v63 = vsel %vm2230_vm1, %v2232_v54, %v2234_v14  ;;  %v1771_v35 = vadd.f32 %v1770_v4, %v6935_v3 }
 0x24e   : > { %v2041_v52 = vrot.slane %v1121_v43, 1  ;;  %v2239_v13 = vrot.slane %v1776_v47, 2 }
 0x24f   : > { %v7138_v57 = vadd.f32 %v2233_v8, %v2150_v7  ;;  %v2237_v36 = vrot.slane %v1771_v35, 2  ;;  %v5270_v0 = vpop.f32.mrb[102].mxu1 }
 0x250   : > { %v2042_v41 = vsel %vm2037_vm2, %v2039_v2, %v2041_v52  ;;  %v1125_v26 = vpop.f32.mrb[6].mxu0  ;;  %v1786_v59 = vadd.f32 %v5270_v0, %v6953_v12  ;;  %v1780_v6 = vpop.f32.mrb[103].mxu1 }
 0x251   : > { %v2151_v33 = vadd.f32 %v2042_v41, %v1114_v21  ;;  %v1127_v40 = vpop.f32.mrb[7].mxu0  ;;  %v2238_v45 = vsel %vm2230_vm1, %v2236_v61, %v2237_v36  ;;  %v2240_v54 = vsel %vm2230_vm1, %v2237_v36, %v2239_v13  ;;  %v1781_v3 = vadd.f32 %v1780_v6, %v6947_v10 }
 0x252   : > { %v2242_v4 = vrot.slane %v1786_v59, 2  ;;  %v2043_v7 = vrot.slane %v1127_v40, 1 }
 0x253   : > { %v7145_v43 = vadd.f32 %v2235_v63, %v2151_v33  ;;  %v2241_v56 = vrot.slane %v1781_v3, 2  ;;  %v5273_v8 = vpop.f32.mrb[104].mxu1 }
 0x254   : > { %v1131_v14 = vpop.f32.mrb[8].mxu0  ;;  %v1796_v52 = vadd.f32 %v5273_v8, %v6965_v16  ;;  %v1790_v2 = vpop.f32.mrb[105].mxu1 }
 0x255   : > { %v1133_v21 = vpop.f32.mrb[9].mxu0  ;;  %v7149_v12 = vsel %vm2230_vm1, %v2241_v56, %v2242_v4  ;;  %v1791_v47 = vadd.f32 %v1790_v2, %v6959_v15 }
 0x256   : > { %v2044_v35 = vrot.slane %v1133_v21, 1  ;;  %v2246_v3 = vrot.slane %v1796_v52, 2 }
 0x257   : > { %v2244_v13 = vrot.slane %v1791_v47, 2  ;;  %v5276_v63 = vpop.f32.mrb[106].mxu1 }
 0x258   : > { %v2045_v10 = vsel %vm2037_vm2, %v2043_v7, %v2044_v35  ;;  %v1137_v61 = vpop.f32.mrb[10].mxu0  ;;  %v1806_v41 = vadd.f32 %v5276_v63, %v6977_v23  ;;  %v1800_v0 = vpop.f32.mrb[107].mxu1  ;;  %v2883_v63 = vld [vmem:[#allocation7 + $0x20] sm:$0xff] }
 0x259   : > { %v2152_v36 = vadd.f32 %v2045_v10, %v1125_v26  ;;  %v1138_v33 = vpop.f32.mrb[11].mxu0  ;;  %v7155_v16 = vsel %vm2230_vm1, %v2242_v4, %v2244_v13  ;;  %v1801_v59 = vadd.f32 %v1800_v0, %v6971_v19  ;;  %v2881_v10 = vld [vmem:[#allocation7 + $0x10] sm:$0xff]  ;;  %v2884_v4 = vld [vmem:[#allocation7 + $0x28] sm:$0xff]  ;;  %v2882_v61 = vld [vmem:[#allocation7 + $0x18] sm:$0xff] }
 0x25a   : > { %v2046_v6 = vrot.slane %v1138_v33, 1  ;;  %v2249_v15 = vrot.slane %v1806_v41, 2  ;;  %v2880_v13 = vld [vmem:[#allocation7 + $0x8] sm:$0xff]  ;;  %v5708_v33 = vpack.c.bf16 %v2884_v4, %v2881_v10 }
 0x25b   : > { %v7158_v40 = vadd.f32 %v2238_v45, %v2152_v36  ;;  %v2247_v56 = vrot.slane %v1801_v59, 2  ;;  %v5279_v2 = vpop.f32.mrb[108].mxu1  ;;  %v5611_v59 = vpack.c.bf16 %v2883_v63, %v2880_v13 }
 0x25c   : > { %v2047_v8 = vsel %vm2037_vm2, %v2044_v35, %v2046_v6  ;;  %v1142_v21 = vpop.f32.mrb[12].mxu0  ;;  %v1816_v23 = vadd.f32 %v5279_v2, %v6989_v30  ;;  %v1810_v7 = vpop.f32.mrb[109].mxu1  ;;  %v2879_v35 = vld [vmem:[#allocation7] sm:$0xff]  ;;  %5709 = vmatpush1.bf16.msra.mxu0 %v5708_v33 }
 0x25d   : > { %v2153_v26 = vadd.f32 %v2047_v8, %v1131_v14  ;;  %v1144_v47 = vpop.f32.mrb[13].mxu0  ;;  %v7163_v19 = vsel %vm2230_vm1, %v2246_v3, %v2247_v56  ;;  %v7166_v45 = vsel %vm2230_vm1, %v2247_v56, %v2249_v15  ;;  %v1811_v52 = vadd.f32 %v1810_v7, %v6983_v31  ;;  %5612 = vmatprep.subr.bf16.mxu1 %v5611_v59 }
 0x25e   : > { %v2252_v14 = vrot.slane %v1816_v23, 2  ;;  %v5613_v6 = vpack.c.bf16 %v2882_v61, %v2879_v35  ;;  %v2048_v31 = vrot.slane %v1144_v47, 1  ;;  %v2886_v35 = vld [vmem:[#allocation7 + $0x38] sm:$0xff]  ;;  %v2889_v47 = vld [vmem:[#allocation7 + $0x50] sm:$0xff] }
 0x25f   : > { %v7169_v36 = vadd.f32 %v2240_v54, %v2153_v26  ;;  %v2251_v30 = vrot.slane %v1811_v52, 2  ;;  %v5282_v41 = vpop.f32.mrb[110].mxu1  ;;  %v9388_v54 = vmov 0.0|0.0  }
 0x260   : > { %v1148_v0 = vpop.f32.mrb[14].mxu0  ;;  %v1826_v3 = vadd.f32 %v5282_v41, %v7001_v39  ;;  %v1820_v8 = vpop.f32.mrb[111].mxu1  ;;  %5614 = vmatpush1.bf16.msra.mxu1 %v5613_v6  ;;  %5710 = vmatprep.subr.bf16.mxu0 %v9388_v54  ;;  %v5615_v41 = vpack.c.bf16 %v2889_v47, %v2886_v35 }
 0x261   : > { %v1150_v2 = vpop.f32.mrb[15].mxu0  ;;  %v7173_v15 = vsel %vm2230_vm1, %v2251_v30, %v2252_v14  ;;  %v1821_v56 = vadd.f32 %v1820_v8, %v6995_v38 }
 0x262   : > { %v2049_v7 = vrot.slane %v1150_v2, 1  ;;  %v2256_v6 = vrot.slane %v1826_v3, 2  ;;  %5616 = vmatprep.subr.bf16.mxu1 %v5615_v41 }
 0x263   : > { %v2254_v26 = vrot.slane %v1821_v56, 2  ;;  %v5285_v10 = vpop.f32.mrb[112].mxu1 }
 0x264   : > { %v2050_v23 = vsel %vm2037_vm2, %v2048_v31, %v2049_v7  ;;  %v1154_v4 = vpop.f32.mrb[16].mxu0  ;;  %v1836_v13 = vadd.f32 %v5285_v10, %v7013_v50  ;;  %v1830_v52 = vpop.f32.mrb[113].mxu1  ;;  %v2887_v10 = vld [vmem:[#allocation7 + $0x40] sm:$0xff] }
 0x265   : > { %v2154_v39 = vadd.f32 %v2050_v23, %v1142_v21  ;;  %v1155_v63 = vpop.f32.mrb[17].mxu0  ;;  %v7180_v38 = vsel %vm2230_vm1, %v2252_v14, %v2254_v26  ;;  %v1831_v61 = vadd.f32 %v1830_v52, %v7007_v44  ;;  %v2885_v23 = vld [vmem:[#allocation7 + $0x30] sm:$0xff]  ;;  %v2888_v44 = vld [vmem:[#allocation7 + $0x48] sm:$0xff]  ;;  %v2891_v52 = vld [vmem:[#allocation7 + $0x60] sm:$0xff] }
 0x266   : > { %v2051_v30 = vrot.slane %v1155_v63, 1  ;;  %v2259_v59 = vrot.slane %v1836_v13, 2  ;;  %v2895_v13 = vld [vmem:[#allocation7 + $0x80] sm:$0xff]  ;;  %v2894_v63 = vld [vmem:[#allocation7 + $0x78] sm:$0xff] }
 0x267   : > { %v7184_v33 = vadd.f32 %v7149_v12, %v2154_v39  ;;  %v2257_v8 = vrot.slane %v1831_v61, 2  ;;  %v5288_v50 = vpop.f32.mrb[114].mxu1  ;;  %v2892_v39 = vld [vmem:[#allocation7 + $0x68] sm:$0xff] }
 0x268   : > { %v2052_v21 = vsel %vm2037_vm2, %v2049_v7, %v2051_v30  ;;  %v1159_v2 = vpop.f32.mrb[18].mxu0  ;;  %v1846_v56 = vadd.f32 %v5288_v50, %v7024_v22  ;;  %v1840_v14 = vpop.f32.mrb[115].mxu1  ;;  %v2890_v7 = vld [vmem:[#allocation7 + $0x58] sm:$0xff]  ;;  %v5617_v30 = vpack.c.bf16 %v2888_v44, %v2885_v23 }
 0x269   : > { %v2155_v31 = vadd.f32 %v2052_v21, %v1148_v0  ;;  %v1161_v26 = vpop.f32.mrb[19].mxu0  ;;  %v7189_v4 = vsel %vm2230_vm1, %v2256_v6, %v2257_v8  ;;  %v7192_v12 = vsel %vm2230_vm1, %v2257_v8, %v2259_v59  ;;  %v1841_v3 = vadd.f32 %v1840_v14, %v7019_v28 }
 0x26a   : > { %v2262_v22 = vrot.slane %v1846_v56, 2  ;;  %v5711_v41 = vpack.c.bf16 %v2890_v7, %v2887_v10  ;;  %v5619_v6 = vpack.c.bf16 %v2895_v13, %v2892_v39  ;;  %v2053_v21 = vrot.slane %v1161_v26, 1  ;;  %5618 = vmatpush1.bf16.msra.mxu1 %v5617_v30  ;;  %v2898_v39 = vld [vmem:[#allocation7 + $0x98] sm:$0xff]  ;;  %v2901_v13 = vld [vmem:[#allocation7 + $0xb0] sm:$0xff] }
 0x26b   : > { %v7196_v0 = vadd.f32 %v7155_v16, %v2155_v31  ;;  %v2261_v35 = vrot.slane %v1841_v3, 2  ;;  %v5291_v47 = vpop.f32.mrb[116].mxu1  ;;  %v5621_v56 = vpack.c.bf16 %v2894_v63, %v2891_v52 }
 0x26c   : > { %v1165_v61 = vpop.f32.mrb[20].mxu0  ;;  %v1856_v59 = vadd.f32 %v5291_v47, %v7032_v46  ;;  %v1850_v8 = vpop.f32.mrb[117].mxu1  ;;  %5712 = vmatpush1.bf16.msra.mxu0 %v5711_v41  ;;  %5620 = vmatprep.subr.bf16.mxu1 %v5619_v6 }
 0x26d   : > { %v1167_v28 = vpop.f32.mrb[21].mxu0  ;;  %v7200_v50 = vsel %vm2230_vm1, %v2261_v35, %v2262_v22  ;;  %v1851_v16 = vadd.f32 %v1850_v8, %v7028_v60  ;;  %5713 = vmatprep.subr.bf16.mxu0 %v9388_v54  ;;  %v5623_v35 = vpack.c.bf16 %v2901_v13, %v2898_v39 }
 0x26e   : > { %v2054_v31 = vrot.slane %v1167_v28, 1  ;;  %5622 = vmatpush1.bf16.msra.mxu1 %v5621_v56  ;;  %v2266_v41 = vrot.slane %v1856_v59, 2  ;;  %v2893_v56 = vld [vmem:[#allocation7 + $0x70] sm:$0xff] }
 0x26f   : > { %v2264_v14 = vrot.slane %v1851_v16, 2  ;;  %v5294_v26 = vpop.f32.mrb[118].mxu1  ;;  %5624 = vmatprep.subr.bf16.mxu1 %v5623_v35 }
 0x270   : > { %v2055_v23 = vsel %vm2037_vm2, %v2053_v21, %v2054_v31  ;;  %v1171_v44 = vpop.f32.mrb[22].mxu0  ;;  %v1866_v10 = vadd.f32 %v5294_v26, %v7040_v53  ;;  %v1860_v3 = vpop.f32.mrb[119].mxu1  ;;  %v2904_v26 = vld [vmem:[#allocation7 + $0xc8] sm:$0xff] }
 0x271   : > { %v2156_v46 = vadd.f32 %v2055_v23, %v1159_v2  ;;  %v1172_v7 = vpop.f32.mrb[23].mxu0  ;;  %v7207_v60 = vsel %vm2230_vm1, %v2262_v22, %v2264_v14  ;;  %v1861_v52 = vadd.f32 %v1860_v3, %v7036_v48  ;;  %v2897_v48 = vld [vmem:[#allocation7 + $0x90] sm:$0xff]  ;;  %v2900_v14 = vld [vmem:[#allocation7 + $0xa8] sm:$0xff]  ;;  %v2907_v44 = vld [vmem:[#allocation7 + $0xe0] sm:$0xff] }
 0x272   : > { %v2056_v63 = vrot.slane %v1172_v7, 1  ;;  %v2269_v30 = vrot.slane %v1866_v10, 2  ;;  %v2906_v10 = vld [vmem:[#allocation7 + $0xd8] sm:$0xff]  ;;  %v5625_v13 = vpack.c.bf16 %v2900_v14, %v2897_v48 }
 0x273   : > { %v7211_v47 = vadd.f32 %v7163_v19, %v2156_v46  ;;  %v2267_v2 = vrot.slane %v1861_v52, 2  ;;  %v5297_v6 = vpop.f32.mrb[120].mxu1  ;;  %v2903_v46 = vld [vmem:[#allocation7 + $0xc0] sm:$0xff] }
 0x274   : > { %v2057_v53 = vsel %vm2037_vm2, %v2054_v31, %v2056_v63  ;;  %v1176_v21 = vpop.f32.mrb[24].mxu0  ;;  %v1876_v22 = vadd.f32 %v5297_v6, %v7048_v5  ;;  %v1870_v28 = vpop.f32.mrb[121].mxu1  ;;  %v2896_v31 = vld [vmem:[#allocation7 + $0x88] sm:$0xff]  ;;  %v5627_v63 = vpack.c.bf16 %v2907_v44, %v2904_v26  ;;  %5626 = vmatpush1.bf16.msra.mxu1 %v5625_v13  ;;  %v5629_v6 = vpack.c.bf16 %v2906_v10, %v2903_v46 }
 0x275   : > { %v2157_v8 = vadd.f32 %v2057_v53, %v1165_v61  ;;  %v1178_v16 = vpop.f32.mrb[25].mxu0  ;;  %v7216_v23 = vsel %vm2230_vm1, %v2266_v41, %v2267_v2  ;;  %v7219_v19 = vsel %vm2230_vm1, %v2267_v2, %v2269_v30  ;;  %v1871_v59 = vadd.f32 %v1870_v28, %v7044_v62 }
 0x276   : > { %v2272_v5 = vrot.slane %v1876_v22, 2  ;;  %v5714_v52 = vpack.c.bf16 %v2896_v31, %v2893_v56  ;;  %v2058_v35 = vrot.slane %v1178_v16, 1  ;;  %5628 = vmatprep.subr.bf16.mxu1 %v5627_v63  ;;  %v2913_v31 = vld [vmem:[#allocation7 + $0x110] sm:$0xff] }
 0x277   : > { %v7223_v61 = vadd.f32 %v7166_v45, %v2157_v8  ;;  %v2271_v3 = vrot.slane %v1871_v59, 2  ;;  %v5300_v7 = vpop.f32.mrb[122].mxu1  ;;  %v2910_v59 = vld [vmem:[#allocation7 + $0xf8] sm:$0xff] }
 0x278   : > { %v1182_v39 = vpop.f32.mrb[26].mxu0  ;;  %v1886_v30 = vadd.f32 %v5300_v7, %v7056_v18  ;;  %v1880_v41 = vpop.f32.mrb[123].mxu1  ;;  %5715 = vmatpush1.bf16.msra.mxu0 %v5714_v52  ;;  %5630 = vmatpush1.bf16.msra.mxu1 %v5629_v6  ;;  %v5631_v46 = vpack.c.bf16 %v2913_v31, %v2910_v59 }
 0x279   : > { %v1184_v62 = vpop.f32.mrb[27].mxu0  ;;  %v7227_v2 = vsel %vm2230_vm1, %v2271_v3, %v2272_v5  ;;  %v1881_v45 = vadd.f32 %v1880_v41, %v7052_v11  ;;  %5716 = vmatprep.subr.bf16.mxu0 %v9388_v54 }
 0x27a   : > { %v2059_v53 = vrot.slane %v1184_v62, 1  ;;  %v2276_v7 = vrot.slane %v1886_v30, 2  ;;  %5632 = vmatprep.subr.bf16.mxu1 %v5631_v46  ;;  %v2912_v62 = vld [vmem:[#allocation7 + $0x108] sm:$0xff] }
 0x27b   : > { %v2274_v8 = vrot.slane %v1881_v45, 2  ;;  %v5303_v28 = vpop.f32.mrb[124].mxu1  ;;  %v2899_v45 = vld [vmem:[#allocation7 + $0xa0] sm:$0xff] }
 0x27c   : > { %v2060_v22 = vsel %vm2037_vm2, %v2058_v35, %v2059_v53  ;;  %v1188_v16 = vpop.f32.mrb[28].mxu0  ;;  %v1896_v48 = vadd.f32 %v5303_v28, %v7064_v27  ;;  %v1890_v14 = vpop.f32.mrb[125].mxu1  ;;  %v2915_v28 = vld [vmem:[#allocation7 + $0x120] sm:$0xff] }
 0x27d   : > { %v2158_v18 = vadd.f32 %v2060_v22, %v1176_v21  ;;  %v1189_v56 = vpop.f32.mrb[29].mxu0  ;;  %v7234_v11 = vsel %vm2230_vm1, %v2272_v5, %v2274_v8  ;;  %v1891_v26 = vadd.f32 %v1890_v14, %v7060_v24  ;;  %v2909_v24 = vld [vmem:[#allocation7 + $0xf0] sm:$0xff]  ;;  %v2916_v8 = vld [vmem:[#allocation7 + $0x128] sm:$0xff]  ;;  %v2919_v22 = vld [vmem:[#allocation7 + $0x140] sm:$0xff] }
 0x27e   : > { %v2061_v44 = vrot.slane %v1189_v56, 1  ;;  %v2279_v3 = vrot.slane %v1896_v48, 2  ;;  %v2918_v16 = vld [vmem:[#allocation7 + $0x138] sm:$0xff]  ;;  %v5633_v56 = vpack.c.bf16 %v2912_v62, %v2909_v24  ;;  %v5635_v31 = vpack.c.bf16 %v2919_v22, %v2916_v8 }
 0x27f   : > { %v7238_v10 = vadd.f32 %v7173_v15, %v2158_v18  ;;  %v2277_v21 = vrot.slane %v1891_v26, 2  ;;  %v5306_v13 = vpop.f32.mrb[126].mxu1  ;;  %v2922_v62 = vld [vmem:[#allocation7 + $0x158] sm:$0xff] }
 0x280   : > { %v2062_v27 = vsel %vm2037_vm2, %v2059_v53, %v2061_v44  ;;  %v1193_v52 = vpop.f32.mrb[30].mxu0  ;;  %v1906_v5 = vadd.f32 %v5306_v13, %v7072_v37  ;;  %v1900_v35 = vpop.f32.mrb[127].mxu1  ;;  %v2902_v53 = vld [vmem:[#allocation7 + $0xb8] sm:$0xff]  ;;  %5634 = vmatpush1.bf16.msra.mxu1 %v5633_v56  ;;  %v2905_v56 = vld [vmem:[#allocation7 + $0xd0] sm:$0xff] }
 0x281   : > { %v2159_v63 = vadd.f32 %v2062_v27, %v1182_v39  ;;  %v1195_v41 = vpop.f32.mrb[31].mxu0  ;;  %v7243_v6 = vsel %vm2230_vm1, %v2276_v7, %v2277_v21  ;;  %v7246_v15 = vsel %vm2230_vm1, %v2277_v21, %v2279_v3  ;;  %v1901_v30 = vadd.f32 %v1900_v35, %v7068_v34  ;;  %5636 = vmatprep.subr.bf16.mxu1 %v5635_v31 }
 0x282   : > { %v2282_v37 = vrot.slane %v1906_v5, 2  ;;  %v5717_v59 = vpack.c.bf16 %v2902_v53, %v2899_v45  ;;  %v2063_v26 = vrot.slane %v1195_v41, 1  ;;  %v5637_v21 = vpack.c.bf16 %v2918_v16, %v2915_v28  ;;  %v2925_v45 = vld [vmem:[#allocation7 + $0x170] sm:$0xff] }
 0x283   : > { %v7250_v39 = vadd.f32 %v7180_v38, %v2159_v63  ;;  %v2281_v18 = vrot.slane %v1901_v30, 2  ;;  %v5309_v48 = vpop.f32.mrb[128].mxu1  ;;  %v5639_v8 = vpack.c.bf16 %v2925_v45, %v2922_v62 }
 0x284   : > { %v1199_v14 = vpop.f32.mrb[32].mxu0  ;;  %v1916_v44 = vadd.f32 %v5309_v48, %v7080_v49  ;;  %v1910_v46 = vpop.f32.mrb[129].mxu1  ;;  %5718 = vmatpush1.bf16.msra.mxu0 %v5717_v59  ;;  %5638 = vmatpush1.bf16.msra.mxu1 %v5637_v21  ;;  %v2908_v59 = vld [vmem:[#allocation7 + $0xe8] sm:$0xff] }
 0x285   : > { %v1201_v34 = vpop.f32.mrb[33].mxu0  ;;  %v7254_v3 = vsel %vm2230_vm1, %v2281_v18, %v2282_v37  ;;  %v1911_v38 = vadd.f32 %v1910_v46, %v7076_v42  ;;  %5719 = vmatprep.subr.bf16.mxu0 %v9388_v54  ;;  %5640 = vmatprep.subr.bf16.mxu1 %v5639_v8  ;;  %v5720_v46 = vpack.c.bf16 %v2908_v59, %v2905_v56  ;;  %v2917_v8 = vld [vmem:[#allocation7 + $0x130] sm:$0xff] }
 0x286   : > { %v2064_v7 = vrot.slane %v1201_v34, 1  ;;  %v2286_v16 = vrot.slane %v1916_v44, 2 }
 0x287   : > { %v2284_v27 = vrot.slane %v1911_v38, 2  ;;  %v5312_v63 = vpop.f32.mrb[130].mxu1 }
 0x288   : > { %v2065_v13 = vsel %vm2037_vm2, %v2063_v26, %v2064_v7  ;;  %v1205_v5 = vpop.f32.mrb[34].mxu0  ;;  %v1926_v35 = vadd.f32 %v5312_v63, %v7088_v55  ;;  %v1920_v41 = vpop.f32.mrb[131].mxu1  ;;  %5721 = vmatpush1.bf16.msra.mxu0 %v5720_v46 }
 0x289   : > { %v2160_v49 = vadd.f32 %v2065_v13, %v1193_v52  ;;  %v1206_v24 = vpop.f32.mrb[35].mxu0  ;;  %v7261_v42 = vsel %vm2230_vm1, %v2282_v37, %v2284_v27  ;;  %v1921_v30 = vadd.f32 %v1920_v41, %v7084_v51  ;;  %5722 = vmatprep.subr.bf16.mxu0 %v9388_v54  ;;  %v2914_v13 = vld [vmem:[#allocation7 + $0x118] sm:$0xff] }
 0x28a   : > { %v2066_v53 = vrot.slane %v1206_v24, 1  ;;  %v2289_v28 = vrot.slane %v1926_v35, 2 }
 0x28b   : > { %v7265_v22 = vadd.f32 %v7189_v4, %v2160_v49  ;;  %v2287_v52 = vrot.slane %v1921_v30, 2  ;;  %v5315_v18 = vpop.f32.mrb[132].mxu1 }
 0x28c   : > { %v2067_v55 = vsel %vm2037_vm2, %v2064_v7, %v2066_v53  ;;  %v1210_v48 = vpop.f32.mrb[36].mxu0  ;;  %v1936_v31 = vadd.f32 %v5315_v18, %v7096_v29  ;;  %v1930_v51 = vpop.f32.mrb[133].mxu1  ;;  %v2911_v29 = vld [vmem:[#allocation7 + $0x100] sm:$0xff] }
 0x28d   : > { %v2161_v37 = vadd.f32 %v2067_v55, %v1199_v14  ;;  %v1212_v26 = vpop.f32.mrb[37].mxu0  ;;  %v7270_v34 = vsel %vm2230_vm1, %v2286_v16, %v2287_v52  ;;  %v7273_v4 = vsel %vm2230_vm1, %v2287_v52, %v2289_v28  ;;  %v1931_v44 = vadd.f32 %v1930_v51, %v7092_v58 }
 0x28e   : > { %v2292_v7 = vrot.slane %v1936_v31, 2  ;;  %v5723_v35 = vpack.c.bf16 %v2914_v13, %v2911_v29  ;;  %v2068_v58 = vrot.slane %v1212_v26, 1 }
 0x28f   : > { %v7277_v38 = vadd.f32 %v7192_v12, %v2161_v37  ;;  %v2291_v21 = vrot.slane %v1931_v44, 2  ;;  %v5318_v14 = vpop.f32.mrb[134].mxu1  ;;  %v2921_v44 = vld [vmem:[#allocation7 + $0x150] sm:$0xff] }
 0x290   : > { %v1216_v27 = vpop.f32.mrb[38].mxu0  ;;  %v1946_v63 = vadd.f32 %v5318_v14, %v7104_v9  ;;  %v1940_v5 = vpop.f32.mrb[135].mxu1  ;;  %5724 = vmatpush1.bf16.msra.mxu0 %v5723_v35  ;;  %v2920_v9 = vld [vmem:[#allocation7 + $0x148] sm:$0xff] }
 0x291   : > { %v1218_v49 = vpop.f32.mrb[39].mxu0  ;;  %v7282_v41 = vsel %vm2230_vm1, %v2291_v21, %v2292_v7  ;;  %v1941_v12 = vadd.f32 %v1940_v5, %v7100_v1  ;;  %5725 = vmatprep.subr.bf16.mxu0 %v9388_v54  ;;  %v5726_v18 = vpack.c.bf16 %v2920_v9, %v2917_v8  ;;  %v2924_v21 = vld [vmem:[#allocation7 + $0x168] sm:$0xff]  ;;  %v2926_v5 = vld [vmem:[#allocation7 + $0x178] sm:$0xff] }
 0x292   : > { %v2069_v24 = vrot.slane %v1218_v49, 1  ;;  %v2296_v51 = vrot.slane %v1946_v63, 2  ;;  %v5641_v13 = vpack.c.bf16 %v2924_v21, %v2921_v44  ;;  %v2930_v8 = vld [vmem:[#allocation7 + $0x198] sm:$0xff]  ;;  %v2937_v44 = vld [vmem:[#allocation7 + $0x1d0] sm:$0xff] }
 0x293   : > { %v2294_v62 = vrot.slane %v1941_v12, 2  ;;  %v5321_v30 = vpop.f32.mrb[136].mxu1 }
 0x294   : > { %v2070_v45 = vsel %vm2037_vm2, %v2068_v58, %v2069_v24  ;;  %v1222_v53 = vpop.f32.mrb[40].mxu0  ;;  %v1956_v16 = vadd.f32 %v5321_v30, %v7112_v20  ;;  %v1950_v52 = vpop.f32.mrb[137].mxu1  ;;  %5727 = vmatpush1.bf16.msra.mxu0 %v5726_v18  ;;  %5642 = vmatpush1.bf16.msra.mxu1 %v5641_v13  ;;  %v2933_v13 = vld [vmem:[#allocation7 + $0x1b0] sm:$0xff] }
 0x295   : > { %v2162_v28 = vadd.f32 %v2070_v45, %v1210_v48  ;;  %v1223_v55 = vpop.f32.mrb[41].mxu0  ;;  %v7289_v56 = vsel %vm2230_vm1, %v2292_v7, %v2294_v62  ;;  %v1951_v1 = vadd.f32 %v1950_v52, %v7108_v17  ;;  %5728 = vmatprep.subr.bf16.mxu0 %v9388_v54  ;;  %v2927_v53 = vld [vmem:[#allocation7 + $0x180] sm:$0xff]  ;;  %v9389_v52 = vld [vmem:[#allocation14_spill] sm:$0xff] }
 0x296   : > { %v2071_v59 = vrot.slane %v1223_v55, 1  ;;  %v2299_v31 = vrot.slane %v1956_v16, 2 }
 0x297   : > { %v7293_v37 = vadd.f32 %v7200_v50, %v2162_v28  ;;  %v2297_v26 = vrot.slane %v1951_v1, 2  ;;  %v5324_v46 = vpop.f32.mrb[138].mxu1  ;;  %v2923_v50 = vld [vmem:[#allocation7 + $0x160] sm:$0xff]  ;;  %v2929_v28 = vld [vmem:[#allocation7 + $0x190] sm:$0xff]  ;;  %v5645_v1 = vpack.c.bf16 %v2930_v8, %v2927_v53  ;;  %v2938_v53 = vld [vmem:[#allocation7 + $0x1d8] sm:$0xff] }
 0x298   : > { %v2072_v48 = vsel %vm2037_vm2, %v2069_v24, %v2071_v59  ;;  %v1227_v20 = vpop.f32.mrb[42].mxu0  ;;  %v1966_v14 = vadd.f32 %v5324_v46, %v7119_v32  ;;  %v1960_v17 = vpop.f32.mrb[139].mxu1  ;;  %v2931_v32 = vld [vmem:[#allocation7 + $0x1a0] sm:$0xff]  ;;  %v5729_v9 = vpack.c.bf16 %v2926_v5, %v2923_v50  ;;  %v2934_v46 = vld [vmem:[#allocation7 + $0x1b8] sm:$0xff]  ;;  %v2936_v50 = vld [vmem:[#allocation7 + $0x1c8] sm:$0xff] }
 0x299   : > { %v2163_v7 = vadd.f32 %v2072_v48, %v1216_v27  ;;  %v1229_v29 = vpop.f32.mrb[43].mxu0  ;;  %v7299_v49 = vsel %vm2230_vm1, %v2296_v51, %v2297_v26  ;;  %v7302_v63 = vsel %vm2230_vm1, %v2297_v26, %v2299_v31  ;;  %v1961_v35 = vadd.f32 %v1960_v17, %v7116_v25  ;;  %v2928_v27 = vld [vmem:[#allocation7 + $0x188] sm:$0xff]  ;;  %v2935_v5 = vld [vmem:[#allocation7 + $0x1c0] sm:$0xff] }
 0x29a   : > { %v2302_v12 = vrot.slane %v1966_v14, 2  ;;  %v5643_v30 = vpack.c.bf16 %v2931_v32, %v2928_v27  ;;  %v2073_v16 = vrot.slane %v1229_v29, 1  ;;  %v9390_v31 = vld [vmem:[#allocation13_spill] sm:$0xff]  ;;  %5730 = vmatpush1.bf16.msra.mxu0 %v5729_v9  ;;  %v5647_v29 = vpack.c.bf16 %v2937_v44, %v2934_v46  ;;  %v9391_v27 = vld [vmem:[#allocation16_spill] sm:$0xff]  ;;  %v9392_v9 = vld [vmem:[#allocation15_spill] sm:$0xff] }
 0x29b   : > { %v7306_v58 = vadd.f32 %v7207_v60, %v2163_v7  ;;  %v2301_v24 = vrot.slane %v1961_v35, 2  ;;  %v5327_v62 = vpop.f32.mrb[140].mxu1  ;;  %v2932_v60 = vld [vmem:[#allocation7 + $0x1a8] sm:$0xff]  ;;  %5731 = vmatprep.subr.bf16.mxu0 %v9388_v54  ;;  %v2939_v44 = vld [vmem:[#allocation7 + $0x1e0] sm:$0xff] }
 0x29c   : > { %v1233_v45 = vpop.f32.mrb[44].mxu0  ;;  %v1976_v55 = vadd.f32 %v5327_v62, %v9389_v52  ;;  %v1970_v18 = vpop.f32.mrb[141].mxu1  ;;  %5644 = vmatprep.subr.bf16.mxu1 %v5643_v30  ;;  %v5732_v48 = vpack.c.bf16 %v2932_v60, %v2929_v28  ;;  %v5649_v30 = vpack.c.bf16 %v2936_v50, %v2933_v13  ;;  %v2946_v50 = vld [vmem:[#allocation7 + $0x218] sm:$0xff] }
 0x29d   : > { %v1235_v25 = vpop.f32.mrb[45].mxu0  ;;  %v7310_v59 = vsel %vm2230_vm1, %v2301_v24, %v2302_v12  ;;  %v1971_v51 = vadd.f32 %v1970_v18, %v9390_v31  ;;  %5646 = vmatpush1.bf16.msra.mxu1 %v5645_v1  ;;  %v2943_v1 = vld [vmem:[#allocation7 + $0x200] sm:$0xff] }
 0x29e   : > { %v2074_v26 = vrot.slane %v1235_v25, 1  ;;  %5648 = vmatprep.subr.bf16.mxu1 %v5647_v29  ;;  %5733 = vmatpush1.bf16.msra.mxu0 %v5732_v48  ;;  %v2306_v60 = vrot.slane %v1976_v55, 2 }
 0x29f   : > { %v2304_v21 = vrot.slane %v1971_v51, 2  ;;  %v5330_v14 = vpop.f32.mrb[142].mxu1  ;;  %5734 = vmatprep.subr.bf16.mxu0 %v9388_v54 }
 0x2a0   : > { %v2075_v7 = vsel %vm2037_vm2, %v2073_v16, %v2074_v26  ;;  %v1239_v17 = vpop.f32.mrb[46].mxu0  ;;  %v1986_v32 = vadd.f32 %v5330_v14, %v9391_v27  ;;  %v1980_v24 = vpop.f32.mrb[143].mxu1  ;;  %v5735_v16 = vpack.c.bf16 %v2938_v53, %v2935_v5  ;;  %v2949_v5 = vld [vmem:[#allocation7 + $0x230] sm:$0xff]  ;;  %v2950_v53 = vld [vmem:[#allocation7 + $0x238] sm:$0xff] }
 0x2a1   : > { %v2164_v35 = vadd.f32 %v2075_v7, %v1227_v20  ;;  %v1240_v62 = vpop.f32.mrb[47].mxu0  ;;  %v7317_v8 = vsel %vm2230_vm1, %v2302_v12, %v2304_v21  ;;  %v1981_v28 = vadd.f32 %v1980_v24, %v9392_v9  ;;  %5650 = vmatpush1.bf16.msra.mxu1 %v5649_v30  ;;  %v2940_v20 = vld [vmem:[#allocation7 + $0x1e8] sm:$0xff]  ;;  %v2942_v21 = vld [vmem:[#allocation7 + $0x1f8] sm:$0xff]  ;;  %v2941_v7 = vld [vmem:[#allocation7 + $0x1f0] sm:$0xff] }
 0x2a2   : > { %v2076_v52 = vrot.slane %v1240_v62, 1  ;;  %v2309_v25 = vrot.slane %v1986_v32, 2  ;;  %v5651_v46 = vpack.c.bf16 %v2943_v1, %v2940_v20  ;;  %v5653_v17 = vpack.c.bf16 %v2942_v21, %v2939_v44  ;;  %5736 = vmatpush1.bf16.msra.mxu0 %v5735_v16  ;;  %v2945_v27 = vld [vmem:[#allocation7 + $0x210] sm:$0xff]  ;;  %v2948_v32 = vld [vmem:[#allocation7 + $0x228] sm:$0xff]  ;;  %v2947_v24 = vld [vmem:[#allocation7 + $0x220] sm:$0xff] }
 0x2a3   : > { %v7321_v18 = vadd.f32 %v7216_v23, %v2164_v35  ;;  %v2307_v31 = vrot.slane %v1981_v28, 2  ;;  %v2944_v23 = vld [vmem:[#allocation7 + $0x208] sm:$0xff]  ;;  %5737 = vmatprep.subr.bf16.mxu0 %v9388_v54  ;;  %v5655_v35 = vpack.c.bf16 %v2949_v5, %v2946_v50  ;;  %v5657_v30 = vpack.c.bf16 %v2948_v32, %v2945_v27  ;;  %v2958_v5 = vld [vmem:[#allocation7 + $0x278] sm:$0xff] }
 0x2a4   : > { %v2077_v12 = vsel %vm2037_vm2, %v2074_v26, %v2076_v52  ;;  %v1244_v51 = vpop.f32.mrb[48].mxu0  ;;  %5652 = vmatprep.subr.bf16.mxu1 %v5651_v46  ;;  %v5738_v55 = vpack.c.bf16 %v2944_v23, %v2941_v7  ;;  %v5741_v52 = vpack.c.bf16 %v2950_v53, %v2947_v24  ;;  %v2952_v16 = vld [vmem:[#allocation7 + $0x248] sm:$0xff]  ;;  %v2953_v46 = vld [vmem:[#allocation7 + $0x250] sm:$0xff] }
 0x2a5   : > { %v2165_v48 = vadd.f32 %v2077_v12, %v1233_v45  ;;  %v1246_v14 = vpop.f32.mrb[49].mxu0  ;;  %v7326_v29 = vsel %vm2230_vm1, %v2306_v60, %v2307_v31  ;;  %v7329_v13 = vsel %vm2230_vm1, %v2307_v31, %v2309_v25  ;;  %5654 = vmatpush1.bf16.msra.mxu1 %v5653_v17  ;;  %v2955_v25 = vld [vmem:[#allocation7 + $0x260] sm:$0xff]  ;;  %v2954_v12 = vld [vmem:[#allocation7 + $0x258] sm:$0xff]  ;;  %v2957_v24 = vld [vmem:[#allocation7 + $0x270] sm:$0xff] }
 0x2a6   : > { %v2078_v9 = vrot.slane %v1246_v14, 1  ;;  %5656 = vmatprep.subr.bf16.mxu1 %v5655_v35  ;;  %5739 = vmatpush1.bf16.msra.mxu0 %v5738_v55  ;;  %v5659_v60 = vpack.c.bf16 %v2955_v25, %v2952_v16  ;;  %v2951_v31 = vld [vmem:[#allocation7 + $0x240] sm:$0xff]  ;;  %v2956_v14 = vld [vmem:[#allocation7 + $0x268] sm:$0xff]  ;;  %v2961_v35 = vld [vmem:[#allocation7 + $0x290] sm:$0xff] }
 0x2a7   : > { %v7332_v26 = vadd.f32 %v7219_v19, %v2165_v48  ;;  %v7338_v19 = vld [vmem:[%s9316_s2] ss:$0 sm:$0xff]  ;;  %5740 = vmatprep.subr.bf16.mxu0 %v9388_v54  ;;  %v5661_v48 = vpack.c.bf16 %v2954_v12, %v2951_v31  ;;  %v5744_v23 = vpack.c.bf16 %v2956_v14, %v2953_v46  ;;  %v5663_v32 = vpack.c.bf16 %v2961_v35, %v2958_v5  ;;  %v2962_v16 = vld [vmem:[#allocation7 + $0x298] sm:$0xff]  ;;  %v2973_v35 = vld [vmem:[#allocation7 + $0x2f0] sm:$0xff] }
 0x2a8   : > { %v1250_v45 = vpop.f32.mrb[50].mxu0  ;;  %v7344_v44 = vadd.f32 %v7338_v19, %v7145_v43  ;;  %v7348_v55 = vadd.f32 %v7338_v19, %v7138_v57  ;;  %v7356_v43 = vadd.f32 %v7338_v19, %v7158_v40  ;;  %v2959_v57 = vld [vmem:[#allocation7 + $0x280] sm:$0xff]  ;;  %v2966_v46 = vld [vmem:[#allocation7 + $0x2b8] sm:$0xff]  ;;  %v7379_v14 = vadd.f32 %v7338_v19, %v7184_v33 }
 0x2a9   : > { %v1252_v62 = vpop.f32.mrb[51].mxu0  ;;  %5658 = vmatpush1.bf16.msra.mxu1 %v5657_v30  ;;  %v7363_v30 = vadd.f32 %v7338_v19, %v7169_v36  ;;  %v5747_v40 = vpack.c.bf16 %v2962_v16, %v2959_v57  ;;  %v2963_v36 = vld [vmem:[#allocation7 + $0x2a0] sm:$0xff]  ;;  %v2970_v5 = vld [vmem:[#allocation7 + $0x2d8] sm:$0xff] }
 0x2aa   : > { %v2079_v28 = vrot.slane %v1252_v62, 1  ;;  %5660 = vmatprep.subr.bf16.mxu1 %v5659_v60  ;;  %5742 = vmatpush1.bf16.msra.mxu0 %v5741_v52  ;;  %v2960_v62 = vld [vmem:[#allocation7 + $0x288] sm:$0xff]  ;;  %v2453_v60 = vmul.f32 %v7356_v43, %v7356_v43  ;;  %v5671_v57 = vpack.c.bf16 %v2973_v35, %v2970_v5  ;;  %v2974_v16 = vld [vmem:[#allocation7 + $0x2f8] sm:$0xff]  ;;  %v7399_v5 = vadd.f32 %v7338_v19, %v7223_v61 }
 0x2ab   : > { %5743 = vmatprep.subr.bf16.mxu0 %v9388_v54  ;;  %v5665_v52 = vpack.c.bf16 %v2960_v62, %v2957_v24  ;;  %v7411_v61 = vadd.f32 %v7338_v19, %v7238_v10 }
 0x2ac   : > { %v2080_v20 = vsel %vm2037_vm2, %v2078_v9, %v2079_v28  ;;  %v1256_v1 = vpop.f32.mrb[52].mxu0 }
 0x2ad   : > { %v2166_v21 = vadd.f32 %v2080_v20, %v1244_v51  ;;  %v1257_v7 = vpop.f32.mrb[53].mxu0  ;;  %5662 = vmatpush1.bf16.msra.mxu1 %v5661_v48  ;;  %v2964_v20 = vld [vmem:[#allocation7 + $0x2a8] sm:$0xff]  ;;  %v2967_v1 = vld [vmem:[#allocation7 + $0x2c0] sm:$0xff] }
 0x2ae   : > { %v2081_v17 = vrot.slane %v1257_v7, 1  ;;  %5664 = vmatprep.subr.bf16.mxu1 %v5663_v32  ;;  %5745 = vmatpush1.bf16.msra.mxu0 %v5744_v23  ;;  %v5667_v12 = vpack.c.bf16 %v2967_v1, %v2964_v20  ;;  %v2968_v7 = vld [vmem:[#allocation7 + $0x2c8] sm:$0xff]  ;;  %v5669_v23 = vpack.c.bf16 %v2966_v46, %v2963_v36  ;;  %v2979_v36 = vld [vmem:[#allocation7 + $0x320] sm:$0xff] }
 0x2af   : > { %v7351_v50 = vadd.f32 %v7227_v2, %v2166_v21  ;;  %v2452_v2 = vmul.f32 %v7344_v44, %v7344_v44  ;;  %5746 = vmatprep.subr.bf16.mxu0 %v9388_v54  ;;  %v2965_v21 = vld [vmem:[#allocation7 + $0x2b0] sm:$0xff] }
 0x2b0   : > { %v2082_v51 = vsel %vm2037_vm2, %v2079_v28, %v2081_v17  ;;  %v1261_v27 = vpop.f32.mrb[54].mxu0  ;;  %v2451_v28 = vmul.f32 %v7348_v55, %v7348_v55  ;;  %v5750_v62 = vpack.c.bf16 %v2968_v7, %v2965_v21 }
 0x2b1   : > { %v2167_v53 = vadd.f32 %v2082_v51, %v1250_v45  ;;  %v1263_v9 = vpop.f32.mrb[55].mxu0  ;;  %5666 = vmatpush1.bf16.msra.mxu1 %v5665_v52  ;;  %v2414_v45 = vadd.f32 %v7344_v44, %v7348_v55  ;;  %v2969_v51 = vld [vmem:[#allocation7 + $0x2d0] sm:$0xff]  ;;  %v2971_v52 = vld [vmem:[#allocation7 + $0x2e0] sm:$0xff] }
 0x2b2   : > { %v2483_v48 = vadd.f32 %v2452_v2, %v2451_v28  ;;  %v2083_v32 = vrot.slane %v1263_v9, 1  ;;  %5668 = vmatprep.subr.bf16.mxu1 %v5667_v12  ;;  %5748 = vmatpush1.bf16.msra.mxu0 %v5747_v40  ;;  %v7383_v2 = vadd.f32 %v7338_v19, %v7196_v0  ;;  %v2976_v40 = vld [vmem:[#allocation7 + $0x308] sm:$0xff]  ;;  %v2455_v12 = vmul.f32 %v7379_v14, %v7379_v14 }
 0x2b3   : > { %v7368_v25 = vadd.f32 %v7234_v11, %v2167_v53  ;;  %v2454_v11 = vmul.f32 %v7363_v30, %v7363_v30  ;;  %v2972_v53 = vld [vmem:[#allocation7 + $0x2e8] sm:$0xff]  ;;  %5749 = vmatprep.subr.bf16.mxu0 %v9388_v54  ;;  %v2415_v28 = vadd.f32 %v2414_v45, %v7356_v43  ;;  %v7392_v0 = vadd.f32 %v7338_v19, %v7211_v47 }
 0x2b4   : > { %v1267_v31 = vpop.f32.mrb[56].mxu0  ;;  %v5673_v33 = vpack.c.bf16 %v2972_v53, %v2969_v51  ;;  %v2484_v20 = vadd.f32 %v2483_v48, %v2453_v60  ;;  %v5675_v7 = vpack.c.bf16 %v2979_v36, %v2976_v40  ;;  %v5753_v48 = vpack.c.bf16 %v2974_v16, %v2971_v52 }
 0x2b5   : > { %v1269_v17 = vpop.f32.mrb[57].mxu0  ;;  %5670 = vmatpush1.bf16.msra.mxu1 %v5669_v23  ;;  %v2456_v23 = vmul.f32 %v7383_v2, %v7383_v2  ;;  %v2458_v53 = vmul.f32 %v7399_v5, %v7399_v5  ;;  %v7435_v36 = vadd.f32 %v7338_v19, %v7277_v38 }
 0x2b6   : > { %v2084_v24 = vrot.slane %v1269_v17, 1  ;;  %5672 = vmatprep.subr.bf16.mxu1 %v5671_v57  ;;  %v2416_v17 = vadd.f32 %v2415_v28, %v7363_v30  ;;  %v2485_v45 = vadd.f32 %v2484_v20, %v2454_v11  ;;  %5751 = vmatpush1.bf16.msra.mxu0 %v5750_v62  ;;  %v7428_v28 = vadd.f32 %v7338_v19, %v7265_v22 }
 0x2b7   : > { %5752 = vmatprep.subr.bf16.mxu0 %v9388_v54 }
 0x2b8   : > { %v2085_v9 = vsel %vm2037_vm2, %v2083_v32, %v2084_v24  ;;  %v1273_v1 = vpop.f32.mrb[58].mxu0  ;;  %v2417_v47 = vadd.f32 %v2416_v17, %v7379_v14  ;;  %v2486_v51 = vadd.f32 %v2485_v45, %v2455_v12  ;;  %v2457_v32 = vmul.f32 %v7392_v0, %v7392_v0 }
 0x2b9   : > { %v2168_v46 = vadd.f32 %v2085_v9, %v1261_v27  ;;  %v1274_v21 = vpop.f32.mrb[59].mxu0  ;;  %5674 = vmatpush1.bf16.msra.mxu1 %v5673_v33  ;;  %v7443_v17 = vadd.f32 %v7338_v19, %v7293_v37 }
 0x2ba   : > { %v2086_v60 = vrot.slane %v1274_v21, 1  ;;  %5676 = vmatprep.subr.bf16.mxu1 %v5675_v7  ;;  %v2418_v57 = vadd.f32 %v2417_v47, %v7383_v2  ;;  %5754 = vmatpush1.bf16.msra.mxu0 %v5753_v48  ;;  %v2487_v54 = vadd.f32 %v2486_v51, %v2456_v23  ;;  %v2461_v7 = vmul.f32 %v7428_v28, %v7428_v28 }
 0x2bb   : > { %v7402_v35 = vadd.f32 %v7243_v6, %v2168_v46  ;;  %v2462_v47 = vmul.f32 %v7435_v36, %v7435_v36  ;;  %v7451_v51 = vadd.f32 %v7338_v19, %v7306_v58 }
 0x2bc   : > { %v2087_v27 = vsel %vm2037_vm2, %v2084_v24, %v2086_v60  ;;  %v1278_v11 = vpop.f32.mrb[60].mxu0  ;;  %v7418_v24 = vadd.f32 %v7338_v19, %v7250_v39  ;;  %v2419_v52 = vadd.f32 %v2418_v57, %v7392_v0  ;;  %v2488_v16 = vadd.f32 %v2487_v54, %v2457_v32 }
 0x2bd   : > { %v2169_v62 = vadd.f32 %v2087_v27, %v1267_v31  ;;  %v1280_v6 = vpop.f32.mrb[61].mxu0  ;;  %v2459_v31 = vmul.f32 %v7411_v61, %v7411_v61 }
 0x2be   : > { %v2420_v9 = vadd.f32 %v2419_v52, %v7399_v5  ;;  %v2088_v1 = vrot.slane %v1280_v6, 1  ;;  %v2489_v40 = vadd.f32 %v2488_v16, %v2458_v53  ;;  %v2463_v6 = vmul.f32 %v7443_v17, %v7443_v17 }
 0x2bf   : > { %v7421_v33 = vadd.f32 %v7246_v15, %v2169_v62  ;;  %v2460_v15 = vmul.f32 %v7418_v24, %v7418_v24  ;;  %v7459_v53 = vadd.f32 %v7338_v19, %v7321_v18  ;;  %v2464_v16 = vmul.f32 %v7451_v51, %v7451_v51 }
 0x2c0   : > { %v1284_v10 = vpop.f32.mrb[62].mxu0  ;;  %v2421_v12 = vadd.f32 %v2420_v9, %v7411_v61  ;;  %v2490_v22 = vadd.f32 %v2489_v40, %v2459_v31  ;;  %v7467_v31 = vadd.f32 %v7338_v19, %v7332_v26 }
 0x2c1   : > { %v1286_v20 = vpop.f32.mrb[63].mxu0  ;;  %v2465_v18 = vmul.f32 %v7459_v53, %v7459_v53 }
 0x2c2   : > { %v2089_v39 = vrot.slane %v1286_v20, 1  ;;  %v2422_v23 = vadd.f32 %v2421_v12, %v7418_v24  ;;  %v2491_v38 = vadd.f32 %v2490_v22, %v2460_v15  ;;  %v2466_v26 = vmul.f32 %v7467_v31, %v7467_v31 }
 0x2c4   : > { %v2090_v46 = vsel %vm2037_vm2, %v2088_v1, %v2089_v39  ;;  %v1290_v21 = vpop.f32.mrb[64].mxu0  ;;  %v2423_v37 = vadd.f32 %v2422_v23, %v7428_v28  ;;  %v7489_v23 = vadd.f32 %v7338_v19, %v7402_v35 }
 0x2c5   : > { %v2170_v45 = vadd.f32 %v2090_v46, %v1278_v11  ;;  %v1291_v60 = vpop.f32.mrb[65].mxu0  ;;  %v2492_v11 = vadd.f32 %v2491_v38, %v2461_v7  ;;  %v7481_v46 = vadd.f32 %v7338_v19, %v7368_v25 }
 0x2c6   : > { %v2091_v48 = vrot.slane %v1291_v60, 1 }
 0x2c7   : > { %v2363_v27 = vadd.f32 %v7254_v3, %v2170_v45  ;;  %v2424_v3 = vadd.f32 %v2423_v37, %v7435_v36  ;;  %v2493_v52 = vadd.f32 %v2492_v11, %v2462_v47  ;;  %v2468_v37 = vmul.f32 %v7481_v46, %v7481_v46 }
 0x2c8   : > { %v2092_v32 = vsel %vm2037_vm2, %v2089_v39, %v2091_v48  ;;  %v1295_v62 = vpop.f32.mrb[66].mxu0  ;;  %v7474_v39 = vadd.f32 %v7338_v19, %v7351_v50 }
 0x2c9   : > { %v2171_v57 = vadd.f32 %v2092_v32, %v1284_v10  ;;  %v1297_v54 = vpop.f32.mrb[67].mxu0  ;;  %v2425_v10 = vadd.f32 %v2424_v3, %v7443_v17  ;;  %v2494_v9 = vadd.f32 %v2493_v52, %v2463_v6  ;;  %v2469_v52 = vmul.f32 %v7489_v23, %v7489_v23 }
 0x2ca   : > { %v2467_v48 = vmul.f32 %v7474_v39, %v7474_v39 }
 0x2cb   : > { %v2364_v58 = vadd.f32 %v7261_v42, %v2171_v57  ;;  %v2093_v42 = vrot.slane %v1297_v54, 1  ;;  %v2426_v15 = vadd.f32 %v2425_v10, %v7451_v51  ;;  %v2495_v12 = vadd.f32 %v2494_v9, %v2464_v16 }
 0x2cc   : > { %v1301_v20 = vpop.f32.mrb[68].mxu0 }
 0x2cd   : > { %v1303_v1 = vpop.f32.mrb[69].mxu0  ;;  %v2427_v7 = vadd.f32 %v2426_v15, %v7459_v53  ;;  %v2496_v60 = vadd.f32 %v2495_v12, %v2465_v18 }
 0x2ce   : > { %v2094_v40 = vrot.slane %v1303_v1, 1  ;;  %v7511_v1 = vadd.f32 %v7338_v19, %v2364_v58 }
 0x2cf   : > { %v2428_v47 = vadd.f32 %v2427_v7, %v7467_v31  ;;  %v2497_v32 = vadd.f32 %v2496_v60, %v2466_v26 }
 0x2d0   : > { %v2095_v21 = vsel %vm2037_vm2, %v2093_v42, %v2094_v40  ;;  %v1307_v22 = vpop.f32.mrb[70].mxu0  ;;  %v2472_v58 = vmul.f32 %v7511_v1, %v7511_v1 }
 0x2d1   : > { %v2172_v45 = vadd.f32 %v2095_v21, %v1295_v62  ;;  %v1308_v50 = vpop.f32.mrb[71].mxu0  ;;  %v7497_v62 = vadd.f32 %v7338_v19, %v7421_v33  ;;  %v2429_v57 = vadd.f32 %v2428_v47, %v7474_v39  ;;  %v2498_v3 = vadd.f32 %v2497_v32, %v2467_v48 }
 0x2d2   : > { %v2096_v38 = vrot.slane %v1308_v50, 1 }
 0x2d3   : > { %v2365_v25 = vadd.f32 %v7270_v34, %v2172_v45  ;;  %v7504_v34 = vadd.f32 %v7338_v19, %v2363_v27  ;;  %v2430_v16 = vadd.f32 %v2429_v57, %v7481_v46  ;;  %v2499_v33 = vadd.f32 %v2498_v3, %v2468_v37 }
 0x2d4   : > { %v2097_v11 = vsel %vm2037_vm2, %v2094_v40, %v2096_v38  ;;  %v1312_v6 = vpop.f32.mrb[72].mxu0  ;;  %v2470_v9 = vmul.f32 %v7497_v62, %v7497_v62 }
 0x2d5   : > { %v2173_v35 = vadd.f32 %v2097_v11, %v1301_v20  ;;  %v1314_v54 = vpop.f32.mrb[73].mxu0  ;;  %v2431_v18 = vadd.f32 %v2430_v16, %v7489_v23  ;;  %v2500_v40 = vadd.f32 %v2499_v33, %v2469_v52  ;;  %v2471_v27 = vmul.f32 %v7504_v34, %v7504_v34 }
 0x2d6   : > { %v2098_v15 = vrot.slane %v1314_v54, 1 }
 0x2d7   : > { %v2366_v10 = vadd.f32 %v7273_v4, %v2173_v35  ;;  %v2432_v26 = vadd.f32 %v2431_v18, %v7497_v62  ;;  %v7518_v4 = vadd.f32 %v7338_v19, %v2365_v25  ;;  %v2501_v21 = vadd.f32 %v2500_v40, %v2470_v9 }
 0x2d8   : > { %v1318_v20 = vpop.f32.mrb[74].mxu0 }
 0x2d9   : > { %v1320_v42 = vpop.f32.mrb[75].mxu0  ;;  %v2433_v45 = vadd.f32 %v2432_v26, %v7504_v34  ;;  %v7525_v50 = vadd.f32 %v7338_v19, %v2366_v10  ;;  %v2502_v38 = vadd.f32 %v2501_v21, %v2471_v27  ;;  %v2473_v25 = vmul.f32 %v7518_v4, %v7518_v4 }
 0x2da   : > { %v2099_v12 = vrot.slane %v1320_v42, 1 }
 0x2db   : > { %v2434_v32 = vadd.f32 %v2433_v45, %v7511_v1  ;;  %v2503_v11 = vadd.f32 %v2502_v38, %v2472_v58  ;;  %v2474_v3 = vmul.f32 %v7525_v50, %v7525_v50 }
 0x2dc   : > { %v2100_v22 = vsel %vm2037_vm2, %v2098_v15, %v2099_v12  ;;  %v1324_v7 = vpop.f32.mrb[76].mxu0 }
 0x2dd   : > { %v2174_v60 = vadd.f32 %v2100_v22, %v1312_v6  ;;  %v1325_v48 = vpop.f32.mrb[77].mxu0  ;;  %v2435_v54 = vadd.f32 %v2434_v32, %v7518_v4  ;;  %v2504_v10 = vadd.f32 %v2503_v11, %v2473_v25 }
 0x2de   : > { %v2101_v47 = vrot.slane %v1325_v48, 1 }
 0x2df   : > { %v2367_v37 = vadd.f32 %v7282_v41, %v2174_v60  ;;  %v2436_v33 = vadd.f32 %v2435_v54, %v7525_v50  ;;  %v2505_v42 = vadd.f32 %v2504_v10, %v2474_v3 }
 0x2e0   : > { %v2102_v57 = vsel %vm2037_vm2, %v2099_v12, %v2101_v47  ;;  %v1329_v35 = vpop.f32.mrb[78].mxu0 }
 0x2e1   : > { %v7536_v6 = vadd.f32 %v7338_v19, %v2367_v37  ;;  %v2175_v52 = vadd.f32 %v2102_v57, %v1318_v20  ;;  %v1331_v16 = vpop.f32.mrb[79].mxu0 }
 0x2e2   : > { %v2103_v12 = vrot.slane %v1331_v16, 1 }
 0x2e3   : > { %v2475_v41 = vmul.f32 %v7536_v6, %v7536_v6  ;;  %v2368_v9 = vadd.f32 %v7289_v56, %v2175_v52  ;;  %v2437_v40 = vadd.f32 %v2436_v33, %v7536_v6 }
 0x2e4   : > { %v1335_v18 = vpop.f32.mrb[80].mxu0 }
 0x2e5   : > { %v7544_v27 = vadd.f32 %v7338_v19, %v2368_v9  ;;  %v1337_v15 = vpop.f32.mrb[81].mxu0  ;;  %v2506_v20 = vadd.f32 %v2505_v42, %v2475_v41 }
 0x2e6   : > { %v2104_v26 = vrot.slane %v1337_v15, 1 }
 0x2e7   : > { %v2438_v21 = vadd.f32 %v2437_v40, %v7544_v27  ;;  %v2476_v58 = vmul.f32 %v7544_v27, %v7544_v27 }
 0x2e8   : > { %v2105_v22 = vsel %vm2037_vm2, %v2103_v12, %v2104_v26  ;;  %v1341_v7 = vpop.f32.mrb[82].mxu0 }
 0x2e9   : > { %v2507_v56 = vadd.f32 %v2506_v20, %v2476_v58  ;;  %v2176_v45 = vadd.f32 %v2105_v22, %v1329_v35  ;;  %v1342_v60 = vpop.f32.mrb[83].mxu0 }
 0x2ea   : > { %v2106_v48 = vrot.slane %v1342_v60, 1 }
 0x2eb   : > { %v2369_v38 = vadd.f32 %v7299_v49, %v2176_v45 }
 0x2ec   : > { %v2107_v47 = vsel %vm2037_vm2, %v2104_v26, %v2106_v48  ;;  %v1346_v32 = vpop.f32.mrb[84].mxu0 }
 0x2ed   : > { %v7553_v25 = vadd.f32 %v7338_v19, %v2369_v38  ;;  %v2177_v37 = vadd.f32 %v2107_v47, %v1335_v18  ;;  %v1348_v11 = vpop.f32.mrb[85].mxu0 }
 0x2ee   : > { %v2108_v10 = vrot.slane %v1348_v11, 1 }
 0x2ef   : > { %v2439_v57 = vadd.f32 %v2438_v21, %v7553_v25  ;;  %v2477_v54 = vmul.f32 %v7553_v25, %v7553_v25  ;;  %v2370_v3 = vadd.f32 %v7302_v63, %v2177_v37 }
 0x2f0   : > { %v1352_v35 = vpop.f32.mrb[86].mxu0 }
 0x2f1   : > { %v2508_v52 = vadd.f32 %v2507_v56, %v2477_v54  ;;  %v7560_v16 = vadd.f32 %v7338_v19, %v2370_v3  ;;  %v1354_v49 = vpop.f32.mrb[87].mxu0 }
 0x2f2   : > { %v2109_v33 = vrot.slane %v1354_v49, 1 }
 0x2f3   : > { %v2440_v41 = vadd.f32 %v2439_v57, %v7560_v16  ;;  %v2478_v9 = vmul.f32 %v7560_v16, %v7560_v16 }
 0x2f4   : > { %v2110_v18 = vsel %vm2037_vm2, %v2108_v10, %v2109_v33  ;;  %v1358_v42 = vpop.f32.mrb[88].mxu0 }
 0x2f5   : > { %v2509_v40 = vadd.f32 %v2508_v52, %v2478_v9  ;;  %v2178_v15 = vadd.f32 %v2110_v18, %v1346_v32  ;;  %v1359_v12 = vpop.f32.mrb[89].mxu0 }
 0x2f6   : > { %v2111_v63 = vrot.slane %v1359_v12, 1 }
 0x2f7   : > { %v2371_v26 = vadd.f32 %v7310_v59, %v2178_v15 }
 0x2f8   : > { %v2112_v20 = vsel %vm2037_vm2, %v2109_v33, %v2111_v63  ;;  %v1363_v21 = vpop.f32.mrb[90].mxu0 }
 0x2f9   : > { %v7569_v58 = vadd.f32 %v7338_v19, %v2371_v26  ;;  %v2179_v22 = vadd.f32 %v2112_v20, %v1352_v35  ;;  %v1365_v7 = vpop.f32.mrb[91].mxu0 }
 0x2fa   : > { %v2113_v32 = vrot.slane %v1365_v7, 1 }
 0x2fb   : > { %v2441_v56 = vadd.f32 %v2440_v41, %v7569_v58  ;;  %v2479_v45 = vmul.f32 %v7569_v58, %v7569_v58  ;;  %v2372_v60 = vadd.f32 %v7317_v8, %v2179_v22 }
 0x2fc   : > { %v1369_v48 = vpop.f32.mrb[92].mxu0 }
 0x2fd   : > { %v2510_v38 = vadd.f32 %v2509_v40, %v2479_v45  ;;  %v7576_v47 = vadd.f32 %v7338_v19, %v2372_v60  ;;  %v1371_v59 = vpop.f32.mrb[93].mxu0 }
 0x2fe   : > { %v2114_v37 = vrot.slane %v1371_v59, 1  ;;  %v2980_v59 = vld [vmem:[#allocation7 + $0x328] sm:$0xff] }
 0x2ff   : > { %v2442_v11 = vadd.f32 %v2441_v56, %v7576_v47  ;;  %v2480_v57 = vmul.f32 %v7576_v47, %v7576_v47 }
 0x300   : > { %v2115_v54 = vsel %vm2037_vm2, %v2113_v32, %v2114_v37  ;;  %v1375_v3 = vpop.f32.mrb[94].mxu0 }
 0x301   : > { %v2511_v35 = vadd.f32 %v2510_v38, %v2480_v57  ;;  %v2180_v52 = vadd.f32 %v2115_v54, %v1363_v21  ;;  %v1376_v49 = vpop.f32.mrb[95].mxu0 }
 0x302   : > { %v2116_v8 = vrot.slane %v1376_v49, 1 }
 0x303   : > { %v2373_v10 = vadd.f32 %v7326_v29, %v2180_v52 }
 0x304   : > { %v2117_v33 = vsel %vm2037_vm2, %v2114_v37, %v2116_v8 }
 0x305   : > { %v7585_v41 = vadd.f32 %v7338_v19, %v2373_v10  ;;  %v2181_v9 = vadd.f32 %v2117_v33, %v1369_v48 }
 0x307   : > { %v2443_v18 = vadd.f32 %v2442_v11, %v7585_v41  ;;  %v2481_v42 = vmul.f32 %v7585_v41, %v7585_v41  ;;  %v2374_v40 = vadd.f32 %v7329_v13, %v2181_v9  ;;  %v2977_v13 = vld [vmem:[#allocation7 + $0x310] sm:$0xff] }
 0x308   : > { %v7597_v32 = vpack.c.bf16 %v2980_v59, %v2977_v13  ;;  %v7654_v13 = vld [vmem:[#allocation7 + $0x348] sm:$0xff]  ;;  %v2997_v9 = vld [vmem:[#allocation7 + $0x3b0] sm:$0xff] }
 0x309   : > { %v2512_v15 = vadd.f32 %v2511_v35, %v2481_v42  ;;  %v7592_v12 = vadd.f32 %v7338_v19, %v2374_v40  ;;  %v7656_v59 = vld [vmem:[#allocation7 + $0x368] sm:$0xff]  ;;  %v7723_v40 = vld [vmem:[#allocation7 + $0x398] sm:$0xff] }
 0x30a   : > { %5756 = vmatprep.subr.bf16.mxu0 %v7597_v32 }
 0x30b   : > { %v2444_v63 = vadd.f32 %v2443_v18, %v7592_v12  ;;  %v2482_v29 = vmul.f32 %v7592_v12, %v7592_v12 }
 0x30d   : > { %v2445_v26 = vrot.slane %v2444_v63, 4  ;;  %v2513_v20 = vadd.f32 %v2512_v15, %v2482_v29 }
 0x30f   : > { %v2446_v21 = vadd.f32 %v2445_v26, %v2444_v63  ;;  %v2514_v22 = vrot.slane %v2513_v20, 4 }
 0x311   : > { %v2447_v7 = vrot.slane %v2446_v21, 2  ;;  %v2515_v56 = vadd.f32 %v2514_v22, %v2513_v20  ;;  %v2975_v22 = vld [vmem:[#allocation7 + $0x300] sm:$0xff] }
 0x313   : > { %v2448_v45 = vadd.f32 %v2447_v7, %v2446_v21  ;;  %v2516_v60 = vrot.slane %v2515_v56, 2  ;;  %v2978_v7 = vld [vmem:[#allocation7 + $0x318] sm:$0xff] }
 0x315   : > { %v2449_v48 = vrot.slane %v2448_v45, 1  ;;  %v2517_v38 = vadd.f32 %v2516_v60, %v2515_v56  ;;  %v7644_v60 = vld [vmem:[#allocation7 + $0x330] sm:$0xff] }
 0x317   : > { %v2450_v19 = vadd.f32 %v2449_v48, %v2448_v45  ;;  %v2518_v37 = vrot.slane %v2517_v38, 1  ;;  %v2985_v45 = vld [vmem:[#allocation7 + $0x350] sm:$0xff] }
 0x319   : > { %v2519_v11 = vadd.f32 %v2518_v37, %v2517_v38  ;;  %v7600_v57 = vmul.f32 0.00390625, %v2450_v19  ;;  %v7658_v19 = vld [vmem:[#allocation7 + $0x380] sm:$0xff] }
 0x31b   : > { %v2521_v54 = vmul.f32 0.00390625, %v2519_v11  ;;  %v2522_v3 = vmul.f32 %v7600_v57, %v7600_v57  ;;  %v2553_v18 = vsub.f32 %v7569_v58, %v7600_v57  ;;  %v2554_v42 = vsub.f32 %v7576_v47, %v7600_v57 }
 0x31c   : > { %v2527_v63 = vsub.f32 %v7356_v43, %v7600_v57  ;;  %v2528_v29 = vsub.f32 %v7363_v30, %v7600_v57  ;;  %v2529_v58 = vsub.f32 %v7379_v14, %v7600_v57  ;;  %v2530_v47 = vsub.f32 %v7383_v2, %v7600_v57  ;;  %v2982_v2 = vld [vmem:[#allocation7 + $0x338] sm:$0xff] }
 0x31d   : > { %v2523_v35 = vsub.f32 %v2521_v54, %v2522_v3  ;;  %v2525_v20 = vsub.f32 %v7348_v55, %v7600_v57  ;;  %v2526_v21 = vsub.f32 %v7344_v44, %v7600_v57 }
 0x31f   : > { %v2524_v52 = vmax.f32 %v2523_v35, 0.0  ;;  %v5677_v35 = vpack.c.bf16 %v2978_v7, %v2975_v22 }
 0x321   : > { %v2557_v49 = vadd.f32 1e-05, %v2524_v52  ;;  %v5679_v52 = vpack.c.bf16 %v2985_v45, %v2982_v2  ;;  %v2534_v2 = vsub.f32 %v7418_v24, %v7600_v57  ;;  %v7696_v24 = vld [vmem:[#allocation7 + $0x360] sm:$0xff] }
 0x323   : > { %6054 = vrsqrt.f32 %v2557_v49 }
 0x32d   : > { %v7624_v26 = vpop.eup %6054 }
 0x32e   : > { %v2561_v43 = vmul.f32 %v7624_v26, %v2527_v63  ;;  %v7636_v30 = vmul.f32 %v7624_v26, %v2528_v29  ;;  %v7639_v56 = vmul.f32 %v7624_v26, %v2553_v18  ;;  %v7642_v14 = vmul.f32 %v7624_v26, %v2554_v42 }
 0x32f   : > { %v2559_v55 = vmul.f32 %v7624_v26, %v2525_v20  ;;  %v2560_v44 = vmul.f32 %v7624_v26, %v2526_v21  ;;  %v7649_v48 = vmul.f32 %v7624_v26, %v2529_v58  ;;  %v7652_v38 = vmul.f32 %v7624_v26, %v2530_v47 }
 0x330   : > { %9393 = vst [vmem:[#allocation14_spill] sm:$0xff] %v7642_v14  ;;  %v2593_v37 = vmax.f32 %v2561_v43, 0.0  ;;  %v2594_v11 = vmax.f32 %v7636_v30, 0.0  ;;  %v5681_v42 = vpack.c.bf16 %v7654_v13, %v7644_v60  ;;  %v5683_v63 = vpack.c.bf16 %v7658_v19, %v7656_v59  ;;  %v2993_v13 = vld [vmem:[#allocation7 + $0x390] sm:$0xff] }
 0x331   : > { %v2591_v54 = vmax.f32 %v2559_v55, 0.0  ;;  %v2592_v3 = vmax.f32 %v2560_v44, 0.0  ;;  %v9336_v18 = vmax.f32 %v7649_v48, 0.0  ;;  %v2531_v29 = vsub.f32 %v7392_v0, %v7600_v57 }
 0x332   : > { %v2703_v49 = vrot.slane %v2593_v37, 1  ;;  %v2751_v58 = vrot.slane %v2593_v37, 7  ;;  %v7668_v47 = vrot.slane %v2594_v11, 7  ;;  %v9329_v20 = vmax.f32 %v7652_v38, 0.0  ;;  %v7698_v37 = vld [vmem:[#allocation7 + $0x378] sm:$0xff] }
 0x333   : > { %v2532_v21 = vsub.f32 %v7399_v5, %v7600_v57  ;;  %v2704_v22 = vrot.slane %v2591_v54, 1  ;;  %v2754_v7 = vrot.slane %v2591_v54, 7  ;;  %v2755_v43 = vrot.slane %v2592_v3, 7 }
 0x334   : > { %v2533_v30 = vsub.f32 %v7411_v61, %v7600_v57  ;;  %v7678_v45 = vsel %vm432_vm0, %v2703_v49, %v2751_v58  ;;  %v7682_v0 = vsel %vm432_vm0, %v2751_v58, %v7668_v47  ;;  %v2535_v55 = vsub.f32 %v7428_v28, %v7600_v57 }
 0x335   : > { %9394 = vst [vmem:[#allocation13_spill] sm:$0xff] %v7678_v45  ;;  %9395 = vst [vmem:[#allocation16_spill] sm:$0xff] %v7682_v0  ;;  %v7687_v5 = vsel %vm432_vm0, %v2704_v22, %v2754_v7  ;;  %v7690_v44 = vsel %vm432_vm0, %v2754_v7, %v2755_v43  ;;  %v7694_v61 = vrot.slane %v9336_v18, 7  ;;  %v2536_v54 = vsub.f32 %v7435_v36, %v7600_v57  ;;  %v9396_v22 = vld [vmem:[#allocation12_spill] sm:$0xff] }
 0x336   : > { %3087 = vmatprep.mubr.f32.mxu1 %v7687_v5  ;;  %3761 = vmatprep.mubr.f32.mxu0 %v7687_v5  ;;  %v7706_v28 = vrot.slane %v9329_v20, 7  ;;  %v7709_v49 = vmul.f32 %v7624_v26, %v2531_v29  ;;  %v7712_v58 = vmul.f32 %v7624_v26, %v2532_v21  ;;  %v2630_v36 = vrot.slane %v2592_v3, %v9396_v22 }
 0x337   : > { %3088 = vmatmul.mubr.f32.vlgmr.msra.gmra.mrb[144].mxu1 %v7678_v45  ;;  %3762 = vmatmul.mubr.f32.vlgmr.msra.gmra.mrb[96].mxu0 %v7678_v45  ;;  %v7718_v7 = vmul.f32 %v7624_v26, %v2533_v30  ;;  %v7721_v15 = vmul.f32 %v7624_v26, %v2534_v2  ;;  %v5685_v30 = vpack.c.bf16 %v7698_v37, %v7696_v24 }
 0x338   : > { %3093 = vmatprep.mubr.f32.mxu1 %v7690_v44  ;;  %5678 = vmatpush1.bf16.msra.mxu1 %v5677_v35  ;;  %v7729_v29 = vsel %vm432_vm0, %v7694_v61, %v7706_v28  ;;  %v9335_v21 = vmax.f32 %v7709_v49, 0.0  ;;  %v9334_v3 = vmax.f32 %v7712_v58, 0.0  ;;  %v7739_v35 = vmul.f32 %v7624_v26, %v2535_v55 }
 0x339   : > { %3766 = vmatprep.mubr.f32.mxu0 %v7690_v44  ;;  %5680 = vmatprep.subr.bf16.mxu1 %v5679_v52  ;;  %v9333_v2 = vmax.f32 %v7718_v7, 0.0  ;;  %v9330_v33 = vmax.f32 %v7721_v15, 0.0  ;;  %v7742_v10 = vmul.f32 %v7624_v26, %v2536_v54  ;;  %v2626_v20 = vrot.slane %v2594_v11, %v9396_v22 }
 0x33a   : > { %v7747_v8 = vrot.slane %v9335_v21, 7  ;;  %v7751_v24 = vrot.slane %v9334_v3, 7  ;;  %v5687_v52 = vpack.c.bf16 %v2997_v9, %v7723_v40  ;;  %5758 = vmatpush3.bf16.msra.mxu0 %v7597_v32  ;;  %v2537_v55 = vsub.f32 %v7443_v17, %v7600_v57 }
 0x33b   : > { %9397 = vst [vmem:[#allocation15_spill] sm:$0xff] %v7742_v10  ;;  %3094 = vmatmul.mubr.f32.gmra.mrb[146].mxu1 %v7682_v0  ;;  %3767 = vmatmul.mubr.f32.gmra.mrb[98].mxu0 %v7682_v0  ;;  %v7760_v11 = vsel %vm432_vm0, %v2755_v43, %v2630_v36  ;;  %v7764_v37 = vrot.slane %v9333_v2, 7  ;;  %v7768_v54 = vrot.slane %v9330_v33, 7  ;;  %v2538_v32 = vsub.f32 %v7451_v51, %v7600_v57  ;;  %v3002_v2 = vld [vmem:[#allocation7 + $0x3d8] sm:$0xff] }
 0x33c   : > { %v2539_v17 = vsub.f32 %v7459_v53, %v7600_v57  ;;  %3099 = vmatprep.mubr.f32.mxu1 %v7760_v11  ;;  %3771 = vmatprep.mubr.f32.mxu0 %v7760_v11  ;;  %v7779_v9 = vsel %vm432_vm0, %v7747_v8, %v7751_v24  ;;  %v9331_v40 = vmax.f32 %v7739_v35, 0.0  ;;  %v2540_v43 = vsub.f32 %v7467_v31, %v7600_v57 }
 0x33d   : > { %v2541_v51 = vsub.f32 %v7474_v39, %v7600_v57  ;;  %5682 = vmatpush1.bf16.msra.mxu1 %v5681_v42  ;;  %v7792_v53 = vsel %vm432_vm0, %v7764_v37, %v7768_v54  ;;  %v9332_v36 = vmax.f32 %v7742_v10, 0.0  ;;  %v7797_v33 = vsel %vm432_vm0, %v7668_v47, %v2626_v20  ;;  %v2996_v42 = vld [vmem:[#allocation7 + $0x3a8] sm:$0xff]  ;;  %v3003_v20 = vld [vmem:[#allocation7 + $0x3e0] sm:$0xff] }
 0x33e   : > { %9398 = vst [vmem:[#allocation12_spill] sm:$0xff] %v7797_v33  ;;  %5684 = vmatprep.subr.bf16.mxu1 %v5683_v63  ;;  %v7804_v31 = vrot.slane %v9331_v40, 7  ;;  %v7807_v39 = vmul.f32 %v7624_v26, %v2537_v55  ;;  %v7810_v60 = vmul.f32 %v7624_v26, %v2538_v32  ;;  %v7819_v19 = vmul.f32 %v7624_v26, %v2539_v17  ;;  %v3000_v47 = vld [vmem:[#allocation7 + $0x3c8] sm:$0xff] }
 0x33f   : > { %3100 = vmatmul.mubr.f32.gmra.mrb[148].mxu1 %v7797_v33  ;;  %3772 = vmatmul.mubr.f32.gmra.mrb[100].mxu0 %v7797_v33  ;;  %v7816_v59 = vrot.slane %v9332_v36, 7  ;;  %v7822_v63 = vmul.f32 %v7624_v26, %v2540_v43  ;;  %v7829_v40 = vmul.f32 %v7624_v26, %v2541_v51  ;;  %v2999_v36 = vld [vmem:[#allocation7 + $0x3c0] sm:$0xff]  ;;  %v5689_v43 = vpack.c.bf16 %v2996_v42, %v2993_v13 }
 0x340   : > { %9399 = vst [vmem:[#allocation17_spill] sm:$0xff] %v7819_v19  ;;  %3104 = vmatprep.mubr.f32.mxu1 %v7678_v45  ;;  %3776 = vmatprep.mubr.f32.mxu0 %v7678_v45  ;;  %v9338_v55 = vmax.f32 %v7807_v39, 0.0  ;;  %v9341_v32 = vmax.f32 %v7810_v60, 0.0  ;;  %v9340_v3 = vmax.f32 %v7819_v19, 0.0  ;;  %v2542_v10 = vsub.f32 %v7481_v46, %v7600_v57 }
 0x341   : > { %9400 = vst [vmem:[#allocation18_spill] sm:$0xff] %v7822_v63  ;;  %5686 = vmatpush1.bf16.msra.mxu1 %v5685_v30  ;;  %v7834_v17 = vsel %vm432_vm0, %v7804_v31, %v7816_v59  ;;  %v9339_v21 = vmax.f32 %v7822_v63, 0.0  ;;  %v5691_v30 = vpack.c.bf16 %v3003_v20, %v3000_v47  ;;  %v2543_v47 = vsub.f32 %v7489_v23, %v7600_v57 }
 0x342   : > { %v7840_v18 = vrot.slane %v9338_v55, 7  ;;  %5688 = vmatprep.subr.bf16.mxu1 %v5687_v52  ;;  %v7844_v51 = vrot.slane %v9341_v32, 7  ;;  %v7852_v13 = vrot.slane %v9340_v3, 7  ;;  %v5693_v52 = vpack.c.bf16 %v3002_v2, %v2999_v36  ;;  %v2983_v55 = vld [vmem:[#allocation7 + $0x340] sm:$0xff]  ;;  %v3006_v2 = vld [vmem:[#allocation7 + $0x3f8] sm:$0xff]  ;;  %v3009_v36 = vld [vmem:[#allocation7 + $0x410] sm:$0xff] }
 0x343   : > { %3105 = vmatmul.mubr.f32.gmra.mrb[150].mxu1 %v7687_v5  ;;  %3777 = vmatmul.mubr.f32.gmra.mrb[102].mxu0 %v7687_v5  ;;  %v7856_v42 = vrot.slane %v9339_v21, 7  ;;  %v2544_v46 = vsub.f32 %v7497_v62, %v7600_v57  ;;  %v2986_v21 = vld [vmem:[#allocation7 + $0x358] sm:$0xff]  ;;  %v2545_v23 = vsub.f32 %v7504_v34, %v7600_v57  ;;  %v2546_v62 = vsub.f32 %v7511_v1, %v7600_v57 }
 0x344   : > { %9401 = vst [vmem:[#allocation19_spill] sm:$0xff] %v7844_v51  ;;  %3110 = vmatprep.mubr.f32.mxu1 %v7682_v0  ;;  %3781 = vmatprep.mubr.f32.mxu0 %v7682_v0  ;;  %v7867_v5 = vsel %vm432_vm0, %v7840_v18, %v7844_v51  ;;  %v7880_v32 = vmul.f32 %v7624_v26, %v2542_v10  ;;  %v9403_v20 = vmax.f32 %v7649_v48, 0.0  ;;  %v9404_v19 = vmax.f32 %v7829_v40, 0.0 }
 0x345   : > { %9402 = vst [vmem:[#allocation20_spill] sm:$0xff] %v7856_v42  ;;  %5690 = vmatpush1.bf16.msra.mxu1 %v5689_v43  ;;  %v7877_v3 = vsel %vm432_vm0, %v7852_v13, %v7856_v42  ;;  %v7889_v34 = vmul.f32 %v7624_v26, %v2543_v47  ;;  %v7892_v1 = vmul.f32 %v7624_v26, %v2544_v46  ;;  %v3005_v43 = vld [vmem:[#allocation7 + $0x3f0] sm:$0xff]  ;;  %v3008_v42 = vld [vmem:[#allocation7 + $0x408] sm:$0xff] }
 0x346   : > { %v2705_v63 = vrot.slane %v9403_v20, 1  ;;  %v7886_v51 = vrot.slane %v9404_v19, 7  ;;  %5692 = vmatprep.subr.bf16.mxu1 %v5691_v30  ;;  %v9348_v10 = vmax.f32 %v7880_v32, 0.0  ;;  %v7898_v48 = vmul.f32 %v7624_v26, %v2545_v23 }
 0x347   : > { %9405 = vst [vmem:[#allocation21_spill] sm:$0xff] %v7892_v1  ;;  %3111 = vmatmul.mubr.f32.gmra.mrb[152].mxu1 %v7690_v44  ;;  %3782 = vmatmul.mubr.f32.gmra.mrb[104].mxu0 %v7690_v44  ;;  %v5759_v19 = vpack.c.bf16 %v2986_v21, %v2983_v55  ;;  %v5695_v20 = vpack.c.bf16 %v3009_v36, %v3006_v2  ;;  %v9347_v30 = vmax.f32 %v7889_v34, 0.0  ;;  %v9346_v47 = vmax.f32 %v7892_v1, 0.0 }
 0x348   : > { %9406 = vst [vmem:[#allocation22_spill] sm:$0xff] %v7898_v48  ;;  %3116 = vmatprep.mubr.f32.mxu1 %v7797_v33  ;;  %3786 = vmatprep.mubr.f32.mxu0 %v7797_v33  ;;  %v7905_v46 = vmul.f32 %v7624_v26, %v2546_v62  ;;  %v7909_v44 = vrot.slane %v9348_v10, 7  ;;  %v9351_v23 = vmax.f32 %v7898_v48, 0.0  ;;  %v5697_v21 = vpack.c.bf16 %v3008_v42, %v3005_v43  ;;  %v2989_v62 = vld [vmem:[#allocation7 + $0x370] sm:$0xff]  ;;  %v2992_v43 = vld [vmem:[#allocation7 + $0x388] sm:$0xff]  ;;  %v3011_v48 = vld [vmem:[#allocation7 + $0x420] sm:$0xff] }
 0x349   : > { %5694 = vmatpush1.bf16.msra.mxu1 %v5693_v52  ;;  %5760 = vmatprep.subr.bf16.mxu0 %v5759_v19  ;;  %v2547_v55 = vsub.f32 %v7518_v4, %v7600_v57  ;;  %v7916_v2 = vrot.slane %v9347_v30, 7  ;;  %v7920_v36 = vrot.slane %v9346_v47, 7  ;;  %v2548_v52 = vsub.f32 %v7525_v50, %v7600_v57 }
 0x34a   : > { %5762 = vmatpush3.bf16.msra.mxu0 %v5759_v19  ;;  %5696 = vmatprep.subr.bf16.mxu1 %v5695_v20  ;;  %v7928_v4 = vsel %vm432_vm0, %v2705_v63, %v7694_v61  ;;  %v7933_v42 = vsel %vm432_vm0, %v7886_v51, %v7909_v44  ;;  %v3012_v19 = vld [vmem:[#allocation7 + $0x428] sm:$0xff]  ;;  %v3015_v20 = vld [vmem:[#allocation7 + $0x440] sm:$0xff]  ;;  %v7945_v61 = vrot.slane %v9351_v23, 7  ;;  %v9410_v47 = vsub.f32 %v7536_v6, %v7600_v57  ;;  %v3014_v23 = vld [vmem:[#allocation7 + $0x438] sm:$0xff] }
 0x34b   : > { %9407 = vst [vmem:[#allocation23_spill] sm:$0xff] %v7920_v36  ;;  %3117 = vmatmul.mubr.f32.gmra.mrb[154].mxu1 %v7760_v11  ;;  %3787 = vmatmul.mubr.f32.gmra.mrb[106].mxu0 %v7760_v11  ;;  %9408 = vst [vmem:[#allocation24_spill] sm:$0xff] %v7928_v4  ;;  %v7941_v50 = vsel %vm432_vm0, %v7916_v2, %v7920_v36  ;;  %v7950_v30 = vmul.f32 %v7624_v26, %v2547_v55  ;;  %v9411_v11 = vmax.f32 %v7652_v38, 0.0 }
 0x34c   : > { %3121 = vmatprep.mubr.f32.mxu1 %v7928_v4  ;;  %3791 = vmatprep.mubr.f32.mxu0 %v7928_v4  ;;  %9409 = vst [vmem:[#allocation25_spill] sm:$0xff] %v7941_v50  ;;  %v7953_v10 = vmul.f32 %v7624_v26, %v2548_v52  ;;  %v7959_v36 = vmul.f32 %v7624_v26, %v9410_v47 }
 0x34d   : > { %5698 = vmatpush1.bf16.msra.mxu1 %v5697_v21  ;;  %v2634_v50 = vrot.slane %v9411_v11, %v9396_v22  ;;  %v9412_v21 = vmax.f32 %v7905_v46, 0.0  ;;  %v5763_v55 = vpack.c.bf16 %v2992_v43, %v2989_v62  ;;  %v5699_v1 = vpack.c.bf16 %v3015_v20, %v3012_v19 }
 0x34e   : > { %v9356_v6 = vmax.f32 %v7950_v30, 0.0  ;;  %v9360_v47 = vmax.f32 %v7953_v10, 0.0  ;;  %v9413_v38 = vsub.f32 %v7544_v27, %v7600_v57  ;;  %v5701_v43 = vpack.c.bf16 %v3014_v23, %v3011_v48 }
 0x34f   : > { %v7966_v63 = vrot.slane %v9412_v21, 7  ;;  %3122 = vmatmul.mubr.f32.gmra.mrb[156].mxu1 %v7678_v45  ;;  %3792 = vmatmul.mubr.f32.gmra.mrb[108].mxu0 %v7678_v45  ;;  %v9414_v19 = vmax.f32 %v7639_v56, 0.0  ;;  %v9415_v21 = vmax.f32 %v7642_v14, 0.0  ;;  %v9416_v48 = vmax.f32 %v7709_v49, 0.0 }
 0x350   : > { %v7977_v11 = vmul.f32 %v7624_v26, %v9413_v38  ;;  %3127 = vmatprep.mubr.f32.mxu1 %v7729_v29  ;;  %3796 = vmatprep.mubr.f32.mxu0 %v7729_v29  ;;  %v7996_v38 = vrot.slane %v9356_v6, 7  ;;  %v8000_v52 = vrot.slane %v9360_v47, 7  ;;  %v9418_v6 = vsub.f32 %v7553_v25, %v7600_v57 }
 0x351   : > { %v7984_v62 = vsel %vm432_vm0, %v7945_v61, %v7966_v63  ;;  %v7988_v20 = vrot.slane %v9414_v19, 7  ;;  %v7992_v27 = vrot.slane %v9415_v21, 7  ;;  %5764 = vmatprep.subr.bf16.mxu0 %v5763_v55  ;;  %5700 = vmatprep.subr.bf16.mxu1 %v5699_v1  ;;  %v2706_v23 = vrot.slane %v9416_v48, 1 }
 0x352   : > { %v9417_v19 = vmax.f32 %v7959_v36, 0.0  ;;  %5766 = vmatpush3.bf16.msra.mxu0 %v5763_v55  ;;  %v9358_v21 = vmax.f32 %v7977_v11, 0.0  ;;  %5702 = vmatpush1.bf16.msra.mxu1 %v5701_v43  ;;  %v8013_v14 = vmul.f32 %v7624_v26, %v9418_v6  ;;  %v8019_v49 = vsel %vm432_vm0, %v7706_v28, %v2634_v50 }
 0x353   : > { %3128 = vmatmul.mubr.f32.gmra.mrb[158].mxu1 %v7682_v0  ;;  %3797 = vmatmul.mubr.f32.gmra.mrb[110].mxu0 %v7682_v0  ;;  %v8024_v1 = vsel %vm432_vm0, %v7996_v38, %v8000_v52  ;;  %v9419_v6 = vsub.f32 %v7560_v16, %v7600_v57  ;;  %v8042_v50 = vsel %vm432_vm0, %v7988_v20, %v7992_v27 }
 0x354   : > { %v8006_v45 = vrot.slane %v9417_v19, 7  ;;  %3133 = vmatprep.mubr.f32.mxu1 %v8019_v49  ;;  %3801 = vmatprep.mubr.f32.mxu0 %v8019_v49  ;;  %v8030_v25 = vrot.slane %v9358_v21, 7  ;;  %v9359_v55 = vmax.f32 %v8013_v14, 0.0  ;;  %v8046_v43 = vsel %vm432_vm0, %v2706_v23, %v7747_v8 }
 0x355   : > { %v8037_v28 = vmul.f32 %v7624_v26, %v9419_v6  ;;  %v9420_v6 = vsub.f32 %v7585_v41, %v7600_v57  ;;  %v9421_v23 = vsub.f32 %v7592_v12, %v7600_v57  ;;  %v9423_v12 = vmax.f32 %v7712_v58, 0.0 }
 0x356   : > { %v8051_v48 = vsel %vm432_vm0, %v8006_v45, %v8030_v25  ;;  %v8057_v16 = vrot.slane %v9359_v55, 7 }
 0x357   : > { %3134 = vmatmul.mubr.f32.gmra.mrb[160].mxu1 %v7797_v33  ;;  %3802 = vmatmul.mubr.f32.gmra.mrb[112].mxu0 %v7797_v33  ;;  %v9361_v19 = vmax.f32 %v8037_v28, 0.0  ;;  %v8064_v8 = vmul.f32 %v7624_v26, %v9420_v6  ;;  %v8070_v21 = vmul.f32 %v7624_v26, %v9421_v23  ;;  %v2638_v57 = vrot.slane %v9423_v12, %v9396_v22  ;;  %v2995_v23 = vld [vmem:[#allocation7 + $0x3a0] sm:$0xff] }
 0x358   : > { %3138 = vmatprep.mubr.f32.mxu1 %v8046_v43  ;;  %3806 = vmatprep.mubr.f32.mxu0 %v8046_v43  ;;  %v9426_v33 = vmax.f32 %v7718_v7, 0.0  ;;  %v9427_v7 = vmax.f32 %v7721_v15, 0.0 }
 0x359   : > { %9422 = vst [vmem:[#allocation26_spill] sm:$0xff] %v8070_v21  ;;  %v8076_v55 = vrot.slane %v9361_v19, 7  ;;  %v9364_v47 = vmax.f32 %v8064_v8, 0.0  ;;  %v9370_v41 = vmax.f32 %v8070_v21, 0.0  ;;  %v2998_v19 = vld [vmem:[#allocation7 + $0x3b8] sm:$0xff] }
 0x35a   : > { %v5767_v58 = vpack.c.bf16 %v2998_v19, %v2995_v23  ;;  %v2707_v0 = vrot.slane %v9426_v33, 1  ;;  %v3018_v21 = vld [vmem:[#allocation7 + $0x458] sm:$0xff]  ;;  %v3017_v23 = vld [vmem:[#allocation7 + $0x450] sm:$0xff] }
 0x35b   : > { %3139 = vmatmul.mubr.f32.gmra.mrb[162].mxu1 %v7928_v4  ;;  %3807 = vmatmul.mubr.f32.gmra.mrb[114].mxu0 %v7928_v4  ;;  %v8088_v26 = vsel %vm432_vm0, %v8057_v16, %v8076_v55  ;;  %v8092_v6 = vrot.slane %v9364_v47, 7  ;;  %v8098_v4 = vrot.slane %v9370_v41, 7  ;;  %v8109_v47 = vsel %vm432_vm0, %v7751_v24, %v2638_v57  ;;  %v3021_v41 = vld [vmem:[#allocation7 + $0x470] sm:$0xff]  ;;  %v3007_v57 = vld [vmem:[#allocation7 + $0x400] sm:$0xff] }
 0x35c   : > { %3144 = vmatprep.mubr.f32.mxu1 %v7779_v9  ;;  %3811 = vmatprep.mubr.f32.mxu0 %v7779_v9  ;;  %v5703_v19 = vpack.c.bf16 %v3021_v41, %v3018_v21  ;;  %v8119_v33 = vsel %vm432_vm0, %v2707_v0, %v7764_v37  ;;  %v2642_v24 = vrot.slane %v9427_v7, %v9396_v22  ;;  %v3004_v21 = vld [vmem:[#allocation7 + $0x3e8] sm:$0xff]  ;;  %v9428_v41 = vmax.f32 %v7739_v35, 0.0  ;;  %v9429_v7 = vld [vmem:[#allocation15_spill] sm:$0xff] }
 0x35d   : > { %9424 = vst [vmem:[#allocation27_spill] sm:$0xff] %v8098_v4  ;;  %v8103_v12 = vsel %vm432_vm0, %v8092_v6, %v8098_v4  ;;  %v3020_v4 = vld [vmem:[#allocation7 + $0x468] sm:$0xff]  ;;  %5768 = vmatprep.subr.bf16.mxu0 %v5767_v58 }
 0x35e   : > { %9425 = vst [vmem:[#allocation28_spill] sm:$0xff] %v8103_v12  ;;  %v5705_v12 = vpack.c.bf16 %v3020_v4, %v3017_v23  ;;  %5770 = vmatpush3.bf16.msra.mxu0 %v5767_v58  ;;  %5704 = vmatprep.subr.bf16.mxu1 %v5703_v19  ;;  %v3001_v4 = vld [vmem:[#allocation7 + $0x3d0] sm:$0xff]  ;;  %v8134_v37 = vsel %vm432_vm0, %v7768_v54, %v2642_v24  ;;  %v2708_v15 = vrot.slane %v9428_v41, 1  ;;  %v3010_v58 = vld [vmem:[#allocation7 + $0x418] sm:$0xff]  ;;  %v3016_v35 = vld [vmem:[#allocation7 + $0x448] sm:$0xff]  ;;  %v9430_v24 = vmax.f32 %v9429_v7, 0.0 }
 0x35f   : > { %3145 = vmatmul.mubr.f32.gmra.mrb[164].mxu1 %v7729_v29  ;;  %3812 = vmatmul.mubr.f32.gmra.mrb[116].mxu0 %v7729_v29  ;;  %v5771_v0 = vpack.c.bf16 %v3004_v21, %v3001_v4  ;;  %v3013_v19 = vld [vmem:[#allocation7 + $0x430] sm:$0xff]  ;;  %v3019_v21 = vld [vmem:[#allocation7 + $0x460] sm:$0xff] }
 0x360   : > { %3150 = vmatprep.mubr.f32.mxu1 %v8109_v47  ;;  %3816 = vmatprep.mubr.f32.mxu0 %v8109_v47  ;;  %v8144_v54 = vsel %vm432_vm0, %v2708_v15, %v7804_v31  ;;  %v5779_v23 = vpack.c.bf16 %v3016_v35, %v3013_v19  ;;  %v2646_v4 = vrot.slane %v9430_v24, %v9396_v22  ;;  %v3022_v31 = vld [vmem:[#allocation7 + $0x478] sm:$0xff]  ;;  %v9431_v15 = vmax.f32 %v7807_v39, 0.0  ;;  %v9434_v19 = vld [vmem:[#allocation17_spill] sm:$0xff]  ;;  %v9436_v7 = vld [vmem:[#allocation18_spill] sm:$0xff] }
 0x361   : > { %5706 = vmatpush1.bf16.msra.mxu1 %v5705_v12  ;;  %5772 = vmatprep.subr.bf16.mxu0 %v5771_v0  ;;  %v5775_v12 = vpack.c.bf16 %v3010_v58, %v3007_v57  ;;  %v9432_v39 = vmax.f32 %v7810_v60, 0.0  ;;  %v9435_v35 = vmax.f32 %v9434_v19, 0.0  ;;  %v9437_v24 = vmax.f32 %v9436_v7, 0.0  ;;  %v9444_v19 = vld [vmem:[#allocation25_spill] sm:$0xff] }
 0x362   : > { %5774 = vmatpush3.bf16.msra.mxu0 %v5771_v0  ;;  %v5783_v0 = vpack.c.bf16 %v3022_v31, %v3019_v21  ;;  %v8159_v41 = vsel %vm432_vm0, %v7816_v59, %v2646_v4  ;;  %v2709_v57 = vrot.slane %v9431_v15, 1  ;;  %v9439_v31 = vmax.f32 %v7829_v40, 0.0 }
 0x363   : > { %3151 = vmatmul.mubr.f32.gmra.mrb[166].mxu1 %v8019_v49  ;;  %3817 = vmatmul.mubr.f32.gmra.mrb[118].mxu0 %v8019_v49  ;;  %v2650_v59 = vrot.slane %v9432_v39, %v9396_v22  ;;  %v2654_v4 = vrot.slane %v9437_v24, %v9396_v22  ;;  %v9440_v40 = vmax.f32 %v7880_v32, 0.0  ;;  %v9441_v39 = vmax.f32 %v7889_v34, 0.0  ;;  %v9442_v34 = vld [vmem:[#allocation21_spill] sm:$0xff] }
 0x364   : > { %3155 = vmatprep.mubr.f32.mxu1 %v8119_v33  ;;  %3821 = vmatprep.mubr.f32.mxu0 %v8119_v33  ;;  %v8169_v58 = vsel %vm432_vm0, %v2709_v57, %v7840_v18  ;;  %v9433_v18 = vld [vmem:[#allocation19_spill] sm:$0xff] }
 0x365   : > { %5776 = vmatprep.subr.bf16.mxu0 %v5775_v12  ;;  %v2658_v57 = vrot.slane %v9440_v40, %v9396_v22 }
 0x366   : > { %5778 = vmatpush3.bf16.msra.mxu0 %v5775_v12  ;;  %v8184_v12 = vsel %vm432_vm0, %v9433_v18, %v2650_v59  ;;  %v2712_v59 = vrot.slane %v9441_v39, 1 }
 0x367   : > { %3156 = vmatmul.mubr.f32.gmra.mrb[168].mxu1 %v8046_v43  ;;  %3822 = vmatmul.mubr.f32.gmra.mrb[120].mxu0 %v8046_v43 }
 0x368   : > { %3161 = vmatprep.mubr.f32.mxu1 %v7792_v53  ;;  %3826 = vmatprep.mubr.f32.mxu0 %v7792_v53  ;;  %v8244_v32 = vsel %vm432_vm0, %v2712_v59, %v7916_v2  ;;  %v9445_v2 = vld [vmem:[#allocation23_spill] sm:$0xff]  ;;  %v9453_v59 = vmax.f32 %v8013_v14, 0.0  ;;  %v9454_v14 = vmax.f32 %v8037_v28, 0.0  ;;  %v9456_v28 = vld [vmem:[#allocation14_spill] sm:$0xff] }
 0x369   : > { %5780 = vmatprep.subr.bf16.mxu0 %v5779_v23 }
 0x36a   : > { %5782 = vmatpush3.bf16.msra.mxu0 %v5779_v23  ;;  %v2710_v23 = vrot.slane %v9435_v35, 1 }
 0x36b   : > { %3162 = vmatmul.mubr.f32.gmra.mrb[170].mxu1 %v7779_v9  ;;  %3827 = vmatmul.mubr.f32.gmra.mrb[122].mxu0 %v7779_v9 }
 0x36c   : > { %3167 = vmatprep.mubr.f32.mxu1 %v8134_v37  ;;  %3831 = vmatprep.mubr.f32.mxu0 %v8134_v37  ;;  %v8194_v60 = vsel %vm432_vm0, %v2710_v23, %v7852_v13  ;;  %v9438_v13 = vld [vmem:[#allocation20_spill] sm:$0xff]  ;;  %v9446_v23 = vld [vmem:[#allocation22_spill] sm:$0xff] }
 0x36d   : > { %5784 = vmatprep.subr.bf16.mxu0 %v5783_v0  ;;  %v8209_v21 = vsel %vm432_vm0, %v9438_v13, %v2654_v4  ;;  %v9447_v7 = vmax.f32 %v9446_v23, 0.0  ;;  %v9448_v13 = vmax.f32 %v7905_v46, 0.0  ;;  %v9458_v23 = vmax.f32 %v8064_v8, 0.0 }
 0x36e   : > { %5786 = vmatpush3.bf16.msra.mxu0 %v5783_v0  ;;  %v2711_v0 = vrot.slane %v9439_v31, 1 }
 0x36f   : > { %3168 = vmatmul.mubr.f32.gmra.mrb[172].mxu1 %v8109_v47  ;;  %3832 = vmatmul.mubr.f32.gmra.mrb[124].mxu0 %v8109_v47  ;;  %v2713_v24 = vrot.slane %v9447_v7, 1  ;;  %v2666_v31 = vrot.slane %v9448_v13, %v9396_v22  ;;  %v2718_v7 = vrot.slane %v9458_v23, 1 }
 0x370   : > { %3172 = vmatprep.mubr.f32.mxu1 %v8144_v54  ;;  %3836 = vmatprep.mubr.f32.mxu0 %v8144_v54  ;;  %v8219_v15 = vsel %vm432_vm0, %v2711_v0, %v7886_v51  ;;  %v8234_v51 = vsel %vm432_vm0, %v7909_v44, %v2658_v57  ;;  %v9443_v44 = vmax.f32 %v9442_v34, 0.0  ;;  %v9449_v0 = vmax.f32 %v7950_v30, 0.0 }
 0x371   : > { %v8269_v4 = vsel %vm432_vm0, %v2713_v24, %v7945_v61  ;;  %v8284_v61 = vsel %vm432_vm0, %v7966_v63, %v2666_v31  ;;  %v9450_v30 = vmax.f32 %v7953_v10, 0.0  ;;  %v9451_v57 = vmax.f32 %v7959_v36, 0.0  ;;  %v9461_v31 = vld [vmem:[#allocation28_spill] sm:$0xff] }
 0x372   : > { %v2662_v18 = vrot.slane %v9443_v44, %v9396_v22  ;;  %v2714_v40 = vrot.slane %v9449_v0, 1  ;;  %v9452_v36 = vmax.f32 %v7977_v11, 0.0  ;;  %v2716_v34 = vrot.slane %v9453_v59, 1 }
 0x373   : > { %3173 = vmatmul.mubr.f32.gmra.mrb[174].mxu1 %v8119_v33  ;;  %3837 = vmatmul.mubr.f32.gmra.mrb[126].mxu0 %v8119_v33  ;;  %v2670_v63 = vrot.slane %v9450_v30, %v9396_v22  ;;  %v2715_v39 = vrot.slane %v9451_v57, 1  ;;  %v9455_v44 = vmax.f32 %v7639_v56, 0.0  ;;  %v8394_v24 = vsel %vm432_vm0, %v2718_v7, %v8092_v6  ;;  %v9462_v6 = vld [vmem:[#allocation27_spill] sm:$0xff]  ;;  %v9465_v30 = vld [vmem:[#allocation16_spill] sm:$0xff] }
 0x374   : > { %3178 = vmatprep.mubr.f32.mxu1 %v7834_v17  ;;  %3841 = vmatprep.mubr.f32.mxu0 %v7834_v17  ;;  %v8259_v35 = vsel %vm432_vm0, %v9445_v2, %v2662_v18  ;;  %v8294_v46 = vsel %vm432_vm0, %v2714_v40, %v7996_v38  ;;  %v8344_v11 = vsel %vm432_vm0, %v2716_v34, %v8057_v16  ;;  %v9464_v40 = vmov 0.0   ;;  %v9467_v57 = vld [vmem:[#allocation24_spill] sm:$0xff] }
 0x375   : > { %v8309_v38 = vsel %vm432_vm0, %v8000_v52, %v2670_v63  ;;  %v8319_v10 = vsel %vm432_vm0, %v2715_v39, %v8006_v45  ;;  %v2674_v52 = vrot.slane %v9452_v36, %v9396_v22  ;;  %v2717_v16 = vrot.slane %v9455_v44, 1  ;;  %v9466_v63 = vld [vmem:[#allocation12_spill] sm:$0xff] }
 0x377   : > { %3179 = vmatmul.mubr.f32.gmra.mrb[176].mxu1 %v7792_v53  ;;  %3842 = vmatmul.mubr.f32.gmra.mrb[128].mxu0 %v7792_v53  ;;  %v8334_v45 = vsel %vm432_vm0, %v8030_v25, %v2674_v52  ;;  %v2678_v25 = vrot.slane %v9454_v14, %v9396_v22  ;;  %v8369_v56 = vsel %vm432_vm0, %v2717_v16, %v7988_v20 }
 0x378   : > { %3184 = vmatprep.mubr.f32.mxu1 %v8159_v41  ;;  %3846 = vmatprep.mubr.f32.mxu0 %v8159_v41 }
 0x379   : > { %v8361_v18 = vsel %vm432_vm0, %v8076_v55, %v2678_v25  ;;  %v9457_v55 = vmax.f32 %v9456_v28, 0.0 }
 0x37b   : > { %3185 = vmatmul.mubr.f32.gmra.mrb[178].mxu1 %v8134_v37  ;;  %3847 = vmatmul.mubr.f32.gmra.mrb[130].mxu0 %v8134_v37  ;;  %v2682_v2 = vrot.slane %v9457_v55, %v9396_v22 }
 0x37c   : > { %3189 = vmatprep.mubr.f32.mxu1 %v8169_v58  ;;  %3851 = vmatprep.mubr.f32.mxu0 %v8169_v58 }
 0x37d   : > { %v8384_v20 = vsel %vm432_vm0, %v7992_v27, %v2682_v2  ;;  %v9459_v27 = vld [vmem:[#allocation26_spill] sm:$0xff] }
 0x37e   : > { %v9460_v8 = vmax.f32 %v9459_v27, 0.0 }
 0x37f   : > { %3190 = vmatmul.mubr.f32.gmra.mrb[180].mxu1 %v8144_v54  ;;  %3852 = vmatmul.mubr.f32.gmra.mrb[132].mxu0 %v8144_v54 }
 0x380   : > { %3195 = vmatprep.mubr.f32.mxu1 %v7867_v5  ;;  %3856 = vmatprep.mubr.f32.mxu0 %v7867_v5  ;;  %v2686_v13 = vrot.slane %v9460_v8, %v9396_v22  ;;  %v9463_v22 = vld [vmem:[#allocation13_spill] sm:$0xff] }
 0x382   : > { %v8409_v0 = vsel %vm432_vm0, %v9462_v6, %v2686_v13 }
 0x383   : > { %3196 = vmatmul.mubr.f32.gmra.mrb[182].mxu1 %v7834_v17  ;;  %3857 = vmatmul.mubr.f32.gmra.mrb[134].mxu0 %v7834_v17 }
 0x384   : > { %3201 = vmatprep.mubr.f32.mxu1 %v8184_v12  ;;  %3861 = vmatprep.mubr.f32.mxu0 %v8184_v12 }
 0x387   : > { %3202 = vmatmul.mubr.f32.gmra.mrb[184].mxu1 %v8159_v41  ;;  %3862 = vmatmul.mubr.f32.gmra.mrb[136].mxu0 %v8159_v41 }
 0x388   : > { %3206 = vmatprep.mubr.f32.mxu1 %v8194_v60  ;;  %3866 = vmatprep.mubr.f32.mxu0 %v8194_v60 }
 0x38b   : > { %3207 = vmatmul.mubr.f32.gmra.mrb[186].mxu1 %v8169_v58  ;;  %3867 = vmatmul.mubr.f32.gmra.mrb[138].mxu0 %v8169_v58 }
 0x38c   : > { %3212 = vmatprep.mubr.f32.mxu1 %v7877_v3  ;;  %3871 = vmatprep.mubr.f32.mxu0 %v7877_v3 }
 0x38f   : > { %3213 = vmatmul.mubr.f32.gmra.mrb[188].mxu1 %v7867_v5  ;;  %3872 = vmatmul.mubr.f32.gmra.mrb[140].mxu0 %v7867_v5 }
 0x390   : > { %3218 = vmatprep.mubr.f32.mxu1 %v8209_v21  ;;  %3876 = vmatprep.mubr.f32.mxu0 %v8209_v21 }
 0x393   : > { %3219 = vmatmul.mubr.f32.gmra.mrb[190].mxu1 %v8184_v12  ;;  %3877 = vmatmul.mubr.f32.gmra.mrb[142].mxu0 %v8184_v12 }
 0x394   : > { %3223 = vmatprep.mubr.f32.mxu1 %v8219_v15  ;;  %3881 = vmatprep.mubr.f32.mxu0 %v8219_v15 }
 0x397   : > { %3224 = vmatmul.mubr.f32.gmra.mrb[192].mxu1 %v8194_v60  ;;  %3882 = vmatmul.mubr.f32.gmra.mrb[144].mxu0 %v8194_v60 }
 0x398   : > { %3229 = vmatprep.mubr.f32.mxu1 %v7933_v42  ;;  %3886 = vmatprep.mubr.f32.mxu0 %v7933_v42 }
 0x39b   : > { %3230 = vmatmul.mubr.f32.gmra.mrb[194].mxu1 %v7877_v3  ;;  %3887 = vmatmul.mubr.f32.gmra.mrb[146].mxu0 %v7877_v3 }
 0x39c   : > { %3235 = vmatprep.mubr.f32.mxu1 %v8234_v51  ;;  %3891 = vmatprep.mubr.f32.mxu0 %v8234_v51 }
 0x39f   : > { %3236 = vmatmul.mubr.f32.gmra.mrb[196].mxu1 %v8209_v21  ;;  %3892 = vmatmul.mubr.f32.gmra.mrb[148].mxu0 %v8209_v21 }
 0x3a0   : > { %3240 = vmatprep.mubr.f32.mxu1 %v8244_v32  ;;  %3896 = vmatprep.mubr.f32.mxu0 %v8244_v32 }
 0x3a3   : > { %3241 = vmatmul.mubr.f32.gmra.mrb[198].mxu1 %v8219_v15  ;;  %3897 = vmatmul.mubr.f32.gmra.mrb[150].mxu0 %v8219_v15 }
 0x3a4   : > { %3246 = vmatprep.mubr.f32.mxu1 %v9444_v19  ;;  %3901 = vmatprep.mubr.f32.mxu0 %v9444_v19 }
 0x3a7   : > { %3247 = vmatmul.mubr.f32.gmra.mrb[200].mxu1 %v7933_v42  ;;  %3902 = vmatmul.mubr.f32.gmra.mrb[152].mxu0 %v7933_v42 }
 0x3a8   : > { %3252 = vmatprep.mubr.f32.mxu1 %v8259_v35  ;;  %3906 = vmatprep.mubr.f32.mxu0 %v8259_v35 }
 0x3ab   : > { %3253 = vmatmul.mubr.f32.gmra.mrb[202].mxu1 %v8234_v51  ;;  %3907 = vmatmul.mubr.f32.gmra.mrb[154].mxu0 %v8234_v51 }
 0x3ac   : > { %3257 = vmatprep.mubr.f32.mxu1 %v8269_v4  ;;  %3911 = vmatprep.mubr.f32.mxu0 %v8269_v4 }
 0x3af   : > { %3258 = vmatmul.mubr.f32.gmra.mrb[204].mxu1 %v8244_v32  ;;  %3912 = vmatmul.mubr.f32.gmra.mrb[156].mxu0 %v8244_v32 }
 0x3b0   : > { %3263 = vmatprep.mubr.f32.mxu1 %v7984_v62  ;;  %3916 = vmatprep.mubr.f32.mxu0 %v7984_v62 }
 0x3b3   : > { %3264 = vmatmul.mubr.f32.gmra.mrb[206].mxu1 %v9444_v19  ;;  %3917 = vmatmul.mubr.f32.gmra.mrb[158].mxu0 %v9444_v19 }
 0x3b4   : > { %3269 = vmatprep.mubr.f32.mxu1 %v8284_v61  ;;  %3921 = vmatprep.mubr.f32.mxu0 %v8284_v61 }
 0x3b7   : > { %3270 = vmatmul.mubr.f32.gmra.mrb[208].mxu1 %v8259_v35  ;;  %3922 = vmatmul.mubr.f32.gmra.mrb[160].mxu0 %v8259_v35 }
 0x3b8   : > { %3274 = vmatprep.mubr.f32.mxu1 %v8294_v46  ;;  %3926 = vmatprep.mubr.f32.mxu0 %v8294_v46 }
 0x3bb   : > { %3275 = vmatmul.mubr.f32.gmra.mrb[210].mxu1 %v8269_v4  ;;  %3927 = vmatmul.mubr.f32.gmra.mrb[162].mxu0 %v8269_v4 }
 0x3bc   : > { %3280 = vmatprep.mubr.f32.mxu1 %v8024_v1  ;;  %3931 = vmatprep.mubr.f32.mxu0 %v8024_v1 }
 0x3bf   : > { %3281 = vmatmul.mubr.f32.gmra.mrb[212].mxu1 %v7984_v62  ;;  %3932 = vmatmul.mubr.f32.gmra.mrb[164].mxu0 %v7984_v62 }
 0x3c0   : > { %3286 = vmatprep.mubr.f32.mxu1 %v8309_v38  ;;  %3936 = vmatprep.mubr.f32.mxu0 %v8309_v38 }
 0x3c3   : > { %3287 = vmatmul.mubr.f32.gmra.mrb[214].mxu1 %v8284_v61  ;;  %3937 = vmatmul.mubr.f32.gmra.mrb[166].mxu0 %v8284_v61 }
 0x3c4   : > { %3291 = vmatprep.mubr.f32.mxu1 %v8319_v10  ;;  %3941 = vmatprep.mubr.f32.mxu0 %v8319_v10 }
 0x3c7   : > { %3292 = vmatmul.mubr.f32.gmra.mrb[216].mxu1 %v8294_v46  ;;  %3942 = vmatmul.mubr.f32.gmra.mrb[168].mxu0 %v8294_v46 }
 0x3c8   : > { %3297 = vmatprep.mubr.f32.mxu1 %v8051_v48  ;;  %3946 = vmatprep.mubr.f32.mxu0 %v8051_v48 }
 0x3cb   : > { %3298 = vmatmul.mubr.f32.gmra.mrb[218].mxu1 %v8024_v1  ;;  %3947 = vmatmul.mubr.f32.gmra.mrb[170].mxu0 %v8024_v1 }
 0x3cc   : > { %3303 = vmatprep.mubr.f32.mxu1 %v8334_v45  ;;  %3951 = vmatprep.mubr.f32.mxu0 %v8334_v45 }
 0x3cf   : > { %3304 = vmatmul.mubr.f32.gmra.mrb[220].mxu1 %v8309_v38  ;;  %3952 = vmatmul.mubr.f32.gmra.mrb[172].mxu0 %v8309_v38 }
 0x3d0   : > { %3308 = vmatprep.mubr.f32.mxu1 %v8344_v11  ;;  %3956 = vmatprep.mubr.f32.mxu0 %v8344_v11 }
 0x3d3   : > { %3309 = vmatmul.mubr.f32.gmra.mrb[222].mxu1 %v8319_v10  ;;  %3957 = vmatmul.mubr.f32.gmra.mrb[174].mxu0 %v8319_v10 }
 0x3d4   : > { %3314 = vmatprep.mubr.f32.mxu1 %v8088_v26  ;;  %3961 = vmatprep.mubr.f32.mxu0 %v8088_v26 }
 0x3d7   : > { %3315 = vmatmul.mubr.f32.gmra.mrb[224].mxu1 %v8051_v48  ;;  %3962 = vmatmul.mubr.f32.gmra.mrb[176].mxu0 %v8051_v48 }
 0x3d8   : > { %3320 = vmatprep.mubr.f32.mxu1 %v8361_v18  ;;  %3966 = vmatprep.mubr.f32.mxu0 %v8361_v18 }
 0x3db   : > { %3321 = vmatmul.mubr.f32.gmra.mrb[226].mxu1 %v8334_v45  ;;  %3967 = vmatmul.mubr.f32.gmra.mrb[178].mxu0 %v8334_v45 }
 0x3dc   : > { %3325 = vmatprep.mubr.f32.mxu1 %v8369_v56  ;;  %3971 = vmatprep.mubr.f32.mxu0 %v8369_v56 }
 0x3df   : > { %3326 = vmatmul.mubr.f32.gmra.mrb[228].mxu1 %v8344_v11  ;;  %3972 = vmatmul.mubr.f32.gmra.mrb[180].mxu0 %v8344_v11 }
 0x3e0   : > { %3331 = vmatprep.mubr.f32.mxu1 %v8042_v50  ;;  %3976 = vmatprep.mubr.f32.mxu0 %v8042_v50 }
 0x3e3   : > { %3332 = vmatmul.mubr.f32.gmra.mrb[230].mxu1 %v8088_v26  ;;  %3977 = vmatmul.mubr.f32.gmra.mrb[182].mxu0 %v8088_v26 }
 0x3e4   : > { %3337 = vmatprep.mubr.f32.mxu1 %v8384_v20  ;;  %3981 = vmatprep.mubr.f32.mxu0 %v8384_v20 }
 0x3e7   : > { %3338 = vmatmul.mubr.f32.gmra.mrb[232].mxu1 %v8361_v18  ;;  %3982 = vmatmul.mubr.f32.gmra.mrb[184].mxu0 %v8361_v18 }
 0x3e8   : > { %3342 = vmatprep.mubr.f32.mxu1 %v8394_v24  ;;  %3986 = vmatprep.mubr.f32.mxu0 %v8394_v24 }
 0x3eb   : > { %3343 = vmatmul.mubr.f32.gmra.mrb[234].mxu1 %v8369_v56  ;;  %3987 = vmatmul.mubr.f32.gmra.mrb[186].mxu0 %v8369_v56 }
 0x3ec   : > { %3348 = vmatprep.mubr.f32.mxu1 %v9461_v31  ;;  %3991 = vmatprep.mubr.f32.mxu0 %v9461_v31 }
 0x3ef   : > { %3349 = vmatmul.mubr.f32.gmra.mrb[236].mxu1 %v8042_v50  ;;  %3992 = vmatmul.mubr.f32.gmra.mrb[188].mxu0 %v8042_v50 }
 0x3f0   : > { %3354 = vmatprep.mubr.f32.mxu1 %v8409_v0  ;;  %3996 = vmatprep.mubr.f32.mxu0 %v8409_v0 }
 0x3f3   : > { %3355 = vmatmul.mubr.f32.gmra.mrb[238].mxu1 %v8384_v20  ;;  %3997 = vmatmul.mubr.f32.gmra.mrb[190].mxu0 %v8384_v20 }
 0x3f4   : > { %5363 = vmatprep.mubr.f32.mxu0 %v9463_v22  ;;  %3424 = vmatprep.mubr.f32.mxu1 %v9464_v40 }
 0x3f7   : > { %3425 = vmatmul.mubr.f32.vlgmr.msra.gmra.mrb[144].mxu1 %v9463_v22  ;;  %5364 = vmatmul.mubr.f32.vlgmr.msra.gmra.mrb[192].mxu0 %v9465_v30 }
 0x3f8   : > { %5366 = vmatprep.mubr.f32.mxu0 %v9466_v63  ;;  %3430 = vmatprep.mubr.f32.mxu1 %v9464_v40 }
 0x3fb   : > { %3431 = vmatmul.mubr.f32.gmra.mrb[146].mxu1 %v9465_v30  ;;  %5367 = vmatmul.mubr.f32.gmra.mrb[194].mxu0 %v9467_v57 }
 0x3fc   : > { %5369 = vmatprep.mubr.f32.mxu0 %v7729_v29  ;;  %3436 = vmatprep.mubr.f32.mxu1 %v9464_v40 }
 0x3ff   : > { %3437 = vmatmul.mubr.f32.gmra.mrb[148].mxu1 %v9466_v63  ;;  %5370 = vmatmul.mubr.f32.gmra.mrb[196].mxu0 %v8019_v49 }
 0x400   : > { %5372 = vmatprep.mubr.f32.mxu0 %v8046_v43  ;;  %3441 = vmatprep.mubr.f32.mxu1 %v9464_v40 }
 0x403   : > { %3442 = vmatmul.mubr.f32.gmra.mrb[150].mxu1 %v9467_v57  ;;  %5373 = vmatmul.mubr.f32.gmra.mrb[198].mxu0 %v7779_v9 }
 0x404   : > { %5375 = vmatprep.mubr.f32.mxu0 %v8109_v47  ;;  %3447 = vmatprep.mubr.f32.mxu1 %v9464_v40 }
 0x407   : > { %3448 = vmatmul.mubr.f32.gmra.mrb[152].mxu1 %v7729_v29  ;;  %5376 = vmatmul.mubr.f32.gmra.mrb[200].mxu0 %v8119_v33 }
 0x408   : > { %5378 = vmatprep.mubr.f32.mxu0 %v7792_v53  ;;  %3453 = vmatprep.mubr.f32.mxu1 %v9464_v40 }
 0x40a   : > { %v8437_v39 = vpop.f32.mrb[96].mxu0 }
 0x40b   : > { %3454 = vmatmul.mubr.f32.gmra.mrb[154].mxu1 %v8019_v49  ;;  %v3765_v36 = vpop.f32.mrb[97].mxu0  ;;  %5379 = vmatmul.mubr.f32.gmra.mrb[202].mxu0 %v8134_v37 }
 0x40c   : > { %5381 = vmatprep.mubr.f32.mxu0 %v8144_v54  ;;  %3458 = vmatprep.mubr.f32.mxu1 %v9464_v40 }
 0x40e   : > { %v8443_v52 = vpop.f32.mrb[98].mxu0 }
 0x40f   : > { %3459 = vmatmul.mubr.f32.gmra.mrb[156].mxu1 %v8046_v43  ;;  %v3770_v29 = vpop.f32.mrb[99].mxu0  ;;  %5382 = vmatmul.mubr.f32.gmra.mrb[204].mxu0 %v7834_v17 }
 0x410   : > { %5384 = vmatprep.mubr.f32.mxu0 %v8159_v41  ;;  %3464 = vmatprep.mubr.f32.mxu1 %v9464_v40 }
 0x412   : > { %v8449_v59 = vpop.f32.mrb[100].mxu0 }
 0x413   : > { %3465 = vmatmul.mubr.f32.gmra.mrb[158].mxu1 %v7779_v9  ;;  %v3775_v49 = vpop.f32.mrb[101].mxu0  ;;  %5385 = vmatmul.mubr.f32.gmra.mrb[206].mxu0 %v8169_v58 }
 0x414   : > { %5387 = vmatprep.mubr.f32.mxu0 %v7867_v5  ;;  %3470 = vmatprep.mubr.f32.mxu1 %v9464_v40 }
 0x416   : > { %v8455_v34 = vpop.f32.mrb[102].mxu0 }
 0x417   : > { %3471 = vmatmul.mubr.f32.gmra.mrb[160].mxu1 %v8109_v47  ;;  %v3780_v43 = vpop.f32.mrb[103].mxu0  ;;  %5388 = vmatmul.mubr.f32.gmra.mrb[208].mxu0 %v8184_v12 }
 0x418   : > { %5390 = vmatprep.mubr.f32.mxu0 %v8194_v60  ;;  %3475 = vmatprep.mubr.f32.mxu1 %v9464_v40 }
 0x41a   : > { %v8461_v14 = vpop.f32.mrb[104].mxu0 }
 0x41b   : > { %3476 = vmatmul.mubr.f32.gmra.mrb[162].mxu1 %v8119_v33  ;;  %v3785_v9 = vpop.f32.mrb[105].mxu0  ;;  %5391 = vmatmul.mubr.f32.gmra.mrb[210].mxu0 %v7877_v3 }
 0x41c   : > { %5393 = vmatprep.mubr.f32.mxu0 %v8209_v21  ;;  %3481 = vmatprep.mubr.f32.mxu1 %v9464_v40 }
 0x41e   : > { %v8467_v25 = vpop.f32.mrb[106].mxu0 }
 0x41f   : > { %3482 = vmatmul.mubr.f32.gmra.mrb[164].mxu1 %v7792_v53  ;;  %v3790_v47 = vpop.f32.mrb[107].mxu0  ;;  %5394 = vmatmul.mubr.f32.gmra.mrb[212].mxu0 %v8219_v15 }
 0x420   : > { %5396 = vmatprep.mubr.f32.mxu0 %v7933_v42  ;;  %3487 = vmatprep.mubr.f32.mxu1 %v9464_v40 }
 0x422   : > { %v8473_v44 = vpop.f32.mrb[108].mxu0 }
 0x423   : > { %3488 = vmatmul.mubr.f32.gmra.mrb[166].mxu1 %v8134_v37  ;;  %v3795_v33 = vpop.f32.mrb[109].mxu0  ;;  %5397 = vmatmul.mubr.f32.gmra.mrb[214].mxu0 %v8234_v51 }
 0x424   : > { %5399 = vmatprep.mubr.f32.mxu0 %v8244_v32  ;;  %3492 = vmatprep.mubr.f32.mxu1 %v9464_v40 }
 0x426   : > { %v8479_v16 = vpop.f32.mrb[110].mxu0 }
 0x427   : > { %3493 = vmatmul.mubr.f32.gmra.mrb[168].mxu1 %v8144_v54  ;;  %v3800_v53 = vpop.f32.mrb[111].mxu0  ;;  %5400 = vmatmul.mubr.f32.gmra.mrb[216].mxu0 %v9444_v19 }
 0x428   : > { %5402 = vmatprep.mubr.f32.mxu0 %v8259_v35  ;;  %3498 = vmatprep.mubr.f32.mxu1 %v9464_v40 }
 0x42a   : > { %v8485_v28 = vpop.f32.mrb[112].mxu0 }
 0x42b   : > { %3499 = vmatmul.mubr.f32.gmra.mrb[170].mxu1 %v7834_v17  ;;  %v3805_v37 = vpop.f32.mrb[113].mxu0  ;;  %5403 = vmatmul.mubr.f32.gmra.mrb[218].mxu0 %v8269_v4 }
 0x42c   : > { %5405 = vmatprep.mubr.f32.mxu0 %v7984_v62  ;;  %3504 = vmatprep.mubr.f32.mxu1 %v9464_v40 }
 0x42e   : > { %v8491_v55 = vpop.f32.mrb[114].mxu0 }
 0x42f   : > { %3505 = vmatmul.mubr.f32.gmra.mrb[172].mxu1 %v8159_v41  ;;  %v3810_v54 = vpop.f32.mrb[115].mxu0  ;;  %5406 = vmatmul.mubr.f32.gmra.mrb[220].mxu0 %v8284_v61 }
 0x430   : > { %5408 = vmatprep.mubr.f32.mxu0 %v8294_v46  ;;  %3509 = vmatprep.mubr.f32.mxu1 %v9464_v40 }
 0x432   : > { %v8497_v2 = vpop.f32.mrb[116].mxu0 }
 0x433   : > { %3510 = vmatmul.mubr.f32.gmra.mrb[174].mxu1 %v8169_v58  ;;  %v3815_v17 = vpop.f32.mrb[117].mxu0  ;;  %5409 = vmatmul.mubr.f32.gmra.mrb[222].mxu0 %v8024_v1 }
 0x434   : > { %5411 = vmatprep.mubr.f32.mxu0 %v8309_v38  ;;  %3515 = vmatprep.mubr.f32.mxu1 %v9464_v40 }
 0x436   : > { %v8503_v23 = vpop.f32.mrb[118].mxu0 }
 0x437   : > { %3516 = vmatmul.mubr.f32.gmra.mrb[176].mxu1 %v7867_v5  ;;  %v3820_v41 = vpop.f32.mrb[119].mxu0  ;;  %5412 = vmatmul.mubr.f32.gmra.mrb[224].mxu0 %v8319_v10 }
 0x438   : > { %5414 = vmatprep.mubr.f32.mxu0 %v8051_v48  ;;  %3521 = vmatprep.mubr.f32.mxu1 %v9464_v40 }
 0x43a   : > { %v8509_v7 = vpop.f32.mrb[120].mxu0 }
 0x43b   : > { %3522 = vmatmul.mubr.f32.gmra.mrb[178].mxu1 %v8184_v12  ;;  %v3825_v58 = vpop.f32.mrb[121].mxu0  ;;  %5415 = vmatmul.mubr.f32.gmra.mrb[226].mxu0 %v8334_v45 }
 0x43c   : > { %5417 = vmatprep.mubr.f32.mxu0 %v8344_v11  ;;  %3526 = vmatprep.mubr.f32.mxu1 %v9464_v40 }
 0x43e   : > { %v8515_v27 = vpop.f32.mrb[122].mxu0 }
 0x43f   : > { %3527 = vmatmul.mubr.f32.gmra.mrb[180].mxu1 %v8194_v60  ;;  %v3830_v5 = vpop.f32.mrb[123].mxu0  ;;  %5418 = vmatmul.mubr.f32.gmra.mrb[228].mxu0 %v8088_v26 }
 0x440   : > { %5420 = vmatprep.mubr.f32.mxu0 %v8361_v18  ;;  %3532 = vmatprep.mubr.f32.mxu1 %v9464_v40 }
 0x442   : > { %v8521_v8 = vpop.f32.mrb[124].mxu0 }
 0x443   : > { %3533 = vmatmul.mubr.f32.gmra.mrb[182].mxu1 %v7877_v3  ;;  %v3835_v12 = vpop.f32.mrb[125].mxu0  ;;  %5421 = vmatmul.mubr.f32.gmra.mrb[230].mxu0 %v8369_v56 }
 0x444   : > { %5423 = vmatprep.mubr.f32.mxu0 %v8042_v50  ;;  %3538 = vmatprep.mubr.f32.mxu1 %v9464_v40 }
 0x446   : > { %v8527_v13 = vpop.f32.mrb[126].mxu0 }
 0x447   : > { %3539 = vmatmul.mubr.f32.gmra.mrb[184].mxu1 %v8209_v21  ;;  %v3840_v60 = vpop.f32.mrb[127].mxu0  ;;  %5424 = vmatmul.mubr.f32.gmra.mrb[232].mxu0 %v8384_v20 }
 0x448   : > { %5426 = vmatprep.mubr.f32.mxu0 %v8394_v24  ;;  %3543 = vmatprep.mubr.f32.mxu1 %v9464_v40 }
 0x44a   : > { %v8533_v6 = vpop.f32.mrb[128].mxu0 }
 0x44b   : > { %3544 = vmatmul.mubr.f32.gmra.mrb[186].mxu1 %v8219_v15  ;;  %v3845_v3 = vpop.f32.mrb[129].mxu0  ;;  %5427 = vmatmul.mubr.f32.gmra.mrb[234].mxu0 %v9461_v31 }
 0x44c   : > { %5429 = vmatprep.mubr.f32.mxu0 %v8409_v0  ;;  %3549 = vmatprep.mubr.f32.mxu1 %v9464_v40 }
 0x44e   : > { %v8539_v22 = vpop.f32.mrb[130].mxu0 }
 0x44f   : > { %3550 = vmatmul.mubr.f32.gmra.mrb[188].mxu1 %v7933_v42  ;;  %v3850_v21 = vpop.f32.mrb[131].mxu0  ;;  %5430 = vmatmul.mubr.f32.gmra.mrb[236].mxu0 %v8369_v56 }
 0x450   : > { %5432 = vmatprep.mubr.f32.mxu0 %v8042_v50  ;;  %3555 = vmatprep.mubr.f32.mxu1 %v9464_v40 }
 0x452   : > { %v8545_v30 = vpop.f32.mrb[132].mxu0 }
 0x453   : > { %3556 = vmatmul.mubr.f32.gmra.mrb[190].mxu1 %v8234_v51  ;;  %v3855_v15 = vpop.f32.mrb[133].mxu0  ;;  %5433 = vmatmul.mubr.f32.gmra.mrb[238].mxu0 %v8384_v20 }
 0x454   : > { %3560 = vmatprep.mubr.f32.mxu1 %v9464_v40 }
 0x456   : > { %v8550_v63 = vpop.f32.mrb[134].mxu0 }
 0x457   : > { %3561 = vmatmul.mubr.f32.gmra.mrb[192].mxu1 %v8244_v32  ;;  %v3860_v42 = vpop.f32.mrb[135].mxu0 }
 0x458   : > { %3566 = vmatprep.mubr.f32.mxu1 %v9464_v40 }
 0x45a   : > { %v8554_v57 = vpop.f32.mrb[136].mxu0 }
 0x45b   : > { %3567 = vmatmul.mubr.f32.gmra.mrb[194].mxu1 %v9444_v19  ;;  %v3865_v36 = vpop.f32.mrb[137].mxu0 }
 0x45c   : > { %3572 = vmatprep.mubr.f32.mxu1 %v9464_v40 }
 0x45e   : > { %v8558_v51 = vpop.f32.mrb[138].mxu0 }
 0x45f   : > { %3573 = vmatmul.mubr.f32.gmra.mrb[196].mxu1 %v8259_v35  ;;  %v3870_v29 = vpop.f32.mrb[139].mxu0 }
 0x460   : > { %3577 = vmatprep.mubr.f32.mxu1 %v9464_v40 }
 0x462   : > { %v8562_v49 = vpop.f32.mrb[140].mxu0 }
 0x463   : > { %3578 = vmatmul.mubr.f32.gmra.mrb[198].mxu1 %v8269_v4  ;;  %v3875_v32 = vpop.f32.mrb[141].mxu0 }
 0x464   : > { %3583 = vmatprep.mubr.f32.mxu1 %v9464_v40 }
 0x466   : > { %v8566_v43 = vpop.f32.mrb[142].mxu0 }
 0x467   : > { %3584 = vmatmul.mubr.f32.gmra.mrb[200].mxu1 %v7984_v62  ;;  %v3880_v19 = vpop.f32.mrb[143].mxu0 }
 0x468   : > { %3589 = vmatprep.mubr.f32.mxu1 %v9464_v40 }
 0x46a   : > { %v8570_v9 = vpop.f32.mrb[144].mxu0 }
 0x46b   : > { %3590 = vmatmul.mubr.f32.gmra.mrb[202].mxu1 %v8284_v61  ;;  %v3885_v35 = vpop.f32.mrb[145].mxu0 }
 0x46c   : > { %3594 = vmatprep.mubr.f32.mxu1 %v9464_v40 }
 0x46e   : > { %v8574_v47 = vpop.f32.mrb[146].mxu0 }
 0x46f   : > { %3595 = vmatmul.mubr.f32.gmra.mrb[204].mxu1 %v8294_v46  ;;  %v3890_v4 = vpop.f32.mrb[147].mxu0 }
 0x470   : > { %3600 = vmatprep.mubr.f32.mxu1 %v9464_v40 }
 0x472   : > { %v8578_v33 = vpop.f32.mrb[148].mxu0 }
 0x473   : > { %3601 = vmatmul.mubr.f32.gmra.mrb[206].mxu1 %v8024_v1  ;;  %v3895_v62 = vpop.f32.mrb[149].mxu0 }
 0x474   : > { %3606 = vmatprep.mubr.f32.mxu1 %v9464_v40 }
 0x476   : > { %v8582_v53 = vpop.f32.mrb[150].mxu0 }
 0x477   : > { %3607 = vmatmul.mubr.f32.gmra.mrb[208].mxu1 %v8309_v38  ;;  %v3900_v61 = vpop.f32.mrb[151].mxu0 }
 0x478   : > { %3611 = vmatprep.mubr.f32.mxu1 %v9464_v40 }
 0x47a   : > { %v8586_v37 = vpop.f32.mrb[152].mxu0 }
 0x47b   : > { %3612 = vmatmul.mubr.f32.gmra.mrb[210].mxu1 %v8319_v10  ;;  %v3905_v46 = vpop.f32.mrb[153].mxu0 }
 0x47c   : > { %3617 = vmatprep.mubr.f32.mxu1 %v9464_v40 }
 0x47e   : > { %v8590_v54 = vpop.f32.mrb[154].mxu0 }
 0x47f   : > { %3618 = vmatmul.mubr.f32.gmra.mrb[212].mxu1 %v8051_v48  ;;  %v3910_v1 = vpop.f32.mrb[155].mxu0 }
 0x480   : > { %3623 = vmatprep.mubr.f32.mxu1 %v9464_v40 }
 0x482   : > { %v8594_v17 = vpop.f32.mrb[156].mxu0 }
 0x483   : > { %3624 = vmatmul.mubr.f32.gmra.mrb[214].mxu1 %v8334_v45  ;;  %v3915_v38 = vpop.f32.mrb[157].mxu0 }
 0x484   : > { %3628 = vmatprep.mubr.f32.mxu1 %v9464_v40 }
 0x486   : > { %v8598_v41 = vpop.f32.mrb[158].mxu0 }
 0x487   : > { %3629 = vmatmul.mubr.f32.gmra.mrb[216].mxu1 %v8344_v11  ;;  %v3920_v10 = vpop.f32.mrb[159].mxu0 }
 0x488   : > { %3634 = vmatprep.mubr.f32.mxu1 %v9464_v40 }
 0x48a   : > { %v8602_v58 = vpop.f32.mrb[160].mxu0 }
 0x48b   : > { %3635 = vmatmul.mubr.f32.gmra.mrb[218].mxu1 %v8088_v26  ;;  %v3925_v48 = vpop.f32.mrb[161].mxu0 }
 0x48c   : > { %3640 = vmatprep.mubr.f32.mxu1 %v9464_v40 }
 0x48e   : > { %v8606_v5 = vpop.f32.mrb[162].mxu0 }
 0x48f   : > { %3641 = vmatmul.mubr.f32.gmra.mrb[220].mxu1 %v8361_v18  ;;  %v3930_v45 = vpop.f32.mrb[163].mxu0 }
 0x490   : > { %3645 = vmatprep.mubr.f32.mxu1 %v9464_v40 }
 0x492   : > { %v8610_v12 = vpop.f32.mrb[164].mxu0 }
 0x493   : > { %3646 = vmatmul.mubr.f32.gmra.mrb[222].mxu1 %v8369_v56  ;;  %v3935_v11 = vpop.f32.mrb[165].mxu0 }
 0x494   : > { %3651 = vmatprep.mubr.f32.mxu1 %v9464_v40 }
 0x496   : > { %v8614_v60 = vpop.f32.mrb[166].mxu0 }
 0x497   : > { %3652 = vmatmul.mubr.f32.gmra.mrb[224].mxu1 %v8042_v50  ;;  %v3940_v26 = vpop.f32.mrb[167].mxu0 }
 0x498   : > { %3657 = vmatprep.mubr.f32.mxu1 %v9464_v40 }
 0x49a   : > { %v8618_v3 = vpop.f32.mrb[168].mxu0 }
 0x49b   : > { %3658 = vmatmul.mubr.f32.gmra.mrb[226].mxu1 %v8384_v20  ;;  %v3945_v18 = vpop.f32.mrb[169].mxu0 }
 0x49c   : > { %3662 = vmatprep.mubr.f32.mxu1 %v9464_v40 }
 0x49e   : > { %v8622_v21 = vpop.f32.mrb[170].mxu0 }
 0x49f   : > { %3663 = vmatmul.mubr.f32.gmra.mrb[228].mxu1 %v8394_v24  ;;  %v3950_v15 = vpop.f32.mrb[171].mxu0 }
 0x4a0   : > { %3668 = vmatprep.mubr.f32.mxu1 %v9464_v40 }
 0x4a2   : > { %v8626_v42 = vpop.f32.mrb[172].mxu0 }
 0x4a3   : > { %3669 = vmatmul.mubr.f32.gmra.mrb[230].mxu1 %v9461_v31  ;;  %v3955_v36 = vpop.f32.mrb[173].mxu0 }
 0x4a4   : > { %3674 = vmatprep.mubr.f32.mxu1 %v9464_v40 }
 0x4a6   : > { %v8630_v29 = vpop.f32.mrb[174].mxu0 }
 0x4a7   : > { %3675 = vmatmul.mubr.f32.gmra.mrb[232].mxu1 %v8409_v0  ;;  %v3960_v32 = vpop.f32.mrb[175].mxu0 }
 0x4a8   : > { %3679 = vmatprep.mubr.f32.mxu1 %v9464_v40 }
 0x4aa   : > { %v8634_v19 = vpop.f32.mrb[176].mxu0 }
 0x4ab   : > { %3680 = vmatmul.mubr.f32.gmra.mrb[234].mxu1 %v8369_v56  ;;  %v3965_v24 = vpop.f32.mrb[177].mxu0 }
 0x4ac   : > { %3685 = vmatprep.mubr.f32.mxu1 %v9464_v40 }
 0x4ae   : > { %v8638_v35 = vpop.f32.mrb[178].mxu0 }
 0x4af   : > { %3686 = vmatmul.mubr.f32.gmra.mrb[236].mxu1 %v8042_v50  ;;  %v3970_v31 = vpop.f32.mrb[179].mxu0 }
 0x4b0   : > { %3691 = vmatprep.mubr.f32.mxu1 %v9464_v40 }
 0x4b2   : > { %v8642_v4 = vpop.f32.mrb[180].mxu0 }
 0x4b3   : > { %3692 = vmatmul.mubr.f32.gmra.mrb[238].mxu1 %v8384_v20  ;;  %v3975_v0 = vpop.f32.mrb[181].mxu0 }
 0x4b6   : > { %v8645_v62 = vpop.f32.mrb[182].mxu0 }
 0x4b7   : > { %v3980_v61 = vpop.f32.mrb[183].mxu0 }
 0x4ba   : > { %v8647_v46 = vpop.f32.mrb[184].mxu0 }
 0x4bb   : > { %9468 = vst [vmem:[#allocation15_spill] sm:$0xff] %v8647_v46  ;;  %v3985_v56 = vpop.f32.mrb[185].mxu0 }
 0x4be   : > { %v8649_v1 = vpop.f32.mrb[186].mxu0 }
 0x4bf   : > { %9469 = vst [vmem:[#allocation19_spill] sm:$0xff] %v8649_v1  ;;  %v3990_v38 = vpop.f32.mrb[187].mxu0 }
 0x4c2   : > { %v8651_v10 = vpop.f32.mrb[188].mxu0 }
 0x4c3   : > { %9470 = vst [vmem:[#allocation17_spill] sm:$0xff] %v8651_v10  ;;  %v3995_v50 = vpop.f32.mrb[189].mxu0 }
 0x4c6   : > { %v8653_v48 = vpop.f32.mrb[190].mxu0 }
 0x4c7   : > { %9471 = vst [vmem:[#allocation18_spill] sm:$0xff] %v8653_v48  ;;  %v4000_v40 = vpop.f32.mrb[191].mxu0 }
 0x4ca   : > { %v3426_v45 = vpop.f32.mrb[144].mxu1  ;;  %v5365_v11 = vpop.f32.mrb[192].mxu0 }
 0x4cb   : > { %v4074_v20 = vadd.f32 %v5365_v11, %v8443_v52  ;;  %v3428_v26 = vpop.f32.mrb[145].mxu1  ;;  %v4068_v18 = vpop.f32.mrb[193].mxu0 }
 0x4cc   : > { %v4069_v15 = vadd.f32 %v4068_v18, %v8437_v39  ;;  %v4355_v38 = vrot.slane %v3428_v26, 1 }
 0x4cd   : > { %v4548_v36 = vrot.slane %v4074_v20, 2 }
 0x4ce   : > { %v4547_v32 = vrot.slane %v4069_v15, 2  ;;  %v3432_v24 = vpop.f32.mrb[146].mxu1  ;;  %v5368_v31 = vpop.f32.mrb[194].mxu0 }
 0x4cf   : > { %v4084_v0 = vadd.f32 %v5368_v31, %v8455_v34  ;;  %v3434_v61 = vpop.f32.mrb[147].mxu1  ;;  %v4078_v56 = vpop.f32.mrb[195].mxu0 }
 0x4d0   : > { %v4549_v50 = vsel %vm2230_vm1, %v4547_v32, %v4548_v36  ;;  %v4356_v40 = vrot.slane %v3434_v61, 1  ;;  %v4079_v10 = vadd.f32 %v4078_v56, %v8449_v59 }
 0x4d1   : > { %v4552_v61 = vrot.slane %v4084_v0, 2 }
 0x4d2   : > { %v4357_v52 = vsel %vm2037_vm2, %v4355_v38, %v4356_v40  ;;  %v4550_v11 = vrot.slane %v4079_v10, 2  ;;  %v3438_v48 = vpop.f32.mrb[148].mxu1  ;;  %v5371_v46 = vpop.f32.mrb[196].mxu0 }
 0x4d3   : > { %v4467_v39 = vadd.f32 %v4357_v52, %v3426_v45  ;;  %v4094_v20 = vadd.f32 %v5371_v46, %v8467_v25  ;;  %v3439_v18 = vpop.f32.mrb[149].mxu1  ;;  %v4088_v15 = vpop.f32.mrb[197].mxu0 }
 0x4d4   : > { %v4551_v34 = vsel %vm2230_vm1, %v4548_v36, %v4550_v11  ;;  %v4358_v31 = vrot.slane %v3439_v18, 1  ;;  %v4089_v26 = vadd.f32 %v4088_v15, %v8461_v14 }
 0x4d5   : > { %v8664_v1 = vadd.f32 %v4549_v50, %v4467_v39  ;;  %v4555_v32 = vrot.slane %v4094_v20, 2 }
 0x4d6   : > { %v4359_v59 = vsel %vm2037_vm2, %v4356_v40, %v4358_v31  ;;  %v4553_v56 = vrot.slane %v4089_v26, 2  ;;  %v3443_v10 = vpop.f32.mrb[150].mxu1  ;;  %v5374_v48 = vpop.f32.mrb[198].mxu0 }
 0x4d7   : > { %v4468_v38 = vadd.f32 %v4359_v59, %v3432_v24  ;;  %v4104_v45 = vadd.f32 %v5374_v48, %v8479_v16  ;;  %v3445_v25 = vpop.f32.mrb[151].mxu1  ;;  %v4098_v46 = vpop.f32.mrb[199].mxu0 }
 0x4d8   : > { %v4554_v52 = vsel %vm2230_vm1, %v4552_v61, %v4553_v56  ;;  %v4556_v36 = vsel %vm2230_vm1, %v4553_v56, %v4555_v32  ;;  %v4099_v14 = vadd.f32 %v4098_v46, %v8473_v44  ;;  %v4360_v15 = vrot.slane %v3445_v25, 1 }
 0x4d9   : > { %v8671_v50 = vadd.f32 %v4551_v34, %v4468_v38  ;;  %v4558_v11 = vrot.slane %v4104_v45, 2 }
 0x4da   : > { %v4557_v0 = vrot.slane %v4099_v14, 2  ;;  %v3449_v39 = vpop.f32.mrb[152].mxu1  ;;  %v5377_v40 = vpop.f32.mrb[200].mxu0 }
 0x4db   : > { %v4114_v20 = vadd.f32 %v5377_v40, %v8491_v55  ;;  %v3451_v18 = vpop.f32.mrb[153].mxu1  ;;  %v4108_v24 = vpop.f32.mrb[201].mxu0 }
 0x4dc   : > { %v4559_v16 = vsel %vm2230_vm1, %v4557_v0, %v4558_v11  ;;  %v4361_v31 = vrot.slane %v3451_v18, 1  ;;  %v4109_v26 = vadd.f32 %v4108_v24, %v8485_v28 }
 0x4dd   : > { %v4562_v0 = vrot.slane %v4114_v20, 2 }
 0x4de   : > { %v4362_v32 = vsel %vm2037_vm2, %v4360_v15, %v4361_v31  ;;  %v4560_v61 = vrot.slane %v4109_v26, 2  ;;  %v3455_v44 = vpop.f32.mrb[154].mxu1  ;;  %v5380_v34 = vpop.f32.mrb[202].mxu0 }
 0x4df   : > { %v4469_v59 = vadd.f32 %v4362_v32, %v3443_v10  ;;  %v4124_v56 = vadd.f32 %v5380_v34, %v8503_v23  ;;  %v3456_v48 = vpop.f32.mrb[155].mxu1  ;;  %v4118_v38 = vpop.f32.mrb[203].mxu0 }
 0x4e0   : > { %v4561_v55 = vsel %vm2230_vm1, %v4558_v11, %v4560_v61  ;;  %v4363_v45 = vrot.slane %v3456_v48, 1  ;;  %v4119_v25 = vadd.f32 %v4118_v38, %v8497_v2 }
 0x4e1   : > { %v8680_v46 = vadd.f32 %v4554_v52, %v4469_v59  ;;  %v4565_v14 = vrot.slane %v4124_v56, 2 }
 0x4e2   : > { %v4364_v28 = vsel %vm2037_vm2, %v4361_v31, %v4363_v45  ;;  %v4563_v40 = vrot.slane %v4119_v25, 2  ;;  %v3460_v18 = vpop.f32.mrb[156].mxu1  ;;  %v5383_v24 = vpop.f32.mrb[204].mxu0 }
 0x4e3   : > { %v4470_v15 = vadd.f32 %v4364_v28, %v3449_v39  ;;  %v4134_v10 = vadd.f32 %v5383_v24, %v8515_v27  ;;  %v3462_v23 = vpop.f32.mrb[157].mxu1  ;;  %v4128_v26 = vpop.f32.mrb[205].mxu0 }
 0x4e4   : > { %v8685_v32 = vsel %vm2230_vm1, %v4562_v0, %v4563_v40  ;;  %v8688_v11 = vsel %vm2230_vm1, %v4563_v40, %v4565_v14  ;;  %v4129_v2 = vadd.f32 %v4128_v26, %v8509_v7  ;;  %v4365_v59 = vrot.slane %v3462_v23, 1 }
 0x4e5   : > { %v8691_v52 = vadd.f32 %v4556_v36, %v4470_v15  ;;  %v4568_v20 = vrot.slane %v4134_v10, 2 }
 0x4e6   : > { %v4567_v31 = vrot.slane %v4129_v2, 2  ;;  %v3466_v61 = vpop.f32.mrb[158].mxu1  ;;  %v5386_v44 = vpop.f32.mrb[206].mxu0 }
 0x4e7   : > { %v4144_v39 = vadd.f32 %v5386_v44, %v8527_v13  ;;  %v3468_v34 = vpop.f32.mrb[159].mxu1  ;;  %v4138_v27 = vpop.f32.mrb[207].mxu0 }
 0x4e8   : > { %v8695_v56 = vsel %vm2230_vm1, %v4567_v31, %v4568_v20  ;;  %v4366_v48 = vrot.slane %v3468_v34, 1  ;;  %v4139_v38 = vadd.f32 %v4138_v27, %v8521_v8 }
 0x4e9   : > { %v4572_v8 = vrot.slane %v4144_v39, 2 }
 0x4ea   : > { %v4367_v45 = vsel %vm2037_vm2, %v4365_v59, %v4366_v48  ;;  %v4570_v7 = vrot.slane %v4139_v38, 2  ;;  %v3472_v36 = vpop.f32.mrb[160].mxu1  ;;  %v5389_v25 = vpop.f32.mrb[208].mxu0 }
 0x4eb   : > { %v4471_v14 = vadd.f32 %v4367_v45, %v3460_v18  ;;  %v4154_v0 = vadd.f32 %v5389_v25, %v8539_v22  ;;  %v3473_v28 = vpop.f32.mrb[161].mxu1  ;;  %v4148_v40 = vpop.f32.mrb[209].mxu0 }
 0x4ec   : > { %v8701_v13 = vsel %vm2230_vm1, %v4568_v20, %v4570_v7  ;;  %v4368_v24 = vrot.slane %v3473_v28, 1  ;;  %v4149_v15 = vadd.f32 %v4148_v40, %v8533_v6 }
 0x4ed   : > { %v8704_v10 = vadd.f32 %v4559_v16, %v4471_v14  ;;  %v4575_v23 = vrot.slane %v4154_v0, 2 }
 0x4ee   : > { %v4369_v26 = vsel %vm2037_vm2, %v4366_v48, %v4368_v24  ;;  %v4573_v2 = vrot.slane %v4149_v15, 2  ;;  %v3477_v31 = vpop.f32.mrb[162].mxu1  ;;  %v5392_v44 = vpop.f32.mrb[210].mxu0 }
 0x4ef   : > { %v4472_v18 = vadd.f32 %v4369_v26, %v3466_v61  ;;  %v4164_v22 = vadd.f32 %v5392_v44, %v8550_v63  ;;  %v3479_v34 = vpop.f32.mrb[163].mxu1  ;;  %v4158_v27 = vpop.f32.mrb[211].mxu0 }
 0x4f0   : > { %v8709_v20 = vsel %vm2230_vm1, %v4572_v8, %v4573_v2  ;;  %v8712_v59 = vsel %vm2230_vm1, %v4573_v2, %v4575_v23  ;;  %v4159_v6 = vadd.f32 %v4158_v27, %v8545_v30  ;;  %v4370_v36 = vrot.slane %v3479_v34, 1 }
 0x4f1   : > { %v8715_v16 = vadd.f32 %v4561_v55, %v4472_v18  ;;  %v4578_v39 = vrot.slane %v4164_v22, 2 }
 0x4f2   : > { %v4577_v48 = vrot.slane %v4159_v6, 2  ;;  %v3483_v38 = vpop.f32.mrb[164].mxu1  ;;  %v5395_v45 = vpop.f32.mrb[212].mxu0 }
 0x4f3   : > { %v4174_v61 = vadd.f32 %v5395_v45, %v8558_v51  ;;  %v3485_v7 = vpop.f32.mrb[165].mxu1  ;;  %v4168_v63 = vpop.f32.mrb[213].mxu0 }
 0x4f4   : > { %v8719_v25 = vsel %vm2230_vm1, %v4577_v48, %v4578_v39  ;;  %v4371_v14 = vrot.slane %v3485_v7, 1  ;;  %v4169_v0 = vadd.f32 %v4168_v63, %v8554_v57 }
 0x4f5   : > { %v4582_v18 = vrot.slane %v4174_v61, 2 }
 0x4f6   : > { %v4372_v28 = vsel %vm2037_vm2, %v4370_v36, %v4371_v14  ;;  %v4580_v30 = vrot.slane %v4169_v0, 2  ;;  %v3489_v55 = vpop.f32.mrb[166].mxu1  ;;  %v5398_v40 = vpop.f32.mrb[214].mxu0 }
 0x4f7   : > { %v4473_v24 = vadd.f32 %v4372_v28, %v3477_v31  ;;  %v4184_v15 = vadd.f32 %v5398_v40, %v8566_v43  ;;  %v3490_v23 = vpop.f32.mrb[167].mxu1  ;;  %v4178_v8 = vpop.f32.mrb[215].mxu0 }
 0x4f8   : > { %v8725_v51 = vsel %vm2230_vm1, %v4578_v39, %v4580_v30  ;;  %v4373_v26 = vrot.slane %v3490_v23, 1  ;;  %v4179_v2 = vadd.f32 %v4178_v8, %v8562_v49 }
 0x4f9   : > { %v8729_v44 = vadd.f32 %v8685_v32, %v4473_v24  ;;  %v4585_v57 = vrot.slane %v4184_v15, 2 }
 0x4fa   : > { %v4374_v22 = vsel %vm2037_vm2, %v4371_v14, %v4373_v26  ;;  %v4583_v34 = vrot.slane %v4179_v2, 2  ;;  %v3494_v27 = vpop.f32.mrb[168].mxu1  ;;  %v5401_v31 = vpop.f32.mrb[216].mxu0 }
 0x4fb   : > { %v4474_v6 = vadd.f32 %v4374_v22, %v3483_v38  ;;  %v4194_v43 = vadd.f32 %v5401_v31, %v8574_v47  ;;  %v3496_v48 = vpop.f32.mrb[169].mxu1  ;;  %v4188_v45 = vpop.f32.mrb[217].mxu0 }
 0x4fc   : > { %v8734_v39 = vsel %vm2230_vm1, %v4582_v18, %v4583_v34  ;;  %v8737_v49 = vsel %vm2230_vm1, %v4583_v34, %v4585_v57  ;;  %v4189_v32 = vadd.f32 %v4188_v45, %v8570_v9  ;;  %v4375_v28 = vrot.slane %v3496_v48, 1 }
 0x4fd   : > { %v8741_v61 = vadd.f32 %v8688_v11, %v4474_v6  ;;  %v4588_v7 = vrot.slane %v4194_v43, 2 }
 0x4fe   : > { %v4587_v63 = vrot.slane %v4189_v32, 2  ;;  %v3500_v36 = vpop.f32.mrb[170].mxu1  ;;  %v5404_v14 = vpop.f32.mrb[218].mxu0 }
 0x4ff   : > { %v4204_v38 = vadd.f32 %v5404_v14, %v8582_v53  ;;  %v3502_v47 = vpop.f32.mrb[171].mxu1  ;;  %v4198_v0 = vpop.f32.mrb[219].mxu0 }
 0x500   : > { %v8745_v30 = vsel %vm2230_vm1, %v4587_v63, %v4588_v7  ;;  %v4376_v55 = vrot.slane %v3502_v47, 1  ;;  %v4199_v40 = vadd.f32 %v4198_v0, %v8578_v33 }
 0x501   : > { %v4592_v34 = vrot.slane %v4204_v38, 2 }
 0x502   : > { %v4377_v9 = vsel %vm2037_vm2, %v4375_v28, %v4376_v55  ;;  %v4590_v24 = vrot.slane %v4199_v40, 2  ;;  %v3506_v11 = vpop.f32.mrb[172].mxu1  ;;  %v5407_v15 = vpop.f32.mrb[220].mxu0 }
 0x503   : > { %v4475_v23 = vadd.f32 %v4377_v9, %v3494_v27  ;;  %v4214_v8 = vadd.f32 %v5407_v15, %v8590_v54  ;;  %v3507_v26 = vpop.f32.mrb[173].mxu1  ;;  %v4208_v2 = vpop.f32.mrb[221].mxu0 }
 0x504   : > { %v8751_v53 = vsel %vm2230_vm1, %v4588_v7, %v4590_v24  ;;  %v4378_v57 = vrot.slane %v3507_v26, 1  ;;  %v4209_v18 = vadd.f32 %v4208_v2, %v8586_v37 }
 0x505   : > { %v8755_v22 = vadd.f32 %v8695_v56, %v4475_v23  ;;  %v4595_v33 = vrot.slane %v4214_v8, 2 }
 0x506   : > { %v4379_v31 = vsel %vm2037_vm2, %v4376_v55, %v4378_v57  ;;  %v4593_v6 = vrot.slane %v4209_v18, 2  ;;  %v3511_v43 = vpop.f32.mrb[174].mxu1  ;;  %v5410_v27 = vpop.f32.mrb[222].mxu0 }
 0x507   : > { %v4476_v48 = vadd.f32 %v4379_v31, %v3500_v36  ;;  %v4224_v54 = vadd.f32 %v5410_v27, %v8598_v41  ;;  %v3513_v45 = vpop.f32.mrb[175].mxu1  ;;  %v4218_v32 = vpop.f32.mrb[223].mxu0 }
 0x508   : > { %v8760_v7 = vsel %vm2230_vm1, %v4592_v34, %v4593_v6  ;;  %v8763_v37 = vsel %vm2230_vm1, %v4593_v6, %v4595_v33  ;;  %v4219_v56 = vadd.f32 %v4218_v32, %v8594_v17  ;;  %v4380_v55 = vrot.slane %v3513_v45, 1 }
 0x509   : > { %v8767_v63 = vadd.f32 %v8701_v13, %v4476_v48  ;;  %v4598_v14 = vrot.slane %v4224_v54, 2 }
 0x50a   : > { %v4597_v38 = vrot.slane %v4219_v56, 2  ;;  %v3517_v47 = vpop.f32.mrb[176].mxu1  ;;  %v5413_v0 = vpop.f32.mrb[224].mxu0 }
 0x50b   : > { %v4234_v36 = vadd.f32 %v5413_v0, %v8606_v5  ;;  %v3519_v41 = vpop.f32.mrb[177].mxu1  ;;  %v4228_v28 = vpop.f32.mrb[225].mxu0 }
 0x50c   : > { %v8771_v40 = vsel %vm2230_vm1, %v4597_v38, %v4598_v14  ;;  %v4381_v9 = vrot.slane %v3519_v41, 1  ;;  %v4229_v24 = vadd.f32 %v4228_v28, %v8602_v58 }
 0x50d   : > { %v4602_v34 = vrot.slane %v4234_v36, 2 }
 0x50e   : > { %v4382_v17 = vsel %vm2037_vm2, %v4380_v55, %v4381_v9  ;;  %v4600_v11 = vrot.slane %v4229_v24, 2  ;;  %v3523_v13 = vpop.f32.mrb[178].mxu1  ;;  %v5416_v15 = vpop.f32.mrb[226].mxu0 }
 0x50f   : > { %v4477_v23 = vadd.f32 %v4382_v17, %v3511_v43  ;;  %v4244_v8 = vadd.f32 %v5416_v15, %v8614_v60  ;;  %v3524_v26 = vpop.f32.mrb[179].mxu1  ;;  %v4238_v2 = vpop.f32.mrb[227].mxu0 }
 0x510   : > { %v8777_v5 = vsel %vm2230_vm1, %v4598_v14, %v4600_v11  ;;  %v4383_v57 = vrot.slane %v3524_v26, 1  ;;  %v4239_v18 = vadd.f32 %v4238_v2, %v8610_v12 }
 0x511   : > { %v8781_v33 = vadd.f32 %v8709_v20, %v4477_v23  ;;  %v4605_v58 = vrot.slane %v4244_v8, 2 }
 0x512   : > { %v4384_v31 = vsel %vm2037_vm2, %v4381_v9, %v4383_v57  ;;  %v4603_v6 = vrot.slane %v4239_v18, 2  ;;  %v3528_v27 = vpop.f32.mrb[180].mxu1  ;;  %v5419_v43 = vpop.f32.mrb[228].mxu0 }
 0x513   : > { %v4478_v48 = vadd.f32 %v4384_v31, %v3517_v47  ;;  %v4254_v60 = vadd.f32 %v5419_v43, %v8622_v21  ;;  %v3530_v54 = vpop.f32.mrb[181].mxu1  ;;  %v4248_v45 = vpop.f32.mrb[229].mxu0 }
 0x514   : > { %v8786_v32 = vsel %vm2230_vm1, %v4602_v34, %v4603_v6  ;;  %v8789_v12 = vsel %vm2230_vm1, %v4603_v6, %v4605_v58  ;;  %v4249_v20 = vadd.f32 %v4248_v45, %v8618_v3  ;;  %v4385_v28 = vrot.slane %v3530_v54, 1 }
 0x515   : > { %v8793_v56 = vadd.f32 %v8712_v59, %v4478_v48  ;;  %v4608_v14 = vrot.slane %v4254_v60, 2 }
 0x516   : > { %v4607_v38 = vrot.slane %v4249_v20, 2  ;;  %v3534_v0 = vpop.f32.mrb[182].mxu1  ;;  %v5422_v36 = vpop.f32.mrb[230].mxu0 }
 0x517   : > { %v4264_v47 = vadd.f32 %v5422_v36, %v8630_v29  ;;  %v3536_v21 = vpop.f32.mrb[183].mxu1  ;;  %v4258_v41 = vpop.f32.mrb[231].mxu0 }
 0x518   : > { %v8797_v55 = vsel %vm2230_vm1, %v4607_v38, %v4608_v14  ;;  %v4386_v9 = vrot.slane %v3536_v21, 1  ;;  %v4259_v24 = vadd.f32 %v4258_v41, %v8626_v42 }
 0x519   : > { %v4612_v18 = vrot.slane %v4264_v47, 2 }
 0x51a   : > { %v4387_v3 = vsel %vm2037_vm2, %v4385_v28, %v4386_v9  ;;  %v4610_v17 = vrot.slane %v4259_v24, 2  ;;  %v3540_v59 = vpop.f32.mrb[184].mxu1  ;;  %v5425_v11 = vpop.f32.mrb[232].mxu0 }
 0x51b   : > { %v4479_v13 = vadd.f32 %v4387_v3, %v3528_v27  ;;  %v4274_v15 = vadd.f32 %v5425_v11, %v8638_v35  ;;  %v3541_v23 = vpop.f32.mrb[185].mxu1  ;;  %v4268_v8 = vpop.f32.mrb[233].mxu0  ;;  %v9474_v11 = vld [vmem:[#allocation18_spill] sm:$0xff] }
 0x51c   : > { %v8803_v29 = vsel %vm2230_vm1, %v4608_v14, %v4610_v17  ;;  %v4388_v26 = vrot.slane %v3541_v23, 1  ;;  %v4269_v2 = vadd.f32 %v4268_v8, %v8634_v19 }
 0x51d   : > { %v8807_v57 = vadd.f32 %v8719_v25, %v4479_v13  ;;  %v4615_v42 = vrot.slane %v4274_v15, 2 }
 0x51e   : > { %v4389_v58 = vsel %vm2037_vm2, %v4386_v9, %v4388_v26  ;;  %v4613_v34 = vrot.slane %v4269_v2, 2  ;;  %v3545_v31 = vpop.f32.mrb[186].mxu1  ;;  %v5428_v6 = vpop.f32.mrb[234].mxu0  ;;  %v9473_v9 = vld [vmem:[#allocation15_spill] sm:$0xff]  ;;  %v9475_v2 = vld [vmem:[#allocation17_spill] sm:$0xff] }
 0x51f   : > { %v4480_v27 = vadd.f32 %v4389_v58, %v3534_v0  ;;  %v4284_v35 = vadd.f32 %v5428_v6, %v8645_v62  ;;  %v3547_v43 = vpop.f32.mrb[187].mxu1  ;;  %v4278_v48 = vpop.f32.mrb[235].mxu0  ;;  %v9472_v0 = vld [vmem:[#allocation19_spill] sm:$0xff] }
 0x520   : > { %v8812_v60 = vsel %vm2230_vm1, %v4612_v18, %v4613_v34  ;;  %v8815_v19 = vsel %vm2230_vm1, %v4613_v34, %v4615_v42  ;;  %v4279_v25 = vadd.f32 %v4278_v48, %v8642_v4  ;;  %v4390_v21 = vrot.slane %v3547_v43, 1  ;;  %v8838_v34 = vld [vmem:[%s9318_s4] ss:$0 sm:$0xff] }
 0x521   : > { %v8819_v54 = vadd.f32 %v8725_v51, %v4480_v27  ;;  %v4618_v45 = vrot.slane %v4284_v35, 2  ;;  %v8843_v43 = vadd.f32 %v8838_v34, %v8671_v50 }
 0x522   : > { %v4617_v20 = vrot.slane %v4279_v25, 2  ;;  %v3551_v14 = vpop.f32.mrb[188].mxu1  ;;  %v5431_v38 = vpop.f32.mrb[236].mxu0 }
 0x523   : > { %v4294_v36 = vadd.f32 %v5431_v38, %v9472_v0  ;;  %v3553_v62 = vpop.f32.mrb[189].mxu1  ;;  %v4288_v47 = vpop.f32.mrb[237].mxu0  ;;  %v8857_v38 = vadd.f32 %v8838_v34, %v8680_v46 }
 0x524   : > { %v8823_v41 = vsel %vm2230_vm1, %v4617_v20, %v4618_v45  ;;  %v4391_v28 = vrot.slane %v3553_v62, 1  ;;  %v4289_v24 = vadd.f32 %v4288_v47, %v9473_v9  ;;  %v8853_v20 = vadd.f32 %v8838_v34, %v8664_v1 }
 0x525   : > { %v4769_v46 = vmul.f32 %v8857_v38, %v8857_v38 }
 0x526   : > { %v4392_v4 = vsel %vm2037_vm2, %v4390_v21, %v4391_v28  ;;  %v4620_v3 = vrot.slane %v4289_v24, 2  ;;  %v3557_v51 = vpop.f32.mrb[190].mxu1  ;;  %v5434_v17 = vpop.f32.mrb[238].mxu0  ;;  %v4767_v1 = vmul.f32 %v8853_v20, %v8853_v20 }
 0x527   : > { %v4481_v59 = vadd.f32 %v4392_v4, %v3545_v31  ;;  %v4304_v13 = vadd.f32 %v5434_v17, %v9474_v11  ;;  %v3558_v15 = vpop.f32.mrb[191].mxu1  ;;  %v4298_v23 = vpop.f32.mrb[239].mxu0  ;;  %v4622_v31 = vrot.slane %v4294_v36, 2  ;;  %v8866_v36 = vadd.f32 %v8838_v34, %v8691_v52 }
 0x528   : > { %v8829_v8 = vsel %vm2230_vm1, %v4618_v45, %v4620_v3  ;;  %v4393_v26 = vrot.slane %v3558_v15, 1  ;;  %v4299_v42 = vadd.f32 %v4298_v23, %v9475_v2  ;;  %v8883_v3 = vadd.f32 %v8838_v34, %v8715_v16 }
 0x529   : > { %v8833_v18 = vadd.f32 %v8734_v39, %v4481_v59  ;;  %v4625_v58 = vrot.slane %v4304_v13, 2  ;;  %v4770_v4 = vmul.f32 %v8866_v36, %v8866_v36  ;;  %v8890_v15 = vadd.f32 %v8838_v34, %v8729_v44 }
 0x52a   : > { %v4394_v6 = vsel %vm2037_vm2, %v4391_v28, %v4393_v26  ;;  %v4623_v27 = vrot.slane %v4299_v42, 2  ;;  %v3562_v35 = vpop.f32.mrb[192].mxu1  ;;  %v4730_v28 = vadd.f32 %v8843_v43, %v8853_v20 }
 0x52b   : > { %v4482_v48 = vadd.f32 %v4394_v6, %v3551_v14  ;;  %v3564_v25 = vpop.f32.mrb[193].mxu1  ;;  %v4768_v14 = vmul.f32 %v8843_v43, %v8843_v43 }
 0x52c   : > { %v8846_v39 = vsel %vm2230_vm1, %v4622_v31, %v4623_v27  ;;  %v8849_v45 = vsel %vm2230_vm1, %v4623_v27, %v4625_v58  ;;  %v4395_v47 = vrot.slane %v3564_v25, 1  ;;  %v4731_v59 = vadd.f32 %v4730_v28, %v8857_v38 }
 0x52d   : > { %v8860_v0 = vadd.f32 %v8737_v49, %v4482_v48  ;;  %v8874_v49 = vadd.f32 %v8838_v34, %v8704_v10  ;;  %v4799_v24 = vadd.f32 %v4768_v14, %v4767_v1  ;;  %v4772_v58 = vmul.f32 %v8883_v3, %v8883_v3 }
 0x52e   : > { %v3568_v50 = vpop.f32.mrb[194].mxu1  ;;  %v4732_v26 = vadd.f32 %v4731_v59, %v8866_v36  ;;  %v8901_v31 = vadd.f32 %v8838_v34, %v8741_v61  ;;  %v8908_v48 = vadd.f32 %v8838_v34, %v8755_v22 }
 0x52f   : > { %v3570_v62 = vpop.f32.mrb[195].mxu1  ;;  %v4800_v11 = vadd.f32 %v4799_v24, %v4769_v46  ;;  %v4771_v13 = vmul.f32 %v8874_v49, %v8874_v49 }
 0x530   : > { %v4396_v21 = vrot.slane %v3570_v62, 1  ;;  %v4733_v44 = vadd.f32 %v4732_v26, %v8874_v49  ;;  %v4774_v61 = vmul.f32 %v8901_v31, %v8901_v31 }
 0x531   : > { %v4801_v42 = vadd.f32 %v4800_v11, %v4770_v4 }
 0x532   : > { %v4397_v9 = vsel %vm2037_vm2, %v4395_v47, %v4396_v21  ;;  %v3574_v52 = vpop.f32.mrb[196].mxu1  ;;  %v4734_v14 = vadd.f32 %v4733_v44, %v8883_v3 }
 0x533   : > { %v4483_v51 = vadd.f32 %v4397_v9, %v3562_v35  ;;  %v3575_v17 = vpop.f32.mrb[197].mxu1  ;;  %v4802_v35 = vadd.f32 %v4801_v42, %v4771_v13  ;;  %v8923_v9 = vadd.f32 %v8838_v34, %v8781_v33  ;;  %v8939_v42 = vadd.f32 %v8838_v34, %v8807_v57 }
 0x534   : > { %v4398_v10 = vrot.slane %v3575_v17, 1  ;;  %v4735_v1 = vadd.f32 %v4734_v14, %v8890_v15  ;;  %v8931_v17 = vadd.f32 %v8838_v34, %v8793_v56 }
 0x535   : > { %v8893_v23 = vadd.f32 %v8745_v30, %v4483_v51  ;;  %v4773_v30 = vmul.f32 %v8890_v15, %v8890_v15  ;;  %v4803_v47 = vadd.f32 %v4802_v35, %v4772_v58  ;;  %v4777_v26 = vmul.f32 %v8923_v9, %v8923_v9 }
 0x536   : > { %v4399_v16 = vsel %vm2037_vm2, %v4396_v21, %v4398_v10  ;;  %v3579_v2 = vpop.f32.mrb[198].mxu1  ;;  %v4736_v52 = vadd.f32 %v4735_v1, %v8901_v31 }
 0x537   : > { %v4484_v6 = vadd.f32 %v4399_v16, %v3568_v50  ;;  %v3581_v27 = vpop.f32.mrb[199].mxu1  ;;  %v8916_v50 = vadd.f32 %v8838_v34, %v8767_v63  ;;  %v4804_v22 = vadd.f32 %v4803_v47, %v4773_v30  ;;  %v8947_v30 = vadd.f32 %v8838_v34, %v8819_v54 }
 0x538   : > { %v4400_v46 = vrot.slane %v3581_v27, 1  ;;  %v4737_v13 = vadd.f32 %v4736_v52, %v8908_v48  ;;  %v4778_v27 = vmul.f32 %v8931_v17, %v8931_v17  ;;  %v4779_v47 = vmul.f32 %v8939_v42, %v8939_v42 }
 0x539   : > { %v4676_v25 = vadd.f32 %v8751_v53, %v4484_v6  ;;  %v4775_v53 = vmul.f32 %v8908_v48, %v8908_v48  ;;  %v4805_v63 = vadd.f32 %v4804_v22, %v4774_v61  ;;  %v4776_v51 = vmul.f32 %v8916_v50, %v8916_v50 }
 0x53a   : > { %v3585_v62 = vpop.f32.mrb[200].mxu1  ;;  %v4738_v56 = vadd.f32 %v4737_v13, %v8916_v50  ;;  %v8955_v61 = vadd.f32 %v8838_v34, %v8833_v18  ;;  %v4780_v54 = vmul.f32 %v8947_v30, %v8947_v30 }
 0x53b   : > { %v3587_v21 = vpop.f32.mrb[201].mxu1  ;;  %v4806_v33 = vadd.f32 %v4805_v63, %v4775_v53 }
 0x53c   : > { %v4401_v28 = vrot.slane %v3587_v21, 1  ;;  %v4781_v18 = vmul.f32 %v8955_v61, %v8955_v61 }
 0x53e   : > { %v4402_v24 = vsel %vm2037_vm2, %v4400_v46, %v4401_v28  ;;  %v3591_v4 = vpop.f32.mrb[202].mxu1 }
 0x53f   : > { %v4485_v59 = vadd.f32 %v4402_v24, %v3579_v2  ;;  %v3592_v10 = vpop.f32.mrb[203].mxu1  ;;  %v4807_v2 = vadd.f32 %v4806_v33, %v4776_v51  ;;  %v8971_v51 = vadd.f32 %v8838_v34, %v8893_v23 }
 0x540   : > { %v4403_v11 = vrot.slane %v3592_v10, 1 }
 0x541   : > { %v4677_v16 = vadd.f32 %v8760_v7, %v4485_v59  ;;  %v4739_v7 = vadd.f32 %v4738_v56, %v8923_v9  ;;  %v4808_v14 = vadd.f32 %v4807_v2, %v4777_v26  ;;  %v8977_v26 = vadd.f32 %v8838_v34, %v4676_v25 }
 0x542   : > { %v4404_v58 = vsel %vm2037_vm2, %v4401_v28, %v4403_v11  ;;  %v3596_v6 = vpop.f32.mrb[204].mxu1  ;;  %v8962_v28 = vadd.f32 %v8838_v34, %v8860_v0 }
 0x543   : > { %v4486_v44 = vadd.f32 %v4404_v58, %v3585_v62  ;;  %v3598_v35 = vpop.f32.mrb[205].mxu1  ;;  %v4740_v62 = vadd.f32 %v4739_v7, %v8931_v17  ;;  %v4809_v1 = vadd.f32 %v4808_v14, %v4778_v27 }
 0x544   : > { %v4782_v11 = vmul.f32 %v8962_v28, %v8962_v28 }
 0x545   : > { %v4678_v57 = vadd.f32 %v8763_v37, %v4486_v44  ;;  %v4405_v37 = vrot.slane %v3598_v35, 1  ;;  %v4741_v53 = vadd.f32 %v4740_v62, %v8939_v42  ;;  %v4810_v52 = vadd.f32 %v4809_v1, %v4779_v47 }
 0x546   : > { %v3602_v21 = vpop.f32.mrb[206].mxu1  ;;  %v8985_v44 = vadd.f32 %v8838_v34, %v4677_v16 }
 0x547   : > { %v3604_v46 = vpop.f32.mrb[207].mxu1  ;;  %v4742_v63 = vadd.f32 %v4741_v53, %v8947_v30  ;;  %v4811_v10 = vadd.f32 %v4810_v52, %v4780_v54  ;;  %v8991_v47 = vadd.f32 %v8838_v34, %v4678_v57 }
 0x548   : > { %v4406_v22 = vrot.slane %v3604_v46, 1  ;;  %v4785_v16 = vmul.f32 %v8985_v44, %v8985_v44 }
 0x549   : > { %v4743_v33 = vadd.f32 %v4742_v63, %v8955_v61  ;;  %v4812_v56 = vadd.f32 %v4811_v10, %v4781_v18  ;;  %v4786_v57 = vmul.f32 %v8991_v47, %v8991_v47 }
 0x54a   : > { %v4407_v24 = vsel %vm2037_vm2, %v4405_v37, %v4406_v22  ;;  %v3608_v4 = vpop.f32.mrb[208].mxu1 }
 0x54b   : > { %v4487_v59 = vadd.f32 %v4407_v24, %v3596_v6  ;;  %v3609_v0 = vpop.f32.mrb[209].mxu1  ;;  %v4744_v23 = vadd.f32 %v4743_v33, %v8962_v28  ;;  %v4783_v6 = vmul.f32 %v8971_v51, %v8971_v51  ;;  %v4813_v14 = vadd.f32 %v4812_v56, %v4782_v11 }
 0x54c   : > { %v4408_v13 = vrot.slane %v3609_v0, 1 }
 0x54d   : > { %v4679_v58 = vadd.f32 %v8771_v40, %v4487_v59  ;;  %v4745_v25 = vadd.f32 %v4744_v23, %v8971_v51  ;;  %v4784_v40 = vmul.f32 %v8977_v26, %v8977_v26  ;;  %v4814_v46 = vadd.f32 %v4813_v14, %v4783_v6 }
 0x54e   : > { %v4409_v2 = vsel %vm2037_vm2, %v4406_v22, %v4408_v13  ;;  %v3613_v27 = vpop.f32.mrb[210].mxu1 }
 0x54f   : > { %v4488_v35 = vadd.f32 %v4409_v2, %v3602_v21  ;;  %v3615_v7 = vpop.f32.mrb[211].mxu1  ;;  %v4746_v54 = vadd.f32 %v4745_v25, %v8977_v26  ;;  %v8998_v21 = vadd.f32 %v8838_v34, %v4679_v58  ;;  %v4815_v52 = vadd.f32 %v4814_v46, %v4784_v40 }
 0x550   : > { %v4410_v22 = vrot.slane %v3615_v7, 1 }
 0x551   : > { %v4680_v62 = vadd.f32 %v8777_v5, %v4488_v35  ;;  %v4747_v18 = vadd.f32 %v4746_v54, %v8985_v44  ;;  %v4816_v63 = vadd.f32 %v4815_v52, %v4785_v16  ;;  %v4787_v0 = vmul.f32 %v8998_v21, %v8998_v21 }
 0x552   : > { %v3619_v1 = vpop.f32.mrb[212].mxu1 }
 0x553   : > { %v3621_v37 = vpop.f32.mrb[213].mxu1  ;;  %v9004_v5 = vadd.f32 %v8838_v34, %v4680_v62  ;;  %v4748_v59 = vadd.f32 %v4747_v18, %v8991_v47  ;;  %v4817_v33 = vadd.f32 %v4816_v63, %v4786_v57 }
 0x554   : > { %v4411_v53 = vrot.slane %v3621_v37, 1 }
 0x555   : > { %v4749_v58 = vadd.f32 %v4748_v59, %v8998_v21  ;;  %v4788_v56 = vmul.f32 %v9004_v5, %v9004_v5  ;;  %v4818_v35 = vadd.f32 %v4817_v33, %v4787_v0 }
 0x556   : > { %v4412_v24 = vsel %vm2037_vm2, %v4410_v22, %v4411_v53  ;;  %v3625_v4 = vpop.f32.mrb[214].mxu1 }
 0x557   : > { %v4489_v10 = vadd.f32 %v4412_v24, %v3613_v27  ;;  %v3626_v11 = vpop.f32.mrb[215].mxu1  ;;  %v4750_v7 = vadd.f32 %v4749_v58, %v9004_v5  ;;  %v4819_v40 = vadd.f32 %v4818_v35, %v4788_v56 }
 0x558   : > { %v4413_v13 = vrot.slane %v3626_v11, 1 }
 0x559   : > { %v4681_v2 = vadd.f32 %v8786_v32, %v4489_v10 }
 0x55a   : > { %v4414_v23 = vsel %vm2037_vm2, %v4411_v53, %v4413_v13  ;;  %v3630_v6 = vpop.f32.mrb[216].mxu1 }
 0x55b   : > { %v9017_v14 = vadd.f32 %v8838_v34, %v4681_v2  ;;  %v4490_v27 = vadd.f32 %v4414_v23, %v3619_v1  ;;  %v3632_v25 = vpop.f32.mrb[217].mxu1 }
 0x55c   : > { %v4415_v53 = vrot.slane %v3632_v25, 1 }
 0x55d   : > { %v4751_v62 = vadd.f32 %v4750_v7, %v9017_v14  ;;  %v4789_v46 = vmul.f32 %v9017_v14, %v9017_v14  ;;  %v4682_v54 = vadd.f32 %v8789_v12, %v4490_v27 }
 0x55e   : > { %v3636_v32 = vpop.f32.mrb[218].mxu1 }
 0x55f   : > { %v4820_v16 = vadd.f32 %v4819_v40, %v4789_v46  ;;  %v9024_v37 = vadd.f32 %v8838_v34, %v4682_v54  ;;  %v3638_v22 = vpop.f32.mrb[219].mxu1 }
 0x560   : > { %v4416_v52 = vrot.slane %v3638_v22, 1 }
 0x561   : > { %v4752_v18 = vadd.f32 %v4751_v62, %v9024_v37  ;;  %v4790_v1 = vmul.f32 %v9024_v37, %v9024_v37 }
 0x562   : > { %v4417_v57 = vsel %vm2037_vm2, %v4415_v53, %v4416_v52  ;;  %v3642_v24 = vpop.f32.mrb[220].mxu1 }
 0x563   : > { %v4821_v4 = vadd.f32 %v4820_v16, %v4790_v1  ;;  %v4491_v63 = vadd.f32 %v4417_v57, %v3630_v6  ;;  %v3643_v59 = vpop.f32.mrb[221].mxu1 }
 0x564   : > { %v4418_v12 = vrot.slane %v3643_v59, 1 }
 0x565   : > { %v4683_v0 = vadd.f32 %v8797_v55, %v4491_v63 }
 0x566   : > { %v4419_v10 = vsel %vm2037_vm2, %v4416_v52, %v4418_v12  ;;  %v3647_v11 = vpop.f32.mrb[222].mxu1 }
 0x567   : > { %v9033_v13 = vadd.f32 %v8838_v34, %v4683_v0  ;;  %v4492_v33 = vadd.f32 %v4419_v10, %v3636_v32  ;;  %v3649_v58 = vpop.f32.mrb[223].mxu1 }
 0x568   : > { %v4420_v27 = vrot.slane %v3649_v58, 1 }
 0x569   : > { %v4753_v56 = vadd.f32 %v4752_v18, %v9033_v13  ;;  %v4791_v2 = vmul.f32 %v9033_v13, %v9033_v13  ;;  %v4684_v23 = vadd.f32 %v8803_v29, %v4492_v33 }
 0x56a   : > { %v3653_v6 = vpop.f32.mrb[224].mxu1 }
 0x56b   : > { %v4822_v35 = vadd.f32 %v4821_v4, %v4791_v2  ;;  %v9040_v7 = vadd.f32 %v8838_v34, %v4684_v23  ;;  %v3655_v55 = vpop.f32.mrb[225].mxu1 }
 0x56c   : > { %v4421_v25 = vrot.slane %v3655_v55, 1 }
 0x56d   : > { %v4754_v40 = vadd.f32 %v4753_v56, %v9040_v7  ;;  %v4792_v62 = vmul.f32 %v9040_v7, %v9040_v7 }
 0x56e   : > { %v4422_v46 = vsel %vm2037_vm2, %v4420_v27, %v4421_v25  ;;  %v3659_v54 = vpop.f32.mrb[226].mxu1 }
 0x56f   : > { %v4823_v32 = vadd.f32 %v4822_v35, %v4792_v62  ;;  %v4493_v16 = vadd.f32 %v4422_v46, %v3647_v11  ;;  %v3660_v22 = vpop.f32.mrb[227].mxu1 }
 0x570   : > { %v4423_v29 = vrot.slane %v3660_v22, 1 }
 0x571   : > { %v4685_v53 = vadd.f32 %v8812_v60, %v4493_v16 }
 0x572   : > { %v4424_v52 = vsel %vm2037_vm2, %v4421_v25, %v4423_v29  ;;  %v3664_v18 = vpop.f32.mrb[228].mxu1 }
 0x573   : > { %v9049_v1 = vadd.f32 %v8838_v34, %v4685_v53  ;;  %v4494_v57 = vadd.f32 %v4424_v52, %v3653_v6  ;;  %v3666_v24 = vpop.f32.mrb[229].mxu1 }
 0x574   : > { %v4425_v11 = vrot.slane %v3666_v24, 1 }
 0x575   : > { %v4755_v4 = vadd.f32 %v4754_v40, %v9049_v1  ;;  %v4793_v63 = vmul.f32 %v9049_v1, %v9049_v1  ;;  %v4686_v59 = vadd.f32 %v8815_v19, %v4494_v57 }
 0x576   : > { %v3670_v12 = vpop.f32.mrb[230].mxu1 }
 0x577   : > { %v4824_v0 = vadd.f32 %v4823_v32, %v4793_v63  ;;  %v9056_v10 = vadd.f32 %v8838_v34, %v4686_v59  ;;  %v3672_v60 = vpop.f32.mrb[231].mxu1 }
 0x578   : > { %v4426_v33 = vrot.slane %v3672_v60, 1 }
 0x579   : > { %v4756_v58 = vadd.f32 %v4755_v4, %v9056_v10  ;;  %v4794_v56 = vmul.f32 %v9056_v10, %v9056_v10 }
 0x57a   : > { %v4427_v2 = vsel %vm2037_vm2, %v4425_v11, %v4426_v33  ;;  %v3676_v23 = vpop.f32.mrb[232].mxu1 }
 0x57b   : > { %v4825_v6 = vadd.f32 %v4824_v0, %v4794_v56  ;;  %v4495_v35 = vadd.f32 %v4427_v2, %v3664_v18  ;;  %v3677_v55 = vpop.f32.mrb[233].mxu1 }
 0x57c   : > { %v4428_v19 = vrot.slane %v3677_v55, 1 }
 0x57d   : > { %v4687_v27 = vadd.f32 %v8823_v41, %v4495_v35 }
 0x57e   : > { %v4429_v25 = vsel %vm2037_vm2, %v4426_v33, %v4428_v19  ;;  %v3681_v40 = vpop.f32.mrb[234].mxu1 }
 0x57f   : > { %v9065_v62 = vadd.f32 %v8838_v34, %v4687_v27  ;;  %v4496_v46 = vadd.f32 %v4429_v25, %v3670_v12  ;;  %v3683_v54 = vpop.f32.mrb[235].mxu1 }
 0x580   : > { %v4430_v18 = vrot.slane %v3683_v54, 1 }
 0x581   : > { %v4757_v32 = vadd.f32 %v4756_v58, %v9065_v62  ;;  %v4795_v16 = vmul.f32 %v9065_v62, %v9065_v62  ;;  %v4688_v22 = vadd.f32 %v8829_v8, %v4496_v46 }
 0x582   : > { %v3687_v29 = vpop.f32.mrb[236].mxu1 }
 0x583   : > { %v4826_v53 = vadd.f32 %v4825_v6, %v4795_v16  ;;  %v9072_v52 = vadd.f32 %v8838_v34, %v4688_v22  ;;  %v3689_v41 = vpop.f32.mrb[237].mxu1 }
 0x584   : > { %v4431_v57 = vrot.slane %v3689_v41, 1 }
 0x585   : > { %v4758_v24 = vadd.f32 %v4757_v32, %v9072_v52  ;;  %v4796_v4 = vmul.f32 %v9072_v52, %v9072_v52 }
 0x586   : > { %v4432_v63 = vsel %vm2037_vm2, %v4430_v18, %v4431_v57  ;;  %v3693_v59 = vpop.f32.mrb[238].mxu1 }
 0x587   : > { %v4827_v12 = vadd.f32 %v4826_v53, %v4796_v4  ;;  %v4497_v0 = vadd.f32 %v4432_v63, %v3681_v40  ;;  %v3694_v60 = vpop.f32.mrb[239].mxu1 }
 0x588   : > { %v4433_v8 = vrot.slane %v3694_v60, 1 }
 0x589   : > { %v4689_v11 = vadd.f32 %v8846_v39, %v4497_v0 }
 0x58a   : > { %v4434_v33 = vsel %vm2037_vm2, %v4431_v57, %v4433_v8 }
 0x58b   : > { %v9081_v58 = vadd.f32 %v8838_v34, %v4689_v11  ;;  %v4498_v56 = vadd.f32 %v4434_v33, %v3687_v29 }
 0x58d   : > { %v4759_v2 = vadd.f32 %v4758_v24, %v9081_v58  ;;  %v4797_v23 = vmul.f32 %v9081_v58, %v9081_v58  ;;  %v4690_v6 = vadd.f32 %v8849_v45, %v4498_v56 }
 0x58f   : > { %v4828_v35 = vadd.f32 %v4827_v12, %v4797_v23  ;;  %v4729_v55 = vadd.f32 %v8838_v34, %v4690_v6 }
 0x591   : > { %v4760_v19 = vadd.f32 %v4759_v2, %v4729_v55  ;;  %v4798_v27 = vmul.f32 %v4729_v55, %v4729_v55 }
 0x593   : > { %v4761_v25 = vrot.slane %v4760_v19, 4  ;;  %v4829_v39 = vadd.f32 %v4828_v35, %v4798_v27 }
 0x595   : > { %v4762_v40 = vadd.f32 %v4761_v25, %v4760_v19  ;;  %v4830_v46 = vrot.slane %v4829_v39, 4  ;;  %v6058_v25 = vld [vmem:[%s6468_s6 + $0xf8] sm:$0xff] }
 0x597   : > { %v4763_v54 = vrot.slane %v4762_v40, 2  ;;  %v4831_v32 = vadd.f32 %v4830_v46, %v4829_v39 }
 0x599   : > { %v4764_v16 = vadd.f32 %v4763_v54, %v4762_v40  ;;  %v4832_v22 = vrot.slane %v4831_v32, 2 }
 0x59b   : > { %v4765_v29 = vrot.slane %v4764_v16, 1  ;;  %v4833_v53 = vadd.f32 %v4832_v22, %v4831_v32 }
 0x59d   : > { %v4766_v41 = vadd.f32 %v4765_v29, %v4764_v16  ;;  %v4834_v18 = vrot.slane %v4833_v53, 1 }
 0x59f   : > { %v4835_v57 = vadd.f32 %v4834_v18, %v4833_v53  ;;  %v9088_v24 = vmul.f32 0.00390625, %v4766_v41 }
 0x5a1   : > { %v4837_v45 = vmul.f32 0.00390625, %v4835_v57  ;;  %v4838_v34 = vmul.f32 %v9088_v24, %v9088_v24  ;;  %v4872_v4 = vsub.f32 %v4729_v55, %v9088_v24  ;;  %v4862_v0 = vsub.f32 %v9004_v5, %v9088_v24 }
 0x5a2   : > { %v4863_v60 = vsub.f32 %v9017_v14, %v9088_v24  ;;  %v4864_v8 = vsub.f32 %v9024_v37, %v9088_v24  ;;  %v4865_v11 = vsub.f32 %v9033_v13, %v9088_v24  ;;  %v4866_v33 = vsub.f32 %v9040_v7, %v9088_v24 }
 0x5a3   : > { %v4839_v63 = vsub.f32 %v4837_v45, %v4838_v34  ;;  %v4867_v56 = vsub.f32 %v9049_v1, %v9088_v24  ;;  %v4868_v2 = vsub.f32 %v9056_v10, %v9088_v24  ;;  %v4869_v5 = vsub.f32 %v9065_v62, %v9088_v24 }
 0x5a4   : > { %v4870_v14 = vsub.f32 %v9072_v52, %v9088_v24  ;;  %v4871_v37 = vsub.f32 %v9081_v58, %v9088_v24  ;;  %v4841_v13 = vsub.f32 %v8853_v20, %v9088_v24  ;;  %v4842_v7 = vsub.f32 %v8843_v43, %v9088_v24 }
 0x5a5   : > { %v4840_v59 = vmax.f32 %v4839_v63, 0.0  ;;  %v4843_v1 = vsub.f32 %v8857_v38, %v9088_v24  ;;  %v4844_v10 = vsub.f32 %v8866_v36, %v9088_v24  ;;  %v4845_v62 = vsub.f32 %v8874_v49, %v9088_v24 }
 0x5a6   : > { %v4846_v52 = vsub.f32 %v8883_v3, %v9088_v24  ;;  %v4847_v58 = vsub.f32 %v8890_v15, %v9088_v24  ;;  %v4848_v20 = vsub.f32 %v8901_v31, %v9088_v24  ;;  %v4849_v43 = vsub.f32 %v8908_v48, %v9088_v24 }
 0x5a7   : > { %v4873_v12 = vadd.f32 1e-05, %v4840_v59  ;;  %v4850_v38 = vsub.f32 %v8916_v50, %v9088_v24  ;;  %v4851_v36 = vsub.f32 %v8923_v9, %v9088_v24  ;;  %v4852_v49 = vsub.f32 %v8931_v17, %v9088_v24 }
 0x5a8   : > { %v4853_v3 = vsub.f32 %v8939_v42, %v9088_v24  ;;  %v4854_v15 = vsub.f32 %v8947_v30, %v9088_v24  ;;  %v4855_v31 = vsub.f32 %v8955_v61, %v9088_v24  ;;  %v4856_v48 = vsub.f32 %v8962_v28, %v9088_v24 }
 0x5a9   : > { %6056 = vrsqrt.f32 %v4873_v12  ;;  %v4857_v50 = vsub.f32 %v8971_v51, %v9088_v24  ;;  %v4858_v17 = vsub.f32 %v8977_v26, %v9088_v24  ;;  %v4859_v42 = vsub.f32 %v8985_v44, %v9088_v24 }
 0x5aa   : > { %v4860_v30 = vsub.f32 %v8991_v47, %v9088_v24  ;;  %v4861_v61 = vsub.f32 %v8998_v21, %v9088_v24 }
 0x5b3   : > { %v6057_v9 = vpop.eup %6056 }
 0x5b4   : > { %v4906_v23 = vmul.f32 %v6057_v9, %v4872_v4  ;;  %v4875_v6 = vmul.f32 %v6057_v9, %v4841_v13  ;;  %v4876_v28 = vmul.f32 %v6057_v9, %v4842_v7  ;;  %v4877_v35 = vmul.f32 %v6057_v9, %v4843_v1  ;;  %v6061_v7 = vld [vmem:[%s6468_s6 + $0x10] sm:$0xff]  ;;  %v6062_v1 = vld [vmem:[%s6468_s6 + $0x18] sm:$0xff] }
 0x5b5   : > { %v4878_v55 = vmul.f32 %v6057_v9, %v4844_v10  ;;  %v4879_v51 = vmul.f32 %v6057_v9, %v4845_v62  ;;  %v4880_v19 = vmul.f32 %v6057_v9, %v4846_v52  ;;  %v4881_v27 = vmul.f32 %v6057_v9, %v4847_v58  ;;  %v6064_v10 = vld [vmem:[%s6468_s6 + $0x28] sm:$0xff]  ;;  %v6065_v62 = vld [vmem:[%s6468_s6 + $0x30] sm:$0xff]  ;;  %v6066_v58 = vld [vmem:[%s6468_s6 + $0x38] sm:$0xff] }
 0x5b6   : > { %v4938_v26 = vadd.f32 %v6058_v25, %v4906_v23  ;;  %v4882_v39 = vmul.f32 %v6057_v9, %v4848_v20  ;;  %v4883_v40 = vmul.f32 %v6057_v9, %v4849_v43  ;;  %v4884_v44 = vmul.f32 %v6057_v9, %v4850_v38  ;;  %v6067_v43 = vld [vmem:[%s6468_s6 + $0x40] sm:$0xff]  ;;  %v6074_v23 = vld [vmem:[%s6468_s6 + $0x78] sm:$0xff] }
 0x5b7   : > { %v4885_v46 = vmul.f32 %v6057_v9, %v4851_v36  ;;  %v4886_v54 = vmul.f32 %v6057_v9, %v4852_v49  ;;  %v4887_v47 = vmul.f32 %v6057_v9, %v4853_v3  ;;  %v4888_v32 = vmul.f32 %v6057_v9, %v4854_v15  ;;  %v6068_v36 = vld [vmem:[%s6468_s6 + $0x48] sm:$0xff]  ;;  %v6069_v3 = vld [vmem:[%s6468_s6 + $0x50] sm:$0xff]  ;;  %v6078_v25 = vld [vmem:[%s6468_s6 + $0x98] sm:$0xff] }
 0x5b8   : > { %4970 = vst [vmem:[%s9158_s11 + $0xf8] sm:$0xff] %v4938_v26  ;;  %v4889_v21 = vmul.f32 %v6057_v9, %v4855_v31  ;;  %v4890_v16 = vmul.f32 %v6057_v9, %v4856_v48  ;;  %v4891_v22 = vmul.f32 %v6057_v9, %v4857_v50  ;;  %v4892_v29 = vmul.f32 %v6057_v9, %v4858_v17  ;;  %v6070_v31 = vld [vmem:[%s6468_s6 + $0x58] sm:$0xff]  ;;  %v6071_v50 = vld [vmem:[%s6468_s6 + $0x60] sm:$0xff]  ;;  %v6072_v17 = vld [vmem:[%s6468_s6 + $0x68] sm:$0xff] }
 0x5b9   : > { %v4893_v53 = vmul.f32 %v6057_v9, %v4859_v42  ;;  %v9161_v41 = vmul.f32 %v6057_v9, %v4860_v30  ;;  %v9163_v18 = vmul.f32 %v6057_v9, %v4861_v61  ;;  %v9165_v57 = vmul.f32 %v6057_v9, %v4862_v0  ;;  %v6073_v30 = vld [vmem:[%s6468_s6 + $0x70] sm:$0xff] }
 0x5ba   : > { %v9167_v24 = vmul.f32 %v6057_v9, %v4863_v60  ;;  %v9169_v45 = vmul.f32 %v6057_v9, %v4864_v8  ;;  %v9171_v34 = vmul.f32 %v6057_v9, %v4865_v11  ;;  %v9173_v4 = vmul.f32 %v6057_v9, %v4866_v33  ;;  %v6059_v8 = vld [vmem:[%s6468_s6] sm:$0xff]  ;;  %v6060_v11 = vld [vmem:[%s6468_s6 + $0x8] sm:$0xff] }
 0x5bb   : > { %v9175_v63 = vmul.f32 %v6057_v9, %v4867_v56  ;;  %v9177_v59 = vmul.f32 %v6057_v9, %v4868_v2  ;;  %v9179_v12 = vmul.f32 %v6057_v9, %v4869_v5  ;;  %v9181_v0 = vmul.f32 %v6057_v9, %v4870_v14  ;;  %v6063_v5 = vld [vmem:[%s6468_s6 + $0x20] sm:$0xff] }
 0x5bc   : > { %v9183_v60 = vmul.f32 %v6057_v9, %v4871_v37  ;;  %v4907_v13 = vadd.f32 %v6059_v8, %v4875_v6  ;;  %v4908_v33 = vadd.f32 %v6060_v11, %v4876_v28  ;;  %v4909_v56 = vadd.f32 %v6061_v7, %v4877_v35  ;;  %v6075_v28 = vld [vmem:[%s6468_s6 + $0x80] sm:$0xff]  ;;  %v6089_v8 = vld [vmem:[%s6468_s6 + $0xf0] sm:$0xff] }
 0x5bd   : > { %v4910_v2 = vadd.f32 %v6062_v1, %v4878_v55  ;;  %v4911_v14 = vadd.f32 %v6063_v5, %v4879_v51  ;;  %v4912_v37 = vadd.f32 %v6064_v10, %v4880_v19  ;;  %v4913_v52 = vadd.f32 %v6065_v62, %v4881_v27  ;;  %v6076_v55 = vld [vmem:[%s6468_s6 + $0x88] sm:$0xff]  ;;  %v6077_v19 = vld [vmem:[%s6468_s6 + $0x90] sm:$0xff] }
 0x5be   : > { %v4914_v20 = vadd.f32 %v6066_v58, %v4882_v39  ;;  %v4915_v38 = vadd.f32 %v6067_v43, %v4883_v40  ;;  %v4916_v49 = vadd.f32 %v6068_v36, %v4884_v44  ;;  %v4917_v15 = vadd.f32 %v6069_v3, %v4885_v46  ;;  %4939 = vst [vmem:[%s9158_s11] sm:$0xff] %v4907_v13  ;;  %v6079_v39 = vld [vmem:[%s6468_s6 + $0xa0] sm:$0xff]  ;;  %v6080_v44 = vld [vmem:[%s6468_s6 + $0xa8] sm:$0xff] }
 0x5bf   : > { %4940 = vst [vmem:[%s9158_s11 + $0x8] sm:$0xff] %v4908_v33  ;;  %4941 = vst [vmem:[%s9158_s11 + $0x10] sm:$0xff] %v4909_v56  ;;  %v4918_v48 = vadd.f32 %v6070_v31, %v4886_v54  ;;  %v4919_v9 = vadd.f32 %v6071_v50, %v4887_v47  ;;  %v4920_v42 = vadd.f32 %v6072_v17, %v4888_v32  ;;  %v6081_v54 = vld [vmem:[%s6468_s6 + $0xb0] sm:$0xff]  ;;  %v6082_v32 = vld [vmem:[%s6468_s6 + $0xb8] sm:$0xff] }
 0x5c0   : > { %v4921_v61 = vadd.f32 %v6073_v30, %v4889_v21  ;;  %4942 = vst [vmem:[%s9158_s11 + $0x18] sm:$0xff] %v4910_v2  ;;  %4943 = vst [vmem:[%s9158_s11 + $0x20] sm:$0xff] %v4911_v14  ;;  %v4922_v6 = vadd.f32 %v6074_v23, %v4890_v16  ;;  %v4923_v35 = vadd.f32 %v6075_v28, %v4891_v22  ;;  %v6083_v16 = vld [vmem:[%s6468_s6 + $0xc0] sm:$0xff] }
 0x5c1   : > { %4944 = vst [vmem:[%s9158_s11 + $0x28] sm:$0xff] %v4912_v37  ;;  %4945 = vst [vmem:[%s9158_s11 + $0x30] sm:$0xff] %v4913_v52  ;;  %v4924_v51 = vadd.f32 %v6076_v55, %v4892_v29  ;;  %v4925_v27 = vadd.f32 %v6077_v19, %v4893_v53  ;;  %v4926_v26 = vadd.f32 %v6078_v25, %v9161_v41  ;;  %v6084_v29 = vld [vmem:[%s6468_s6 + $0xc8] sm:$0xff]  ;;  %v6085_v41 = vld [vmem:[%s6468_s6 + $0xd0] sm:$0xff] }
 0x5c2   : > { %4946 = vst [vmem:[%s9158_s11 + $0x38] sm:$0xff] %v4914_v20  ;;  %4947 = vst [vmem:[%s9158_s11 + $0x40] sm:$0xff] %v4915_v38  ;;  %v4927_v40 = vadd.f32 %v6079_v39, %v9163_v18  ;;  %v4928_v46 = vadd.f32 %v6080_v44, %v9165_v57  ;;  %v4929_v47 = vadd.f32 %v6081_v54, %v9167_v24  ;;  %v6086_v57 = vld [vmem:[%s6468_s6 + $0xd8] sm:$0xff] }
 0x5c3   : > { %4948 = vst [vmem:[%s9158_s11 + $0x48] sm:$0xff] %v4916_v49  ;;  %4949 = vst [vmem:[%s9158_s11 + $0x50] sm:$0xff] %v4917_v15  ;;  %v4930_v21 = vadd.f32 %v6082_v32, %v9169_v45  ;;  %v4931_v22 = vadd.f32 %v6083_v16, %v9171_v34  ;;  %v4932_v53 = vadd.f32 %v6084_v29, %v9173_v4  ;;  %v6087_v45 = vld [vmem:[%s6468_s6 + $0xe0] sm:$0xff]  ;;  %v6088_v4 = vld [vmem:[%s6468_s6 + $0xe8] sm:$0xff] }
 0x5c4   : > { %4950 = vst [vmem:[%s9158_s11 + $0x58] sm:$0xff] %v4918_v48  ;;  %4951 = vst [vmem:[%s9158_s11 + $0x60] sm:$0xff] %v4919_v9  ;;  %v4933_v18 = vadd.f32 %v6085_v41, %v9175_v63  ;;  %v4934_v24 = vadd.f32 %v6086_v57, %v9177_v59  ;;  %v4935_v34 = vadd.f32 %v6087_v45, %v9179_v12 }
 0x5c5   : > { %4952 = vst [vmem:[%s9158_s11 + $0x68] sm:$0xff] %v4920_v42  ;;  %4953 = vst [vmem:[%s9158_s11 + $0x70] sm:$0xff] %v4921_v61  ;;  %v4936_v63 = vadd.f32 %v6088_v4, %v9181_v0  ;;  %v4937_v13 = vadd.f32 %v6089_v8, %v9183_v60 }
 0x5c6   : > { %4954 = vst [vmem:[%s9158_s11 + $0x78] sm:$0xff] %v4922_v6  ;;  %4955 = vst [vmem:[%s9158_s11 + $0x80] sm:$0xff] %v4923_v35 }
 0x5c7   : > { %4956 = vst [vmem:[%s9158_s11 + $0x88] sm:$0xff] %v4924_v51  ;;  %4957 = vst [vmem:[%s9158_s11 + $0x90] sm:$0xff] %v4925_v27 }
 0x5c8   : > { %4958 = vst [vmem:[%s9158_s11 + $0x98] sm:$0xff] %v4926_v26  ;;  %4959 = vst [vmem:[%s9158_s11 + $0xa0] sm:$0xff] %v4927_v40 }
 0x5c9   : > { %4960 = vst [vmem:[%s9158_s11 + $0xa8] sm:$0xff] %v4928_v46  ;;  %4961 = vst [vmem:[%s9158_s11 + $0xb0] sm:$0xff] %v4929_v47 }
 0x5ca   : > { %4962 = vst [vmem:[%s9158_s11 + $0xb8] sm:$0xff] %v4930_v21  ;;  %4963 = vst [vmem:[%s9158_s11 + $0xc0] sm:$0xff] %v4931_v22 }
 0x5cb   : > { %4964 = vst [vmem:[%s9158_s11 + $0xc8] sm:$0xff] %v4932_v53  ;;  %4965 = vst [vmem:[%s9158_s11 + $0xd0] sm:$0xff] %v4933_v18 }
 0x5cc   : > { %4966 = vst [vmem:[%s9158_s11 + $0xd8] sm:$0xff] %v4934_v24  ;;  %4967 = vst [vmem:[%s9158_s11 + $0xe0] sm:$0xff] %v4935_v34 }
 0x5cd   : > { %4968 = vst [vmem:[%s9158_s11 + $0xe8] sm:$0xff] %v4936_v63  ;;  %4969 = vst [vmem:[%s9158_s11 + $0xf0] sm:$0xff] %v4937_v13 }
 0x5ce   : > { %6189 = shalt.err (!%p6186_p2)
}
 0x5cf   : > { %s6190_s6 = scalar_lea.hbm %s9246_s9, 4096  ;;  %s6194_s8 = scalar_lea.hbm %s9319_s5, 8192 }
 0x5d0   : > { %p6191_p13 = scmp.ne.s32.totalorder %s9246_s9, %s6190_s6  ;;  %p6195_p4 = scmp.lt.u32.totalorder %s9246_s9, %s9319_s5 }
 0x5d1   : > { %p6196_p5 = scmp.lt.u32.totalorder %s6194_s8, %s6190_s6  ;;  %p6198_p11 = scmp.lt.u32.totalorder %s6190_s6, %s9246_s9 }
 0x5d2   : > { %p6192_p6 = pnand %p6191_p13, %p9476_p0 }
 0x5d3   : > { %p6197_p8 = por %p6196_p5, %p6195_p4 }
 0x5d4   : > { %p6193_p10 = pneg %p6192_p6 }
 0x5d5   : > { %p6199_p1 = por %p6198_p11, %p6197_p8 }
 0x5d7   : > { %p6200_p3 = pnand %p6199_p1, %p6193_p10 }
 0x5d9   : > { %6203 = shalt.err (!%p6200_p3)
}
 0x5da   : > { %s6258_s28 = smov 128   ;;  %s6259_s15 = smov 8  }
 0x5db   : > { %5989 = dma.vmem_to_hbm [thread:$0]  (%p9476_p0), %s9250_s30, 4096, %s9246_s9, %s4972_s22, %s6258_s28, %s6258_s28, %s6259_s15  }
 0x5dc PF: > { %s5000_s16 = sand.u32 1, %s6234_s18   ;;  %p9477_p7 = scmp.ne.s32.totalorder %s9374_s25, 0 }
 0x5dd   : > { %p9478_p9 = scmp.ge.s32.totalorder %s6246_s21, 2  ;;  %s5001_s12 = scalar_lea.sflag [#allocation4], %s5000_s16 }
 0x5df   : > { %p6003_p12 = pnand %p9478_p9, %p9477_p7 }
 0x5e1   : > { %6229 = dma.done.wait (!%p6003_p12), %s5001_s12, 4096  }
 0x5e2   : > { %6231 = vsyncadd (!%p6003_p12), %s5001_s12, 4294963200  ;;  %p19_p2 = scmp.ge.s32.totalorder %s6400_s14, 4   ;;  %s9479_s18 = smov %s6238_s19 }
 0x5e3   : > { %s9480_s19 = smov %s6242_s20  ;;  %s9481_s20 = smov %s6416_s27 }
 0x5e4   : > { %s9482_s21 = smov %s6400_s14  ;;  %21 = sbr.rel (!%p19_p2) target bundleno = 6 (0x6), region = 93 }
 0x5eb   :  { %5006 = vsyncpa [#allocation3], 1 }
 0x5ec   :  { %5008 = vsyncpa [#allocation3 + $0x1], 1 }
 0x5ed   :  { %5009 = vsyncpa [#allocation6], 1 }
 0x5ee   :  { %5010 = vsyncpa [#allocation4], 1 }
 0x5ef   :  { %5012 = vsyncpa [#allocation4 + $0x1], 1 }

</bundles_post_ra>
